<compile_context>
chip_gen: v5e
topology: v5e:2x2
jax: 0.10.0
libtpu: 0.0.40
codegen_flags: <defaults>
</compile_context>

<pallas_src>
import functools

import jax
import jax.numpy as jnp
from jax import lax
from jax.experimental import pallas as pl
from jax.experimental.pallas import tpu as pltpu

LANE = 128
SUBLANE = 8
EPS = 1e-5


def _round_up(x, m):
    return (x + m - 1) // m * m


def _pick_tile_rows(h, w, n, max_rows=512, min_grid=4):
    """Rows-per-tile: biggest divisor of H whose tile fits the row budget,
    shrunk (if possible) until the grid has enough steps to pipeline / feed
    both TensorCores."""
    divisors = [d for d in range(1, h + 1) if h % d == 0]
    fitting = [d for d in divisors if d * w <= max_rows]
    tr = max(fitting) if fitting else 1
    while n * (h // tr) < min_grid:
        smaller = [d for d in divisors if d < tr]
        if not smaller:
            break
        tr = max(smaller)
    return tr


# ----------------------- kernel 1: 3x3 conv + BN partial stats ----------------
def conv_stats_kernel(slab_ref, w_ref, b_ref, ml_ref, mr_ref,
                      out_ref, sum_ref, ssq_ref, *, w_img, rows_out):
    """One row-tile of a 3x3 'same' conv as 9 shifted MXU matmuls.

    slab_ref: (1, rows_out + 4*w_img, Cin)  flattened pixel rows with halo
    w_ref:    (9, Cin, Cout)                 (ky*3+kx, cin, cout)
    b_ref:    (1, Cout)
    ml/mr_ref:(rows_out, 1)  0/1 masks killing row-wrap neighbours for dx=-1/+1
    out_ref:  (1, rows_out, Cout)            conv output (pre-BN, bias added)
    sum_ref / ssq_ref: (1, 1, Cout)          per-tile BN partial sums
    """
    c_out = w_ref.shape[-1]
    acc = jnp.zeros((rows_out, c_out), jnp.float32)
    k = 0
    for dy in (-1, 0, 1):
        for dx in (-1, 0, 1):
            start = 2 * w_img + dy * w_img + dx           # static python int
            xs = slab_ref[0, pl.ds(start, rows_out), :]   # (rows_out, Cin)
            if dx == -1:
                xs = xs * ml_ref[...]
            elif dx == 1:
                xs = xs * mr_ref[...]
            acc = acc + jnp.dot(xs, w_ref[k], preferred_element_type=jnp.float32)
            k += 1
    acc = acc + b_ref[...]
    out_ref[0] = acc
    sum_ref[0] = jnp.sum(acc, axis=0, keepdims=True)
    ssq_ref[0] = jnp.sum(acc * acc, axis=0, keepdims=True)


# ----------------------- kernel 2: fused BN affine + ReLU ----------------------
def bn_relu_kernel(x_ref, scale_ref, shift_ref, o_ref):
    """o = relu(x * scale + shift); scale/shift already fold mean/var/gamma/beta."""
    o_ref[...] = jnp.maximum(x_ref[...] * scale_ref[...] + shift_ref[...], 0.0)


# ------------------------------ one conv block ---------------------------------
def _conv3x3_bn_relu_block(x_nhwc, w_hwio, bias, gamma, beta, *, tile_rows):
    """Conv2d(3x3, pad=1) + BatchNorm2d (training stats) + ReLU.

    x_nhwc: (N, H, W, Cin) f32, channels already padded as desired.
    w_hwio: (3, 3, Cin, Cout); bias/gamma/beta: (Cout,). Returns (N, H, W, Cout).
    """
    n, h, w, cin = x_nhwc.shape
    cout = w_hwio.shape[-1]
    tr = tile_rows
    assert h % tr == 0
    t = h // tr
    trw = tr * w                    # output pixel-rows per grid step
    sr = trw + 4 * w                # slab rows (2*W halo on each side)
    hw = h * w
    nt = n * t

    # Static VMEM budget check (double-buffered), sized for the smallest scoped
    # default (16 MiB on v5e); shrink tile_rows if this ever trips.
    est = 2 * 4 * (sr * cin + 9 * cin * cout + cout + 2 * trw
                   + trw * cout + 2 * cout)
    assert est < 16 * 1024 * 1024, f"tile working set too large: {est} bytes"

    # Flatten spatial, add 2*W zero halo rows top/bottom (covers dy=+-1 and the
    # +-1 element dx shift at image boundaries).
    flat = x_nhwc.reshape(n, hw, cin)
    flat = jnp.pad(flat, ((0, 0), (2 * w, 2 * w), (0, 0)))
    # Overlapping row-tile slabs (halo duplication factor (trw+4w)/trw only).
    slabs = jnp.stack([flat[:, i * trw:i * trw + sr, :] for i in range(t)],
                      axis=1).reshape(nt, sr, cin)

    # dx row-wrap masks; identical for every tile since trw % w == 0.
    col = jnp.arange(trw, dtype=jnp.int32) % w
    mleft = (col != 0).astype(jnp.float32).reshape(trw, 1)
    mright = (col != w - 1).astype(jnp.float32).reshape(trw, 1)

    w9 = w_hwio.reshape(9, cin, cout)
    b2 = bias.reshape(1, cout)

    kernel1 = functools.partial(conv_stats_kernel, w_img=w, rows_out=trw)
    conv_out, psum, psq = pl.pallas_call(
        kernel1,
        grid_spec=pltpu.PrefetchScalarGridSpec(
            num_scalar_prefetch=0,
            grid=(nt,),
            in_specs=[
                pl.BlockSpec((1, sr, cin), lambda i: (i, 0, 0)),
                pl.BlockSpec((9, cin, cout), lambda i: (0, 0, 0)),
                pl.BlockSpec((1, cout), lambda i: (0, 0)),
                pl.BlockSpec((trw, 1), lambda i: (0, 0)),
                pl.BlockSpec((trw, 1), lambda i: (0, 0)),
            ],
            out_specs=(
                pl.BlockSpec((1, trw, cout), lambda i: (i, 0, 0)),
                pl.BlockSpec((1, 1, cout), lambda i: (i, 0, 0)),
                pl.BlockSpec((1, 1, cout), lambda i: (i, 0, 0)),
            ),
        ),
        out_shape=(
            jax.ShapeDtypeStruct((nt, trw, cout), jnp.float32),
            jax.ShapeDtypeStruct((nt, 1, cout), jnp.float32),
            jax.ShapeDtypeStruct((nt, 1, cout), jnp.float32),
        ),
        compiler_params=pltpu.CompilerParams(dimension_semantics=("parallel",)),
    )(slabs, w9, b2, mleft, mright)

    # Cross-tile BatchNorm reduction (tiny (nt, C) tensors -> plain JAX).
    m = jnp.float32(n * hw)
    total = jnp.sum(psum[:, 0, :], axis=0)
    total_sq = jnp.sum(psq[:, 0, :], axis=0)
    mean = total / m
    var = jnp.maximum(total_sq / m - mean * mean, 0.0)   # biased var (PyTorch train)
    scale = gamma * lax.rsqrt(var + EPS)
    shift = beta - mean * scale

    y = pl.pallas_call(
        bn_relu_kernel,
        grid_spec=pltpu.PrefetchScalarGridSpec(
            num_scalar_prefetch=0,
            grid=(nt,),
            in_specs=[
                pl.BlockSpec((1, trw, cout), lambda i: (i, 0, 0)),
                pl.BlockSpec((1, cout), lambda i: (0, 0)),
                pl.BlockSpec((1, cout), lambda i: (0, 0)),
            ],
            out_specs=pl.BlockSpec((1, trw, cout), lambda i: (i, 0, 0)),
        ),
        out_shape=jax.ShapeDtypeStruct((nt, trw, cout), jnp.float32),
        compiler_params=pltpu.CompilerParams(dimension_semantics=("parallel",)),
    )(conv_out, scale.reshape(1, cout), shift.reshape(1, cout))

    return y.reshape(n, h, w, cout)


# --------------------------------- DoubleConv ----------------------------------
@jax.jit
def double_conv(x_nchw, params):
    """Forward pass of DoubleConv. Input/output in NCHW like PyTorch."""
    x = jnp.transpose(x_nchw, (0, 2, 3, 1)).astype(jnp.float32)    # -> NHWC
    n, h, w, cin = x.shape
    c_out = params["w1"].shape[-1]

    cin_p = _round_up(cin, SUBLANE)   # sublane-align conv-1 contraction dim
    c_pad = _round_up(c_out, LANE)    # lane-dense output channels
    tr = _pick_tile_rows(h, w, n)

    # ---- block 1 ----
    x_p = jnp.pad(x, ((0, 0), (0, 0), (0, 0), (0, cin_p - cin)))
    w1 = jnp.pad(params["w1"],
                 ((0, 0), (0, 0), (0, cin_p - cin), (0, c_pad - c_out)))
    b1 = jnp.pad(params["b1"], (0, c_pad - c_out))
    g1 = jnp.pad(params["g1"], (0, c_pad - c_out))
    be1 = jnp.pad(params["beta1"], (0, c_pad - c_out))
    y1 = _conv3x3_bn_relu_block(x_p, w1, b1, g1, be1, tile_rows=tr)

    # ---- block 2 (consumes the already channel-padded y1 directly) ----
    w2 = jnp.pad(params["w2"],
                 ((0, 0), (0, 0), (0, c_pad - c_out), (0, c_pad - c_out)))
    b2 = jnp.pad(params["b2"], (0, c_pad - c_out))
    g2 = jnp.pad(params["g2"], (0, c_pad - c_out))
    be2 = jnp.pad(params["beta2"], (0, c_pad - c_out))
    y2 = _conv3x3_bn_relu_block(y1, w2, b2, g2, be2, tile_rows=tr)

    y2 = y2[..., :c_out]
    return jnp.transpose(y2, (0, 3, 1, 2))                          # -> NCHW


# ------------------------------ pure-JAX reference ------------------------------
def _ref_block(x_nhwc, w_hwio, b, g, be):
    y = lax.conv_general_dilated(
        x_nhwc, w_hwio, window_strides=(1, 1), padding="SAME",
        dimension_numbers=("NHWC", "HWIO", "NHWC"))
    y = y + b
    mean = jnp.mean(y, axis=(0, 1, 2), keepdims=True)
    var = jnp.mean((y - mean) ** 2, axis=(0, 1, 2), keepdims=True)
    y = (y - mean) * lax.rsqrt(var + EPS) * g + be
    return jnp.maximum(y, 0.0)


def ref_double_conv(x_nchw, params):
    x = jnp.transpose(x_nchw, (0, 2, 3, 1)).astype(jnp.float32)
    y = _ref_block(x, params["w1"], params["b1"], params["g1"], params["beta1"])
    y = _ref_block(y, params["w2"], params["b2"], params["g2"], params["beta2"])
    return jnp.transpose(y, (0, 3, 1, 2))


# ------------------------------------ main --------------------------------------
if __name__ == "__main__":
    N, C_IN, C_OUT, H, W = 2, 4, 8, 16, 16

    key = jax.random.PRNGKey(0)
    kx, kw1, kb1, kw2, kb2 = jax.random.split(key, 5)

    x = jax.random.normal(kx, (N, C_IN, H, W), jnp.float32)         # NCHW like PyTorch

    # Synthetic parameters (shapes from nn.Conv2d / nn.BatchNorm2d).
    # Conv weights stored HWIO (ky, kx, cin, cout); BN params per out-channel.
    params = {
        "w1": jax.random.normal(kw1, (3, 3, C_IN, C_OUT), jnp.float32) * 0.1,
        "b1": jax.random.normal(kb1, (C_OUT,), jnp.float32) * 0.1,
        "g1": jnp.ones((C_OUT,), jnp.float32),       # BatchNorm default weight
        "beta1": jnp.zeros((C_OUT,), jnp.float32),   # BatchNorm default bias
        "w2": jax.random.normal(kw2, (3, 3, C_OUT, C_OUT), jnp.float32) * 0.1,
        "b2": jax.random.normal(kb2, (C_OUT,), jnp.float32) * 0.1,
        "g2": jnp.ones((C_OUT,), jnp.float32),
        "beta2": jnp.zeros((C_OUT,), jnp.float32),
    }

    out = jax.block_until_ready(double_conv(x, params))
    ref = jax.block_until_ready(ref_double_conv(x, params))

    assert out.shape == (N, C_OUT, H, W), out.shape
    if not jnp.allclose(out, ref, rtol=5e-4, atol=5e-4):
        max_err = float(jnp.max(jnp.abs(out - ref)))
        raise AssertionError(f"Pallas output mismatch vs reference, max|err|={max_err}")

    print("KERNEL_OK")
</pallas_src>

<mosaic_0001>
module attributes {stable_mosaic.version = 11 : i64} {
  func.func @conv_stats_kernel(%arg0: i32, %arg1: memref<1x192x8xf32, #tpu.memory_space<vmem>>, %arg2: memref<9x8x128xf32, #tpu.memory_space<vmem>>, %arg3: memref<1x128xf32, #tpu.memory_space<vmem>>, %arg4: memref<128x1xf32, #tpu.memory_space<vmem>>, %arg5: memref<128x1xf32, #tpu.memory_space<vmem>>, %arg6: memref<1x128x128xf32, #tpu.memory_space<vmem>>, %arg7: memref<1x1x128xf32, #tpu.memory_space<vmem>>, %arg8: memref<1x1x128xf32, #tpu.memory_space<vmem>>) attributes {dimension_semantics = [#tpu.dimension_semantics<parallel>], iteration_bounds = array<i64: 4>, scalar_prefetch = 0 : i64, scratch_operands = 0 : i64, tpu.core_type = #tpu.core_type<tc>, window_params = [{transform_indices = @transform_0, window_bounds = array<i64: 1, 192, 8>}, {pipeline_mode = #tpu.pipeline_mode<synchronous>, transform_indices = @transform_1, window_bounds = array<i64: 9, 8, 128>}, {pipeline_mode = #tpu.pipeline_mode<synchronous>, transform_indices = @transform_2, window_bounds = array<i64: 1, 128>}, {pipeline_mode = #tpu.pipeline_mode<synchronous>, transform_indices = @transform_3, window_bounds = array<i64: 128, 1>}, {pipeline_mode = #tpu.pipeline_mode<synchronous>, transform_indices = @transform_4, window_bounds = array<i64: 128, 1>}, {transform_indices = @transform_5, window_bounds = array<i64: 1, 128, 128>}, {transform_indices = @transform_6, window_bounds = array<i64: 1, 1, 128>}, {transform_indices = @transform_7, window_bounds = array<i64: 1, 1, 128>}]} {
    %cst = arith.constant 0.000000e+00 : f32
    %0 = vector.broadcast %cst : f32 to vector<128x128xf32>
    %c0 = arith.constant 0 : index
    %c15 = arith.constant 15 : index
    %c0_0 = arith.constant 0 : index
    %1 = vector.load %arg1[%c0, %c15, %c0_0] : memref<1x192x8xf32, #tpu.memory_space<vmem>>, vector<1x128x8xf32>
    %2 = vector.shape_cast %1 : vector<1x128x8xf32> to vector<128x8xf32>
    %c0_1 = arith.constant 0 : index
    %c0_2 = arith.constant 0 : index
    %3 = vector.load %arg4[%c0_1, %c0_2] : memref<128x1xf32, #tpu.memory_space<vmem>>, vector<128x1xf32>
    %4 = vector.broadcast %3 : vector<128x1xf32> to vector<128x8xf32>
    %5 = arith.mulf %2, %4 : vector<128x8xf32>
    %c0_3 = arith.constant 0 : index
    %c0_4 = arith.constant 0 : index
    %c0_5 = arith.constant 0 : index
    %6 = vector.load %arg2[%c0_3, %c0_4, %c0_5] : memref<9x8x128xf32, #tpu.memory_space<vmem>>, vector<1x8x128xf32>
    %7 = vector.shape_cast %6 : vector<1x8x128xf32> to vector<8x128xf32>
    %cst_6 = arith.constant dense<0.000000e+00> : vector<128x128xf32>
    %8 = tpu.matmul %5, %7, %cst_6 {dimension_numbers = #tpu.dot_dimension_numbers<[1], [0], [0], [1], [0, 0, 1, 1], [], []>} : vector<128x8xf32>, vector<8x128xf32>, vector<128x128xf32> -> vector<128x128xf32>
    %9 = arith.addf %0, %8 : vector<128x128xf32>
    %c0_7 = arith.constant 0 : index
    %c16 = arith.constant 16 : index
    %c0_8 = arith.constant 0 : index
    %10 = vector.load %arg1[%c0_7, %c16, %c0_8] : memref<1x192x8xf32, #tpu.memory_space<vmem>>, vector<1x128x8xf32>
    %11 = vector.shape_cast %10 : vector<1x128x8xf32> to vector<128x8xf32>
    %c1 = arith.constant 1 : index
    %c0_9 = arith.constant 0 : index
    %c0_10 = arith.constant 0 : index
    %12 = vector.load %arg2[%c1, %c0_9, %c0_10] : memref<9x8x128xf32, #tpu.memory_space<vmem>>, vector<1x8x128xf32>
    %13 = vector.shape_cast %12 : vector<1x8x128xf32> to vector<8x128xf32>
    %cst_11 = arith.constant dense<0.000000e+00> : vector<128x128xf32>
    %14 = tpu.matmul %11, %13, %cst_11 {dimension_numbers = #tpu.dot_dimension_numbers<[1], [0], [0], [1], [0, 0, 1, 1], [], []>} : vector<128x8xf32>, vector<8x128xf32>, vector<128x128xf32> -> vector<128x128xf32>
    %15 = arith.addf %9, %14 : vector<128x128xf32>
    %c0_12 = arith.constant 0 : index
    %c17 = arith.constant 17 : index
    %c0_13 = arith.constant 0 : index
    %16 = vector.load %arg1[%c0_12, %c17, %c0_13] : memref<1x192x8xf32, #tpu.memory_space<vmem>>, vector<1x128x8xf32>
    %17 = vector.shape_cast %16 : vector<1x128x8xf32> to vector<128x8xf32>
    %c0_14 = arith.constant 0 : index
    %c0_15 = arith.constant 0 : index
    %18 = vector.load %arg5[%c0_14, %c0_15] : memref<128x1xf32, #tpu.memory_space<vmem>>, vector<128x1xf32>
    %19 = vector.broadcast %18 : vector<128x1xf32> to vector<128x8xf32>
    %20 = arith.mulf %17, %19 : vector<128x8xf32>
    %c2 = arith.constant 2 : index
    %c0_16 = arith.constant 0 : index
    %c0_17 = arith.constant 0 : index
    %21 = vector.load %arg2[%c2, %c0_16, %c0_17] : memref<9x8x128xf32, #tpu.memory_space<vmem>>, vector<1x8x128xf32>
    %22 = vector.shape_cast %21 : vector<1x8x128xf32> to vector<8x128xf32>
    %cst_18 = arith.constant dense<0.000000e+00> : vector<128x128xf32>
    %23 = tpu.matmul %20, %22, %cst_18 {dimension_numbers = #tpu.dot_dimension_numbers<[1], [0], [0], [1], [0, 0, 1, 1], [], []>} : vector<128x8xf32>, vector<8x128xf32>, vector<128x128xf32> -> vector<128x128xf32>
    %24 = arith.addf %15, %23 : vector<128x128xf32>
    %c0_19 = arith.constant 0 : index
    %c31 = arith.constant 31 : index
    %c0_20 = arith.constant 0 : index
    %25 = vector.load %arg1[%c0_19, %c31, %c0_20] : memref<1x192x8xf32, #tpu.memory_space<vmem>>, vector<1x128x8xf32>
    %26 = vector.shape_cast %25 : vector<1x128x8xf32> to vector<128x8xf32>
    %c0_21 = arith.constant 0 : index
    %c0_22 = arith.constant 0 : index
    %27 = vector.load %arg4[%c0_21, %c0_22] : memref<128x1xf32, #tpu.memory_space<vmem>>, vector<128x1xf32>
    %28 = vector.broadcast %27 : vector<128x1xf32> to vector<128x8xf32>
    %29 = arith.mulf %26, %28 : vector<128x8xf32>
    %c3 = arith.constant 3 : index
    %c0_23 = arith.constant 0 : index
    %c0_24 = arith.constant 0 : index
    %30 = vector.load %arg2[%c3, %c0_23, %c0_24] : memref<9x8x128xf32, #tpu.memory_space<vmem>>, vector<1x8x128xf32>
    %31 = vector.shape_cast %30 : vector<1x8x128xf32> to vector<8x128xf32>
    %cst_25 = arith.constant dense<0.000000e+00> : vector<128x128xf32>
    %32 = tpu.matmul %29, %31, %cst_25 {dimension_numbers = #tpu.dot_dimension_numbers<[1], [0], [0], [1], [0, 0, 1, 1], [], []>} : vector<128x8xf32>, vector<8x128xf32>, vector<128x128xf32> -> vector<128x128xf32>
    %33 = arith.addf %24, %32 : vector<128x128xf32>
    %c0_26 = arith.constant 0 : index
    %c32 = arith.constant 32 : index
    %c0_27 = arith.constant 0 : index
    %34 = vector.load %arg1[%c0_26, %c32, %c0_27] : memref<1x192x8xf32, #tpu.memory_space<vmem>>, vector<1x128x8xf32>
    %35 = vector.shape_cast %34 : vector<1x128x8xf32> to vector<128x8xf32>
    %c4 = arith.constant 4 : index
    %c0_28 = arith.constant 0 : index
    %c0_29 = arith.constant 0 : index
    %36 = vector.load %arg2[%c4, %c0_28, %c0_29] : memref<9x8x128xf32, #tpu.memory_space<vmem>>, vector<1x8x128xf32>
    %37 = vector.shape_cast %36 : vector<1x8x128xf32> to vector<8x128xf32>
    %cst_30 = arith.constant dense<0.000000e+00> : vector<128x128xf32>
    %38 = tpu.matmul %35, %37, %cst_30 {dimension_numbers = #tpu.dot_dimension_numbers<[1], [0], [0], [1], [0, 0, 1, 1], [], []>} : vector<128x8xf32>, vector<8x128xf32>, vector<128x128xf32> -> vector<128x128xf32>
    %39 = arith.addf %33, %38 : vector<128x128xf32>
    %c0_31 = arith.constant 0 : index
    %c33 = arith.constant 33 : index
    %c0_32 = arith.constant 0 : index
    %40 = vector.load %arg1[%c0_31, %c33, %c0_32] : memref<1x192x8xf32, #tpu.memory_space<vmem>>, vector<1x128x8xf32>
    %41 = vector.shape_cast %40 : vector<1x128x8xf32> to vector<128x8xf32>
    %c0_33 = arith.constant 0 : index
    %c0_34 = arith.constant 0 : index
    %42 = vector.load %arg5[%c0_33, %c0_34] : memref<128x1xf32, #tpu.memory_space<vmem>>, vector<128x1xf32>
    %43 = vector.broadcast %42 : vector<128x1xf32> to vector<128x8xf32>
    %44 = arith.mulf %41, %43 : vector<128x8xf32>
    %c5 = arith.constant 5 : index
    %c0_35 = arith.constant 0 : index
    %c0_36 = arith.constant 0 : index
    %45 = vector.load %arg2[%c5, %c0_35, %c0_36] : memref<9x8x128xf32, #tpu.memory_space<vmem>>, vector<1x8x128xf32>
    %46 = vector.shape_cast %45 : vector<1x8x128xf32> to vector<8x128xf32>
    %cst_37 = arith.constant dense<0.000000e+00> : vector<128x128xf32>
    %47 = tpu.matmul %44, %46, %cst_37 {dimension_numbers = #tpu.dot_dimension_numbers<[1], [0], [0], [1], [0, 0, 1, 1], [], []>} : vector<128x8xf32>, vector<8x128xf32>, vector<128x128xf32> -> vector<128x128xf32>
    %48 = arith.addf %39, %47 : vector<128x128xf32>
    %c0_38 = arith.constant 0 : index
    %c47 = arith.constant 47 : index
    %c0_39 = arith.constant 0 : index
    %49 = vector.load %arg1[%c0_38, %c47, %c0_39] : memref<1x192x8xf32, #tpu.memory_space<vmem>>, vector<1x128x8xf32>
    %50 = vector.shape_cast %49 : vector<1x128x8xf32> to vector<128x8xf32>
    %c0_40 = arith.constant 0 : index
    %c0_41 = arith.constant 0 : index
    %51 = vector.load %arg4[%c0_40, %c0_41] : memref<128x1xf32, #tpu.memory_space<vmem>>, vector<128x1xf32>
    %52 = vector.broadcast %51 : vector<128x1xf32> to vector<128x8xf32>
    %53 = arith.mulf %50, %52 : vector<128x8xf32>
    %c6 = arith.constant 6 : index
    %c0_42 = arith.constant 0 : index
    %c0_43 = arith.constant 0 : index
    %54 = vector.load %arg2[%c6, %c0_42, %c0_43] : memref<9x8x128xf32, #tpu.memory_space<vmem>>, vector<1x8x128xf32>
    %55 = vector.shape_cast %54 : vector<1x8x128xf32> to vector<8x128xf32>
    %cst_44 = arith.constant dense<0.000000e+00> : vector<128x128xf32>
    %56 = tpu.matmul %53, %55, %cst_44 {dimension_numbers = #tpu.dot_dimension_numbers<[1], [0], [0], [1], [0, 0, 1, 1], [], []>} : vector<128x8xf32>, vector<8x128xf32>, vector<128x128xf32> -> vector<128x128xf32>
    %57 = arith.addf %48, %56 : vector<128x128xf32>
    %c0_45 = arith.constant 0 : index
    %c48 = arith.constant 48 : index
    %c0_46 = arith.constant 0 : index
    %58 = vector.load %arg1[%c0_45, %c48, %c0_46] : memref<1x192x8xf32, #tpu.memory_space<vmem>>, vector<1x128x8xf32>
    %59 = vector.shape_cast %58 : vector<1x128x8xf32> to vector<128x8xf32>
    %c7 = arith.constant 7 : index
    %c0_47 = arith.constant 0 : index
    %c0_48 = arith.constant 0 : index
    %60 = vector.load %arg2[%c7, %c0_47, %c0_48] : memref<9x8x128xf32, #tpu.memory_space<vmem>>, vector<1x8x128xf32>
    %61 = vector.shape_cast %60 : vector<1x8x128xf32> to vector<8x128xf32>
    %cst_49 = arith.constant dense<0.000000e+00> : vector<128x128xf32>
    %62 = tpu.matmul %59, %61, %cst_49 {dimension_numbers = #tpu.dot_dimension_numbers<[1], [0], [0], [1], [0, 0, 1, 1], [], []>} : vector<128x8xf32>, vector<8x128xf32>, vector<128x128xf32> -> vector<128x128xf32>
    %63 = arith.addf %57, %62 : vector<128x128xf32>
    %c0_50 = arith.constant 0 : index
    %c49 = arith.constant 49 : index
    %c0_51 = arith.constant 0 : index
    %64 = vector.load %arg1[%c0_50, %c49, %c0_51] : memref<1x192x8xf32, #tpu.memory_space<vmem>>, vector<1x128x8xf32>
    %65 = vector.shape_cast %64 : vector<1x128x8xf32> to vector<128x8xf32>
    %c0_52 = arith.constant 0 : index
    %c0_53 = arith.constant 0 : index
    %66 = vector.load %arg5[%c0_52, %c0_53] : memref<128x1xf32, #tpu.memory_space<vmem>>, vector<128x1xf32>
    %67 = vector.broadcast %66 : vector<128x1xf32> to vector<128x8xf32>
    %68 = arith.mulf %65, %67 : vector<128x8xf32>
    %c8 = arith.constant 8 : index
    %c0_54 = arith.constant 0 : index
    %c0_55 = arith.constant 0 : index
    %69 = vector.load %arg2[%c8, %c0_54, %c0_55] : memref<9x8x128xf32, #tpu.memory_space<vmem>>, vector<1x8x128xf32>
    %70 = vector.shape_cast %69 : vector<1x8x128xf32> to vector<8x128xf32>
    %cst_56 = arith.constant dense<0.000000e+00> : vector<128x128xf32>
    %71 = tpu.matmul %68, %70, %cst_56 {dimension_numbers = #tpu.dot_dimension_numbers<[1], [0], [0], [1], [0, 0, 1, 1], [], []>} : vector<128x8xf32>, vector<8x128xf32>, vector<128x128xf32> -> vector<128x128xf32>
    %72 = arith.addf %63, %71 : vector<128x128xf32>
    %c0_57 = arith.constant 0 : index
    %c0_58 = arith.constant 0 : index
    %73 = vector.load %arg3[%c0_57, %c0_58] : memref<1x128xf32, #tpu.memory_space<vmem>>, vector<1x128xf32>
    %74 = vector.broadcast %73 : vector<1x128xf32> to vector<128x128xf32>
    %75 = arith.addf %72, %74 : vector<128x128xf32>
    %c0_59 = arith.constant 0 : index
    %c0_60 = arith.constant 0 : index
    %c0_61 = arith.constant 0 : index
    %76 = vector.load %arg6[%c0_59, %c0_60, %c0_61] : memref<1x128x128xf32, #tpu.memory_space<vmem>>, vector<1x128x128xf32>
    %77 = vector.shape_cast %76 : vector<1x128x128xf32> to vector<128x128xf32>
    %78 = vector.shape_cast %75 : vector<128x128xf32> to vector<1x128x128xf32>
    tpu.vector_store %arg6[%c0_59, %c0_60, %c0_61], %78 {strides = array<i32>} : memref<1x128x128xf32, #tpu.memory_space<vmem>>, vector<1x128x128xf32>,
    %cst_62 = arith.constant dense<0.000000e+00> : vector<128xf32>
    %79 = vector.multi_reduction <add>, %75, %cst_62 [0] : vector<128x128xf32> to vector<128xf32>
    %80 = vector.shape_cast %79 : vector<128xf32> to vector<1x128xf32>
    %c0_63 = arith.constant 0 : index
    %c0_64 = arith.constant 0 : index
    %c0_65 = arith.constant 0 : index
    %81 = vector.load %arg7[%c0_63, %c0_64, %c0_65] : memref<1x1x128xf32, #tpu.memory_space<vmem>>, vector<1x1x128xf32>
    %82 = vector.shape_cast %81 : vector<1x1x128xf32> to vector<1x128xf32>
    %83 = vector.shape_cast %80 : vector<1x128xf32> to vector<1x1x128xf32>
    tpu.vector_store %arg7[%c0_63, %c0_64, %c0_65], %83 {strides = array<i32>} : memref<1x1x128xf32, #tpu.memory_space<vmem>>, vector<1x1x128xf32>,
    %84 = arith.mulf %75, %75 : vector<128x128xf32>
    %cst_66 = arith.constant dense<0.000000e+00> : vector<128xf32>
    %85 = vector.multi_reduction <add>, %84, %cst_66 [0] : vector<128x128xf32> to vector<128xf32>
    %86 = vector.shape_cast %85 : vector<128xf32> to vector<1x128xf32>
    %c0_67 = arith.constant 0 : index
    %c0_68 = arith.constant 0 : index
    %c0_69 = arith.constant 0 : index
    %87 = vector.load %arg8[%c0_67, %c0_68, %c0_69] : memref<1x1x128xf32, #tpu.memory_space<vmem>>, vector<1x1x128xf32>
    %88 = vector.shape_cast %87 : vector<1x1x128xf32> to vector<1x128xf32>
    %89 = vector.shape_cast %86 : vector<1x128xf32> to vector<1x1x128xf32>
    tpu.vector_store %arg8[%c0_67, %c0_68, %c0_69], %89 {strides = array<i32>} : memref<1x1x128xf32, #tpu.memory_space<vmem>>, vector<1x1x128xf32>,
    return
  }
  func.func @transform_0(%arg0: i32) -> (i32, i32, i32) {
    %c0_i32 = arith.constant 0 : i32
    %c0_i32_0 = arith.constant 0 : i32
    %c0_i32_1 = arith.constant 0 : i32
    return %arg0, %c0_i32, %c0_i32_0 : i32, i32, i32
  }
  func.func @transform_1(%arg0: i32) -> (i32, i32, i32) {
    %c0_i32 = arith.constant 0 : i32
    %c0_i32_0 = arith.constant 0 : i32
    %c0_i32_1 = arith.constant 0 : i32
    %c0_i32_2 = arith.constant 0 : i32
    return %c0_i32, %c0_i32_0, %c0_i32_1 : i32, i32, i32
  }
  func.func @transform_2(%arg0: i32) -> (i32, i32) {
    %c0_i32 = arith.constant 0 : i32
    %c0_i32_0 = arith.constant 0 : i32
    %c0_i32_1 = arith.constant 0 : i32
    return %c0_i32, %c0_i32_0 : i32, i32
  }
  func.func @transform_3(%arg0: i32) -> (i32, i32) {
    %c0_i32 = arith.constant 0 : i32
    %c0_i32_0 = arith.constant 0 : i32
    %c0_i32_1 = arith.constant 0 : i32
    return %c0_i32, %c0_i32_0 : i32, i32
  }
  func.func @transform_4(%arg0: i32) -> (i32, i32) {
    %c0_i32 = arith.constant 0 : i32
    %c0_i32_0 = arith.constant 0 : i32
    %c0_i32_1 = arith.constant 0 : i32
    return %c0_i32, %c0_i32_0 : i32, i32
  }
  func.func @transform_5(%arg0: i32) -> (i32, i32, i32) {
    %c0_i32 = arith.constant 0 : i32
    %c0_i32_0 = arith.constant 0 : i32
    %c0_i32_1 = arith.constant 0 : i32
    return %arg0, %c0_i32, %c0_i32_0 : i32, i32, i32
  }
  func.func @transform_6(%arg0: i32) -> (i32, i32, i32) {
    %c0_i32 = arith.constant 0 : i32
    %c0_i32_0 = arith.constant 0 : i32
    %c0_i32_1 = arith.constant 0 : i32
    return %arg0, %c0_i32, %c0_i32_0 : i32, i32, i32
  }
  func.func @transform_7(%arg0: i32) -> (i32, i32, i32) {
    %c0_i32 = arith.constant 0 : i32
    %c0_i32_0 = arith.constant 0 : i32
    %c0_i32_1 = arith.constant 0 : i32
    return %arg0, %c0_i32, %c0_i32_0 : i32, i32, i32
  }
}

module attributes {stable_mosaic.version = 11 : i64} {
  func.func @bn_relu_kernel(%arg0: i32, %arg1: memref<1x128x128xf32, #tpu.memory_space<vmem>>, %arg2: memref<1x128xf32, #tpu.memory_space<vmem>>, %arg3: memref<1x128xf32, #tpu.memory_space<vmem>>, %arg4: memref<1x128x128xf32, #tpu.memory_space<vmem>>) attributes {dimension_semantics = [#tpu.dimension_semantics<parallel>], iteration_bounds = array<i64: 4>, scalar_prefetch = 0 : i64, scratch_operands = 0 : i64, tpu.core_type = #tpu.core_type<tc>, window_params = [{transform_indices = @transform_0, window_bounds = array<i64: 1, 128, 128>}, {pipeline_mode = #tpu.pipeline_mode<synchronous>, transform_indices = @transform_1, window_bounds = array<i64: 1, 128>}, {pipeline_mode = #tpu.pipeline_mode<synchronous>, transform_indices = @transform_2, window_bounds = array<i64: 1, 128>}, {transform_indices = @transform_3, window_bounds = array<i64: 1, 128, 128>}]} {
    %c0 = arith.constant 0 : index
    %c0_0 = arith.constant 0 : index
    %c0_1 = arith.constant 0 : index
    %0 = vector.load %arg1[%c0, %c0_0, %c0_1] : memref<1x128x128xf32, #tpu.memory_space<vmem>>, vector<1x128x128xf32>
    %c0_2 = arith.constant 0 : index
    %c0_3 = arith.constant 0 : index
    %1 = vector.load %arg2[%c0_2, %c0_3] : memref<1x128xf32, #tpu.memory_space<vmem>>, vector<1x128xf32>
    %2 = vector.shape_cast %1 : vector<1x128xf32> to vector<1x1x128xf32>
    %3 = vector.broadcast %2 : vector<1x1x128xf32> to vector<1x128x128xf32>
    %4 = arith.mulf %0, %3 : vector<1x128x128xf32>
    %c0_4 = arith.constant 0 : index
    %c0_5 = arith.constant 0 : index
    %5 = vector.load %arg3[%c0_4, %c0_5] : memref<1x128xf32, #tpu.memory_space<vmem>>, vector<1x128xf32>
    %6 = vector.shape_cast %5 : vector<1x128xf32> to vector<1x1x128xf32>
    %7 = vector.broadcast %6 : vector<1x1x128xf32> to vector<1x128x128xf32>
    %8 = arith.addf %4, %7 : vector<1x128x128xf32>
    %cst = arith.constant 0.000000e+00 : f32
    %9 = vector.broadcast %cst : f32 to vector<1x128x128xf32>
    %10 = arith.maximumf %8, %9 : vector<1x128x128xf32>
    %c0_6 = arith.constant 0 : index
    %c0_7 = arith.constant 0 : index
    %c0_8 = arith.constant 0 : index
    %11 = vector.load %arg4[%c0_6, %c0_7, %c0_8] : memref<1x128x128xf32, #tpu.memory_space<vmem>>, vector<1x128x128xf32>
    tpu.vector_store %arg4[%c0_6, %c0_7, %c0_8], %10 {strides = array<i32>} : memref<1x128x128xf32, #tpu.memory_space<vmem>>, vector<1x128x128xf32>,
    return
  }
  func.func @transform_0(%arg0: i32) -> (i32, i32, i32) {
    %c0_i32 = arith.constant 0 : i32
    %c0_i32_0 = arith.constant 0 : i32
    %c0_i32_1 = arith.constant 0 : i32
    return %arg0, %c0_i32, %c0_i32_0 : i32, i32, i32
  }
  func.func @transform_1(%arg0: i32) -> (i32, i32) {
    %c0_i32 = arith.constant 0 : i32
    %c0_i32_0 = arith.constant 0 : i32
    %c0_i32_1 = arith.constant 0 : i32
    return %c0_i32, %c0_i32_0 : i32, i32
  }
  func.func @transform_2(%arg0: i32) -> (i32, i32) {
    %c0_i32 = arith.constant 0 : i32
    %c0_i32_0 = arith.constant 0 : i32
    %c0_i32_1 = arith.constant 0 : i32
    return %c0_i32, %c0_i32_0 : i32, i32
  }
  func.func @transform_3(%arg0: i32) -> (i32, i32, i32) {
    %c0_i32 = arith.constant 0 : i32
    %c0_i32_0 = arith.constant 0 : i32
    %c0_i32_1 = arith.constant 0 : i32
    return %arg0, %c0_i32, %c0_i32_0 : i32, i32, i32
  }
}

module attributes {stable_mosaic.version = 11 : i64} {
  func.func @conv_stats_kernel(%arg0: i32, %arg1: memref<1x192x128xf32, #tpu.memory_space<vmem>>, %arg2: memref<9x128x128xf32, #tpu.memory_space<vmem>>, %arg3: memref<1x128xf32, #tpu.memory_space<vmem>>, %arg4: memref<128x1xf32, #tpu.memory_space<vmem>>, %arg5: memref<128x1xf32, #tpu.memory_space<vmem>>, %arg6: memref<1x128x128xf32, #tpu.memory_space<vmem>>, %arg7: memref<1x1x128xf32, #tpu.memory_space<vmem>>, %arg8: memref<1x1x128xf32, #tpu.memory_space<vmem>>) attributes {dimension_semantics = [#tpu.dimension_semantics<parallel>], iteration_bounds = array<i64: 4>, scalar_prefetch = 0 : i64, scratch_operands = 0 : i64, tpu.core_type = #tpu.core_type<tc>, window_params = [{transform_indices = @transform_0, window_bounds = array<i64: 1, 192, 128>}, {pipeline_mode = #tpu.pipeline_mode<synchronous>, transform_indices = @transform_1, window_bounds = array<i64: 9, 128, 128>}, {pipeline_mode = #tpu.pipeline_mode<synchronous>, transform_indices = @transform_2, window_bounds = array<i64: 1, 128>}, {pipeline_mode = #tpu.pipeline_mode<synchronous>, transform_indices = @transform_3, window_bounds = array<i64: 128, 1>}, {pipeline_mode = #tpu.pipeline_mode<synchronous>, transform_indices = @transform_4, window_bounds = array<i64: 128, 1>}, {transform_indices = @transform_5, window_bounds = array<i64: 1, 128, 128>}, {transform_indices = @transform_6, window_bounds = array<i64: 1, 1, 128>}, {transform_indices = @transform_7, window_bounds = array<i64: 1, 1, 128>}]} {
    %cst = arith.constant 0.000000e+00 : f32
    %0 = vector.broadcast %cst : f32 to vector<128x128xf32>
    %c0 = arith.constant 0 : index
    %c15 = arith.constant 15 : index
    %c0_0 = arith.constant 0 : index
    %1 = vector.load %arg1[%c0, %c15, %c0_0] : memref<1x192x128xf32, #tpu.memory_space<vmem>>, vector<1x128x128xf32>
    %2 = vector.shape_cast %1 : vector<1x128x128xf32> to vector<128x128xf32>
    %c0_1 = arith.constant 0 : index
    %c0_2 = arith.constant 0 : index
    %3 = vector.load %arg4[%c0_1, %c0_2] : memref<128x1xf32, #tpu.memory_space<vmem>>, vector<128x1xf32>
    %4 = vector.broadcast %3 : vector<128x1xf32> to vector<128x128xf32>
    %5 = arith.mulf %2, %4 : vector<128x128xf32>
    %c0_3 = arith.constant 0 : index
    %c0_4 = arith.constant 0 : index
    %c0_5 = arith.constant 0 : index
    %6 = vector.load %arg2[%c0_3, %c0_4, %c0_5] : memref<9x128x128xf32, #tpu.memory_space<vmem>>, vector<1x128x128xf32>
    %7 = vector.shape_cast %6 : vector<1x128x128xf32> to vector<128x128xf32>
    %cst_6 = arith.constant dense<0.000000e+00> : vector<128x128xf32>
    %8 = tpu.matmul %5, %7, %cst_6 {dimension_numbers = #tpu.dot_dimension_numbers<[1], [0], [0], [1], [0, 0, 1, 1], [], []>} : vector<128x128xf32>, vector<128x128xf32>, vector<128x128xf32> -> vector<128x128xf32>
    %9 = arith.addf %0, %8 : vector<128x128xf32>
    %c0_7 = arith.constant 0 : index
    %c16 = arith.constant 16 : index
    %c0_8 = arith.constant 0 : index
    %10 = vector.load %arg1[%c0_7, %c16, %c0_8] : memref<1x192x128xf32, #tpu.memory_space<vmem>>, vector<1x128x128xf32>
    %11 = vector.shape_cast %10 : vector<1x128x128xf32> to vector<128x128xf32>
    %c1 = arith.constant 1 : index
    %c0_9 = arith.constant 0 : index
    %c0_10 = arith.constant 0 : index
    %12 = vector.load %arg2[%c1, %c0_9, %c0_10] : memref<9x128x128xf32, #tpu.memory_space<vmem>>, vector<1x128x128xf32>
    %13 = vector.shape_cast %12 : vector<1x128x128xf32> to vector<128x128xf32>
    %cst_11 = arith.constant dense<0.000000e+00> : vector<128x128xf32>
    %14 = tpu.matmul %11, %13, %cst_11 {dimension_numbers = #tpu.dot_dimension_numbers<[1], [0], [0], [1], [0, 0, 1, 1], [], []>} : vector<128x128xf32>, vector<128x128xf32>, vector<128x128xf32> -> vector<128x128xf32>
    %15 = arith.addf %9, %14 : vector<128x128xf32>
    %c0_12 = arith.constant 0 : index
    %c17 = arith.constant 17 : index
    %c0_13 = arith.constant 0 : index
    %16 = vector.load %arg1[%c0_12, %c17, %c0_13] : memref<1x192x128xf32, #tpu.memory_space<vmem>>, vector<1x128x128xf32>
    %17 = vector.shape_cast %16 : vector<1x128x128xf32> to vector<128x128xf32>
    %c0_14 = arith.constant 0 : index
    %c0_15 = arith.constant 0 : index
    %18 = vector.load %arg5[%c0_14, %c0_15] : memref<128x1xf32, #tpu.memory_space<vmem>>, vector<128x1xf32>
    %19 = vector.broadcast %18 : vector<128x1xf32> to vector<128x128xf32>
    %20 = arith.mulf %17, %19 : vector<128x128xf32>
    %c2 = arith.constant 2 : index
    %c0_16 = arith.constant 0 : index
    %c0_17 = arith.constant 0 : index
    %21 = vector.load %arg2[%c2, %c0_16, %c0_17] : memref<9x128x128xf32, #tpu.memory_space<vmem>>, vector<1x128x128xf32>
    %22 = vector.shape_cast %21 : vector<1x128x128xf32> to vector<128x128xf32>
    %cst_18 = arith.constant dense<0.000000e+00> : vector<128x128xf32>
    %23 = tpu.matmul %20, %22, %cst_18 {dimension_numbers = #tpu.dot_dimension_numbers<[1], [0], [0], [1], [0, 0, 1, 1], [], []>} : vector<128x128xf32>, vector<128x128xf32>, vector<128x128xf32> -> vector<128x128xf32>
    %24 = arith.addf %15, %23 : vector<128x128xf32>
    %c0_19 = arith.constant 0 : index
    %c31 = arith.constant 31 : index
    %c0_20 = arith.constant 0 : index
    %25 = vector.load %arg1[%c0_19, %c31, %c0_20] : memref<1x192x128xf32, #tpu.memory_space<vmem>>, vector<1x128x128xf32>
    %26 = vector.shape_cast %25 : vector<1x128x128xf32> to vector<128x128xf32>
    %c0_21 = arith.constant 0 : index
    %c0_22 = arith.constant 0 : index
    %27 = vector.load %arg4[%c0_21, %c0_22] : memref<128x1xf32, #tpu.memory_space<vmem>>, vector<128x1xf32>
    %28 = vector.broadcast %27 : vector<128x1xf32> to vector<128x128xf32>
    %29 = arith.mulf %26, %28 : vector<128x128xf32>
    %c3 = arith.constant 3 : index
    %c0_23 = arith.constant 0 : index
    %c0_24 = arith.constant 0 : index
    %30 = vector.load %arg2[%c3, %c0_23, %c0_24] : memref<9x128x128xf32, #tpu.memory_space<vmem>>, vector<1x128x128xf32>
    %31 = vector.shape_cast %30 : vector<1x128x128xf32> to vector<128x128xf32>
    %cst_25 = arith.constant dense<0.000000e+00> : vector<128x128xf32>
    %32 = tpu.matmul %29, %31, %cst_25 {dimension_numbers = #tpu.dot_dimension_numbers<[1], [0], [0], [1], [0, 0, 1, 1], [], []>} : vector<128x128xf32>, vector<128x128xf32>, vector<128x128xf32> -> vector<128x128xf32>
    %33 = arith.addf %24, %32 : vector<128x128xf32>
    %c0_26 = arith.constant 0 : index
    %c32 = arith.constant 32 : index
    %c0_27 = arith.constant 0 : index
    %34 = vector.load %arg1[%c0_26, %c32, %c0_27] : memref<1x192x128xf32, #tpu.memory_space<vmem>>, vector<1x128x128xf32>
    %35 = vector.shape_cast %34 : vector<1x128x128xf32> to vector<128x128xf32>
    %c4 = arith.constant 4 : index
    %c0_28 = arith.constant 0 : index
    %c0_29 = arith.constant 0 : index
    %36 = vector.load %arg2[%c4, %c0_28, %c0_29] : memref<9x128x128xf32, #tpu.memory_space<vmem>>, vector<1x128x128xf32>
    %37 = vector.shape_cast %36 : vector<1x128x128xf32> to vector<128x128xf32>
    %cst_30 = arith.constant dense<0.000000e+00> : vector<128x128xf32>
    %38 = tpu.matmul %35, %37, %cst_30 {dimension_numbers = #tpu.dot_dimension_numbers<[1], [0], [0], [1], [0, 0, 1, 1], [], []>} : vector<128x128xf32>, vector<128x128xf32>, vector<128x128xf32> -> vector<128x128xf32>
    %39 = arith.addf %33, %38 : vector<128x128xf32>
    %c0_31 = arith.constant 0 : index
    %c33 = arith.constant 33 : index
    %c0_32 = arith.constant 0 : index
    %40 = vector.load %arg1[%c0_31, %c33, %c0_32] : memref<1x192x128xf32, #tpu.memory_space<vmem>>, vector<1x128x128xf32>
    %41 = vector.shape_cast %40 : vector<1x128x128xf32> to vector<128x128xf32>
    %c0_33 = arith.constant 0 : index
    %c0_34 = arith.constant 0 : index
    %42 = vector.load %arg5[%c0_33, %c0_34] : memref<128x1xf32, #tpu.memory_space<vmem>>, vector<128x1xf32>
    %43 = vector.broadcast %42 : vector<128x1xf32> to vector<128x128xf32>
    %44 = arith.mulf %41, %43 : vector<128x128xf32>
    %c5 = arith.constant 5 : index
    %c0_35 = arith.constant 0 : index
    %c0_36 = arith.constant 0 : index
    %45 = vector.load %arg2[%c5, %c0_35, %c0_36] : memref<9x128x128xf32, #tpu.memory_space<vmem>>, vector<1x128x128xf32>
    %46 = vector.shape_cast %45 : vector<1x128x128xf32> to vector<128x128xf32>
    %cst_37 = arith.constant dense<0.000000e+00> : vector<128x128xf32>
    %47 = tpu.matmul %44, %46, %cst_37 {dimension_numbers = #tpu.dot_dimension_numbers<[1], [0], [0], [1], [0, 0, 1, 1], [], []>} : vector<128x128xf32>, vector<128x128xf32>, vector<128x128xf32> -> vector<128x128xf32>
    %48 = arith.addf %39, %47 : vector<128x128xf32>
    %c0_38 = arith.constant 0 : index
    %c47 = arith.constant 47 : index
    %c0_39 = arith.constant 0 : index
    %49 = vector.load %arg1[%c0_38, %c47, %c0_39] : memref<1x192x128xf32, #tpu.memory_space<vmem>>, vector<1x128x128xf32>
    %50 = vector.shape_cast %49 : vector<1x128x128xf32> to vector<128x128xf32>
    %c0_40 = arith.constant 0 : index
    %c0_41 = arith.constant 0 : index
    %51 = vector.load %arg4[%c0_40, %c0_41] : memref<128x1xf32, #tpu.memory_space<vmem>>, vector<128x1xf32>
    %52 = vector.broadcast %51 : vector<128x1xf32> to vector<128x128xf32>
    %53 = arith.mulf %50, %52 : vector<128x128xf32>
    %c6 = arith.constant 6 : index
    %c0_42 = arith.constant 0 : index
    %c0_43 = arith.constant 0 : index
    %54 = vector.load %arg2[%c6, %c0_42, %c0_43] : memref<9x128x128xf32, #tpu.memory_space<vmem>>, vector<1x128x128xf32>
    %55 = vector.shape_cast %54 : vector<1x128x128xf32> to vector<128x128xf32>
    %cst_44 = arith.constant dense<0.000000e+00> : vector<128x128xf32>
    %56 = tpu.matmul %53, %55, %cst_44 {dimension_numbers = #tpu.dot_dimension_numbers<[1], [0], [0], [1], [0, 0, 1, 1], [], []>} : vector<128x128xf32>, vector<128x128xf32>, vector<128x128xf32> -> vector<128x128xf32>
    %57 = arith.addf %48, %56 : vector<128x128xf32>
    %c0_45 = arith.constant 0 : index
    %c48 = arith.constant 48 : index
    %c0_46 = arith.constant 0 : index
    %58 = vector.load %arg1[%c0_45, %c48, %c0_46] : memref<1x192x128xf32, #tpu.memory_space<vmem>>, vector<1x128x128xf32>
    %59 = vector.shape_cast %58 : vector<1x128x128xf32> to vector<128x128xf32>
    %c7 = arith.constant 7 : index
    %c0_47 = arith.constant 0 : index
    %c0_48 = arith.constant 0 : index
    %60 = vector.load %arg2[%c7, %c0_47, %c0_48] : memref<9x128x128xf32, #tpu.memory_space<vmem>>, vector<1x128x128xf32>
    %61 = vector.shape_cast %60 : vector<1x128x128xf32> to vector<128x128xf32>
    %cst_49 = arith.constant dense<0.000000e+00> : vector<128x128xf32>
    %62 = tpu.matmul %59, %61, %cst_49 {dimension_numbers = #tpu.dot_dimension_numbers<[1], [0], [0], [1], [0, 0, 1, 1], [], []>} : vector<128x128xf32>, vector<128x128xf32>, vector<128x128xf32> -> vector<128x128xf32>
    %63 = arith.addf %57, %62 : vector<128x128xf32>
    %c0_50 = arith.constant 0 : index
    %c49 = arith.constant 49 : index
    %c0_51 = arith.constant 0 : index
    %64 = vector.load %arg1[%c0_50, %c49, %c0_51] : memref<1x192x128xf32, #tpu.memory_space<vmem>>, vector<1x128x128xf32>
    %65 = vector.shape_cast %64 : vector<1x128x128xf32> to vector<128x128xf32>
    %c0_52 = arith.constant 0 : index
    %c0_53 = arith.constant 0 : index
    %66 = vector.load %arg5[%c0_52, %c0_53] : memref<128x1xf32, #tpu.memory_space<vmem>>, vector<128x1xf32>
    %67 = vector.broadcast %66 : vector<128x1xf32> to vector<128x128xf32>
    %68 = arith.mulf %65, %67 : vector<128x128xf32>
    %c8 = arith.constant 8 : index
    %c0_54 = arith.constant 0 : index
    %c0_55 = arith.constant 0 : index
    %69 = vector.load %arg2[%c8, %c0_54, %c0_55] : memref<9x128x128xf32, #tpu.memory_space<vmem>>, vector<1x128x128xf32>
    %70 = vector.shape_cast %69 : vector<1x128x128xf32> to vector<128x128xf32>
    %cst_56 = arith.constant dense<0.000000e+00> : vector<128x128xf32>
    %71 = tpu.matmul %68, %70, %cst_56 {dimension_numbers = #tpu.dot_dimension_numbers<[1], [0], [0], [1], [0, 0, 1, 1], [], []>} : vector<128x128xf32>, vector<128x128xf32>, vector<128x128xf32> -> vector<128x128xf32>
    %72 = arith.addf %63, %71 : vector<128x128xf32>
    %c0_57 = arith.constant 0 : index
    %c0_58 = arith.constant 0 : index
    %73 = vector.load %arg3[%c0_57, %c0_58] : memref<1x128xf32, #tpu.memory_space<vmem>>, vector<1x128xf32>
    %74 = vector.broadcast %73 : vector<1x128xf32> to vector<128x128xf32>
    %75 = arith.addf %72, %74 : vector<128x128xf32>
    %c0_59 = arith.constant 0 : index
    %c0_60 = arith.constant 0 : index
    %c0_61 = arith.constant 0 : index
    %76 = vector.load %arg6[%c0_59, %c0_60, %c0_61] : memref<1x128x128xf32, #tpu.memory_space<vmem>>, vector<1x128x128xf32>
    %77 = vector.shape_cast %76 : vector<1x128x128xf32> to vector<128x128xf32>
    %78 = vector.shape_cast %75 : vector<128x128xf32> to vector<1x128x128xf32>
    tpu.vector_store %arg6[%c0_59, %c0_60, %c0_61], %78 {strides = array<i32>} : memref<1x128x128xf32, #tpu.memory_space<vmem>>, vector<1x128x128xf32>,
    %cst_62 = arith.constant dense<0.000000e+00> : vector<128xf32>
    %79 = vector.multi_reduction <add>, %75, %cst_62 [0] : vector<128x128xf32> to vector<128xf32>
    %80 = vector.shape_cast %79 : vector<128xf32> to vector<1x128xf32>
    %c0_63 = arith.constant 0 : index
    %c0_64 = arith.constant 0 : index
    %c0_65 = arith.constant 0 : index
    %81 = vector.load %arg7[%c0_63, %c0_64, %c0_65] : memref<1x1x128xf32, #tpu.memory_space<vmem>>, vector<1x1x128xf32>
    %82 = vector.shape_cast %81 : vector<1x1x128xf32> to vector<1x128xf32>
    %83 = vector.shape_cast %80 : vector<1x128xf32> to vector<1x1x128xf32>
    tpu.vector_store %arg7[%c0_63, %c0_64, %c0_65], %83 {strides = array<i32>} : memref<1x1x128xf32, #tpu.memory_space<vmem>>, vector<1x1x128xf32>,
    %84 = arith.mulf %75, %75 : vector<128x128xf32>
    %cst_66 = arith.constant dense<0.000000e+00> : vector<128xf32>
    %85 = vector.multi_reduction <add>, %84, %cst_66 [0] : vector<128x128xf32> to vector<128xf32>
    %86 = vector.shape_cast %85 : vector<128xf32> to vector<1x128xf32>
    %c0_67 = arith.constant 0 : index
    %c0_68 = arith.constant 0 : index
    %c0_69 = arith.constant 0 : index
    %87 = vector.load %arg8[%c0_67, %c0_68, %c0_69] : memref<1x1x128xf32, #tpu.memory_space<vmem>>, vector<1x1x128xf32>
    %88 = vector.shape_cast %87 : vector<1x1x128xf32> to vector<1x128xf32>
    %89 = vector.shape_cast %86 : vector<1x128xf32> to vector<1x1x128xf32>
    tpu.vector_store %arg8[%c0_67, %c0_68, %c0_69], %89 {strides = array<i32>} : memref<1x1x128xf32, #tpu.memory_space<vmem>>, vector<1x1x128xf32>,
    return
  }
  func.func @transform_0(%arg0: i32) -> (i32, i32, i32) {
    %c0_i32 = arith.constant 0 : i32
    %c0_i32_0 = arith.constant 0 : i32
    %c0_i32_1 = arith.constant 0 : i32
    return %arg0, %c0_i32, %c0_i32_0 : i32, i32, i32
  }
  func.func @transform_1(%arg0: i32) -> (i32, i32, i32) {
    %c0_i32 = arith.constant 0 : i32
    %c0_i32_0 = arith.constant 0 : i32
    %c0_i32_1 = arith.constant 0 : i32
    %c0_i32_2 = arith.constant 0 : i32
    return %c0_i32, %c0_i32_0, %c0_i32_1 : i32, i32, i32
  }
  func.func @transform_2(%arg0: i32) -> (i32, i32) {
    %c0_i32 = arith.constant 0 : i32
    %c0_i32_0 = arith.constant 0 : i32
    %c0_i32_1 = arith.constant 0 : i32
    return %c0_i32, %c0_i32_0 : i32, i32
  }
  func.func @transform_3(%arg0: i32) -> (i32, i32) {
    %c0_i32 = arith.constant 0 : i32
    %c0_i32_0 = arith.constant 0 : i32
    %c0_i32_1 = arith.constant 0 : i32
    return %c0_i32, %c0_i32_0 : i32, i32
  }
  func.func @transform_4(%arg0: i32) -> (i32, i32) {
    %c0_i32 = arith.constant 0 : i32
    %c0_i32_0 = arith.constant 0 : i32
    %c0_i32_1 = arith.constant 0 : i32
    return %c0_i32, %c0_i32_0 : i32, i32
  }
  func.func @transform_5(%arg0: i32) -> (i32, i32, i32) {
    %c0_i32 = arith.constant 0 : i32
    %c0_i32_0 = arith.constant 0 : i32
    %c0_i32_1 = arith.constant 0 : i32
    return %arg0, %c0_i32, %c0_i32_0 : i32, i32, i32
  }
  func.func @transform_6(%arg0: i32) -> (i32, i32, i32) {
    %c0_i32 = arith.constant 0 : i32
    %c0_i32_0 = arith.constant 0 : i32
    %c0_i32_1 = arith.constant 0 : i32
    return %arg0, %c0_i32, %c0_i32_0 : i32, i32, i32
  }
  func.func @transform_7(%arg0: i32) -> (i32, i32, i32) {
    %c0_i32 = arith.constant 0 : i32
    %c0_i32_0 = arith.constant 0 : i32
    %c0_i32_1 = arith.constant 0 : i32
    return %arg0, %c0_i32, %c0_i32_0 : i32, i32, i32
  }
}

</mosaic_0001>

<bundles_post_ra>
// kernel: double_conv.5
= control target key start
LH: loop header
LB: loop body
LE: loop exit
PB: predicated region body
PF: predicated region fallthrough
CT: control target
= control target key end

     0   :  { %s365_s12 = smov 0   ;;  %s442_s0 = inlined_call_operand.vmem [shape: f32[4,128,128], index: 0, kind: input, shape index: {}]   ;;  %s443_s1 = inlined_call_operand.vmem [shape: f32[1,128], index: 1, kind: input, shape index: {}]   ;;  %s444_s2 = inlined_call_operand.vmem [shape: f32[1,128], index: 2, kind: input, shape index: {}]   ;;  %s445_s3 = inlined_call_operand.vmem [shape: f32[4,128,128], index: 3, kind: output, shape index: {}]  }
   0x1 LB: > { %s314_s13 = sadd.s32 4294967295, %s343_s12   ;;  %p318_p0 = scmp.ge.s32.totalorder %s343_s12, 1  ;;  %s343_s12 = sphi %s365_s12, %s13_s12  }
   0x2   : > { %p137_p1 = scmp.lt.s32.totalorder %s343_s12, 5 }
   0x4   : > { %p138_p2 = pnand %p318_p0, %p137_p1 }
   0x5   : > { %p161_p3 = scmp.lt.s32.totalorder (!%p138_p2), %s314_s13, 3 }
   0x6   : > { %141 = sbr.rel (%p138_p2) target bundleno = 37 (0x25), region = 32 }
   0xb   : > { %s447_s13 = smov (!%p161_p3, %s314_s13), 3  ;;  %v335_v0 = vld [vmem:[%s443_s1] ss:$0 sm:$0xff] }
   0xc   : > { %s325_s16 = sshll.u32 %s447_s13, 7  ;;  %v384_v1 = vld [vmem:[%s444_s2] ss:$0 sm:$0xff] }
   0xd   : > { %s379_s19 = scalar_lea.vmem %s442_s0, %s325_s16  ;;  %s400_s24 = scalar_lea.vmem %s445_s3, %s325_s16 }
   0xe   : > { %v171_v2 = vld [vmem:[%s379_s19] sm:$0xff]  ;;  %v172_v3 = vld [vmem:[%s379_s19 + $0x8] sm:$0xff]  ;;  %v173_v4 = vld [vmem:[%s379_s19 + $0x10] sm:$0xff] }
   0xf   : > { %v191_v5 = vmul.f32 %v335_v0, %v171_v2  ;;  %v192_v6 = vmul.f32 %v335_v0, %v172_v3  ;;  %v193_v7 = vmul.f32 %v335_v0, %v173_v4  ;;  %v174_v8 = vld [vmem:[%s379_s19 + $0x18] sm:$0xff]  ;;  %v175_v9 = vld [vmem:[%s379_s19 + $0x20] sm:$0xff]  ;;  %v176_v10 = vld [vmem:[%s379_s19 + $0x28] sm:$0xff] }
  0x10   : > { %v194_v11 = vmul.f32 %v335_v0, %v174_v8  ;;  %v195_v12 = vmul.f32 %v335_v0, %v175_v9  ;;  %v196_v13 = vmul.f32 %v335_v0, %v176_v10  ;;  %v177_v14 = vld [vmem:[%s379_s19 + $0x30] sm:$0xff]  ;;  %v178_v15 = vld [vmem:[%s379_s19 + $0x38] sm:$0xff]  ;;  %v179_v24 = vld [vmem:[%s379_s19 + $0x40] sm:$0xff] }
  0x11   : > { %v211_v16 = vadd.f32 %v384_v1, %v191_v5  ;;  %v212_v17 = vadd.f32 %v384_v1, %v192_v6  ;;  %v213_v18 = vadd.f32 %v384_v1, %v193_v7  ;;  %v197_v19 = vmul.f32 %v335_v0, %v177_v14  ;;  %v180_v25 = vld [vmem:[%s379_s19 + $0x48] sm:$0xff]  ;;  %v181_v26 = vld [vmem:[%s379_s19 + $0x50] sm:$0xff]  ;;  %v182_v31 = vld [vmem:[%s379_s19 + $0x58] sm:$0xff] }
  0x12   : > { %v214_v20 = vadd.f32 %v384_v1, %v194_v11  ;;  %v215_v21 = vadd.f32 %v384_v1, %v195_v12  ;;  %v216_v22 = vadd.f32 %v384_v1, %v196_v13  ;;  %v198_v23 = vmul.f32 %v335_v0, %v178_v15  ;;  %v183_v32 = vld [vmem:[%s379_s19 + $0x60] sm:$0xff]  ;;  %v184_v33 = vld [vmem:[%s379_s19 + $0x68] sm:$0xff]  ;;  %v185_v37 = vld [vmem:[%s379_s19 + $0x70] sm:$0xff] }
  0x13   : > { %v227_v27 = vmax.f32 %v211_v16, 0.0  ;;  %v228_v28 = vmax.f32 %v212_v17, 0.0  ;;  %v229_v29 = vmax.f32 %v213_v18, 0.0  ;;  %v217_v30 = vadd.f32 %v384_v1, %v197_v19  ;;  %v186_v42 = vld [vmem:[%s379_s19 + $0x78] sm:$0xff] }
  0x14   : > { %v230_v34 = vmax.f32 %v214_v20, 0.0  ;;  %v231_v35 = vmax.f32 %v215_v21, 0.0  ;;  %v218_v36 = vadd.f32 %v384_v1, %v198_v23  ;;  %v232_v38 = vmax.f32 %v216_v22, 0.0 }
  0x15   : > { %243 = vst [vmem:[%s400_s24] sm:$0xff] %v227_v27  ;;  %v199_v39 = vmul.f32 %v335_v0, %v179_v24  ;;  %v200_v40 = vmul.f32 %v335_v0, %v180_v25  ;;  %v201_v41 = vmul.f32 %v335_v0, %v181_v26  ;;  %v233_v43 = vmax.f32 %v217_v30, 0.0 }
  0x16   : > { %244 = vst [vmem:[%s400_s24 + $0x8] sm:$0xff] %v228_v28  ;;  %v202_v44 = vmul.f32 %v335_v0, %v182_v31  ;;  %v203_v45 = vmul.f32 %v335_v0, %v183_v32  ;;  %v204_v46 = vmul.f32 %v335_v0, %v184_v33  ;;  %v205_v50 = vmul.f32 %v335_v0, %v185_v37 }
  0x17   : > { %245 = vst [vmem:[%s400_s24 + $0x10] sm:$0xff] %v229_v29  ;;  %v219_v47 = vadd.f32 %v384_v1, %v199_v39  ;;  %v220_v48 = vadd.f32 %v384_v1, %v200_v40  ;;  %v221_v49 = vadd.f32 %v384_v1, %v201_v41  ;;  %v234_v51 = vmax.f32 %v218_v36, 0.0 }
  0x18   : > { %246 = vst [vmem:[%s400_s24 + $0x18] sm:$0xff] %v230_v34  ;;  %v222_v52 = vadd.f32 %v384_v1, %v202_v44  ;;  %v206_v53 = vmul.f32 %v335_v0, %v186_v42  ;;  %v223_v55 = vadd.f32 %v384_v1, %v203_v45  ;;  %v224_v57 = vadd.f32 %v384_v1, %v204_v46 }
  0x19   : > { %247 = vst [vmem:[%s400_s24 + $0x20] sm:$0xff] %v231_v35  ;;  %v235_v54 = vmax.f32 %v219_v47, 0.0  ;;  %v236_v56 = vmax.f32 %v220_v48, 0.0  ;;  %v237_v58 = vmax.f32 %v221_v49, 0.0  ;;  %v225_v59 = vadd.f32 %v384_v1, %v205_v50 }
  0x1a   : > { %248 = vst [vmem:[%s400_s24 + $0x28] sm:$0xff] %v232_v38  ;;  %v238_v60 = vmax.f32 %v222_v52, 0.0  ;;  %v226_v61 = vadd.f32 %v384_v1, %v206_v53  ;;  %v239_v62 = vmax.f32 %v223_v55, 0.0  ;;  %v240_v63 = vmax.f32 %v224_v57, 0.0 }
  0x1b   : > { %249 = vst [vmem:[%s400_s24 + $0x30] sm:$0xff] %v233_v43  ;;  %v241_v0 = vmax.f32 %v225_v59, 0.0 }
  0x1c   : > { %250 = vst [vmem:[%s400_s24 + $0x38] sm:$0xff] %v234_v51  ;;  %v242_v2 = vmax.f32 %v226_v61, 0.0 }
  0x1d   : > { %251 = vst [vmem:[%s400_s24 + $0x40] sm:$0xff] %v235_v54 }
  0x1e   : > { %252 = vst [vmem:[%s400_s24 + $0x48] sm:$0xff] %v236_v56 }
  0x1f   : > { %253 = vst [vmem:[%s400_s24 + $0x50] sm:$0xff] %v237_v58 }
  0x20   : > { %254 = vst [vmem:[%s400_s24 + $0x58] sm:$0xff] %v238_v60 }
  0x21   : > { %255 = vst [vmem:[%s400_s24 + $0x60] sm:$0xff] %v239_v62 }
  0x22   : > { %256 = vst [vmem:[%s400_s24 + $0x68] sm:$0xff] %v240_v63 }
  0x23   : > { %257 = vst [vmem:[%s400_s24 + $0x70] sm:$0xff] %v241_v0 }
  0x24   : > { %258 = vst [vmem:[%s400_s24 + $0x78] sm:$0xff] %v242_v2 }
  0x25 PF: > { %s13_s12 = sadd.s32 1, %s343_s12  }
  0x26   : > { %p10_p4 = scmp.ge.s32.totalorder %s13_s12, 6  }
  0x28   :  { %12 = sbr.rel (!%p10_p4) target bundleno = 1 (0x1), region = 62 }

// kernel: double_conv.4
= control target key start
LH: loop header
LB: loop body
LE: loop exit
PB: predicated region body
PF: predicated region fallthrough
CT: control target
= control target key end

     0   :  { %s2305_s24 = smov 0   ;;  %s3260_s0 = inlined_call_operand.vmem [shape: f32[4,192,8], index: 0, kind: input, shape index: {}]   ;;  %s3261_s1 = inlined_call_operand.vmem [shape: f32[9,8,128], index: 1, kind: input, shape index: {}]   ;;  %s3262_s2 = inlined_call_operand.vmem [shape: f32[1,128], index: 2, kind: input, shape index: {}]   ;;  %s3263_s3 = inlined_call_operand.vmem [shape: f32[128,1], index: 3, kind: input, shape index: {}]   ;;  %s3264_s4 = inlined_call_operand.vmem [shape: f32[128,1], index: 4, kind: input, shape index: {}]   ;;  %s3265_s5 = inlined_call_operand.vmem [shape: f32[4,128,128], index: 5, kind: output, shape index: {0}]   ;;  %s3266_s6 = inlined_call_operand.vmem [shape: f32[4,1,128], index: 6, kind: output, shape index: {1}]   ;;  %s3267_s7 = inlined_call_operand.vmem [shape: f32[4,1,128], index: 7, kind: output, shape index: {2}]  }
   0x1 LB: > { %s2076_s25 = sadd.s32 4294967295, %s2262_s24   ;;  %p2080_p0 = scmp.ge.s32.totalorder %s2262_s24, 1  ;;  %s2262_s24 = sphi %s2305_s24, %s18_s24  }
   0x2   : > { %p242_p1 = scmp.lt.s32.totalorder %s2262_s24, 5 }
   0x4   : > { %p243_p2 = pnand %p2080_p0, %p242_p1 }
   0x6   : > { %246 = sbr.rel (%p243_p2) target bundleno = 543 (0x21f), region = 40 }
   0xb   : > { %v688_v0 = vld [vmem:[%s3264_s4 + $0x10] sm:$0xff]  ;;  %v687_v1 = vld [vmem:[%s3264_s4 + $0x8] sm:$0xff]  ;;  %v686_v2 = vld [vmem:[%s3264_s4] sm:$0xff]  ;;  %p280_p3 = scmp.lt.s32.totalorder %s2076_s25, 3  ;;  %v2264_v3 = vmov 0   ;;  %vm443_vm0 = vcmask 64512  }
   0xc   : > { %2254 = vset.pattern.permute.xlu2 %v2264_v3  ;;  %2253 = vset.pattern.permute.xlu1 %v2264_v3  ;;  %v2084_v4 = vld [vmem:[%s3261_s1 + $0x8] sm:$0xff]  ;;  %v2151_v5 = vld [vmem:[%s3261_s1 + $0x20] sm:$0xff]  ;;  %v314_v7 = vld [vmem:[%s3263_s3 + $0x10] sm:$0xff] }
   0xd   : > { %2252 = vset.pattern.permute.xlu0 %v2264_v3  ;;  %714 = vperm.xlu2 %2254, %v688_v0   ;;  %s3330_s25 = smov (!%p280_p3, %s2076_s25), 3  ;;  %v313_v8 = vld [vmem:[%s3263_s3 + $0x8] sm:$0xff]  ;;  %v312_v9 = vld [vmem:[%s3263_s3] sm:$0xff]  ;;  %v315_v12 = vld [vmem:[%s3263_s3 + $0x18] sm:$0xff] }
   0xe   : > { %709 = vperm.xlu1 %2253, %v687_v1   ;;  %704 = vperm.xlu0 %2252, %v686_v2   ;;  %s2242_s11 = smul.u32 192, %s3330_s25  ;;  %v690_v11 = vld [vmem:[%s3264_s4 + $0x20] sm:$0xff]  ;;  %v689_v13 = vld [vmem:[%s3264_s4 + $0x18] sm:$0xff]  ;;  %v317_v16 = vld [vmem:[%s3263_s3 + $0x28] sm:$0xff]  ;;  %s292_s15 = scalar_lea.vmem %s3266_s6, %s3330_s25 }
   0xf   : > { %507 = vmatpush.msra.mxu0 %v2084_v4  ;;  %2240 = vmatpush.msra.mxu2 %v2084_v4  ;;  %v691_v17 = vld [vmem:[%s3264_s4 + $0x28] sm:$0xff]  ;;  %v316_v18 = vld [vmem:[%s3263_s3 + $0x20] sm:$0xff]  ;;  %v693_v21 = vld [vmem:[%s3264_s4 + $0x38] sm:$0xff]  ;;  %s295_s19 = scalar_lea.vmem %s3267_s7, %s3330_s25 }
  0x10   : > { %2239 = vmatpush.msra.mxu1 %v2084_v4  ;;  %2241 = vmatpush.msra.mxu3 %v2084_v4  ;;  %s2334_s16 = scalar_lea.vmem %s3260_s0, %s2242_s11  ;;  %v318_v22 = vld [vmem:[%s3263_s3 + $0x30] sm:$0xff]  ;;  %v320_v25 = vld [vmem:[%s3263_s3 + $0x40] sm:$0xff]  ;;  %v319_v27 = vld [vmem:[%s3263_s3 + $0x38] sm:$0xff] }
  0x11   : > { %1173 = vmatpush.msrb.mxu0 %v2151_v5  ;;  %v425_v6 = vld [vmem:[%s2334_s16 + $0x10] sm:$0xff]  ;;  %v426_v10 = vld [vmem:[%s2334_s16 + $0x18] sm:$0xff]  ;;  %v427_v15 = vld [vmem:[%s2334_s16 + $0x20] sm:$0xff] }
  0x12   : > { %2085 = vmatmul.msk.f32.vlgmr.msra.gmra.mxu0 %vm443_vm0, %v425_v6  ;;  %v2359_v14 = vld [vmem:[%s2334_s16 + $0x30] sm:$0xff]  ;;  %v2375_v19 = vld [vmem:[%s2334_s16 + $0x38] sm:$0xff]  ;;  %v428_v20 = vld [vmem:[%s2334_s16 + $0x28] sm:$0xff] }
  0x13   : > { %2089 = vmatmul.msk.f32.vlgmr.msra.gmra.mxu1 %vm443_vm0, %v2359_v14  ;;  %v692_v23 = vld [vmem:[%s3264_s4 + $0x30] sm:$0xff]  ;;  %v2391_v24 = vld [vmem:[%s2334_s16 + $0x40] sm:$0xff]  ;;  %v2406_v28 = vld [vmem:[%s2334_s16 + $0x48] sm:$0xff] }
  0x14   : > { %v694_v26 = vld [vmem:[%s3264_s4 + $0x40] sm:$0xff]  ;;  %v696_v29 = vld [vmem:[%s3264_s4 + $0x50] sm:$0xff]  ;;  %v321_v30 = vld [vmem:[%s3263_s3 + $0x48] sm:$0xff] }
  0x15   : > { %340 = vperm.xlu2 %2254, %v314_v7   ;;  %v695_v31 = vld [vmem:[%s3264_s4 + $0x48] sm:$0xff]  ;;  %v2421_v32 = vld [vmem:[%s2334_s16 + $0x50] sm:$0xff]  ;;  %v323_v33 = vld [vmem:[%s3263_s3 + $0x58] sm:$0xff] }
  0x16   : > { %335 = vperm.xlu1 %2253, %v313_v8   ;;  %330 = vperm.xlu0 %2252, %v312_v9   ;;  %v697_v34 = vld [vmem:[%s3264_s4 + $0x58] sm:$0xff]  ;;  %v322_v35 = vld [vmem:[%s3263_s3 + $0x50] sm:$0xff]  ;;  %v699_v40 = vld [vmem:[%s3264_s4 + $0x68] sm:$0xff] }
  0x17   : > { %2093 = vmatmul.msk.f32.vlgmr.msra.gmra.mxu2 %vm443_vm0, %v2421_v32  ;;  %v2117_v36 = vld [vmem:[%s3261_s1 + $0x10] sm:$0xff]  ;;  %v2440_v37 = vld [vmem:[%s2334_s16 + $0x58] sm:$0xff]  ;;  %v324_v41 = vld [vmem:[%s3263_s3 + $0x60] sm:$0xff] }
  0x18   : > { %863 = vmatpush.msrb.mxu2 %v2117_v36  ;;  %3277 = vst [vmem:[#allocation2_spill] sm:$0xff] %v2440_v37  ;;  %v2443_v38 = vld [vmem:[%s2334_s16 + $0x70] sm:$0xff]  ;;  %v2134_v39 = vld [vmem:[%s3261_s1 + $0x18] sm:$0xff]  ;;  %v698_v42 = vld [vmem:[%s3264_s4 + $0x60] sm:$0xff] }
  0x19   : > { %3278 = vst [vmem:[#allocation3_spill] sm:$0xff] %v2443_v38  ;;  %2097 = vmatmul.msk.f32.vlgmr.msra.gmra.mxu3 %vm443_vm0, %v2443_v38  ;;  %v424_v43 = vld [vmem:[%s3261_s1] sm:$0xff]  ;;  %v2470_v45 = vld [vmem:[%s2334_s16 + $0x78] sm:$0xff]  ;;  %v326_v46 = vld [vmem:[%s3263_s3 + $0x70] sm:$0xff] }
  0x1a   : > { %2086 = vmatmul.msk.f32.gmra.mxu0 %vm443_vm0, %v426_v10  ;;  %1026 = vmatpush.msrb.mxu3 %v2134_v39  ;;  %v2467_v44 = vld [vmem:[%s2334_s16 + $0x60] sm:$0xff]  ;;  %3280 = vst [vmem:[#allocation5_spill] sm:$0xff] %v2470_v45  ;;  %v700_v47 = vld [vmem:[%s3264_s4 + $0x70] sm:$0xff]  ;;  %v325_v48 = vld [vmem:[%s3263_s3 + $0x68] sm:$0xff] }
  0x1b   : > { %2090 = vmatmul.msk.f32.gmra.mxu1 %vm443_vm0, %v2375_v19  ;;  %3279 = vst [vmem:[#allocation4_spill] sm:$0xff] %v2467_v44  ;;  %v2488_v49 = vld [vmem:[%s2334_s16 + $0x68] sm:$0xff]  ;;  %v2491_v50 = vld [vmem:[%s2334_s16 + $0x80] sm:$0xff]  ;;  %v327_v51 = vld [vmem:[%s3263_s3 + $0x78] sm:$0xff] }
  0x1c   : > { %620 = vmatpush.msrb.mxu1 %v424_v43  ;;  %3281 = vst [vmem:[#allocation6_spill] sm:$0xff] %v2488_v49  ;;  %v701_v52 = vld [vmem:[%s3264_s4 + $0x78] sm:$0xff]  ;;  %v2508_v53 = vld [vmem:[%s2334_s16 + $0x88] sm:$0xff]  ;;  %v2185_v57 = vld [vmem:[%s3261_s1 + $0x30] sm:$0xff] }
  0x1d   : > { %724 = vperm.xlu2 %2254, %v690_v11   ;;  %3282 = vst [vmem:[#allocation7_spill] sm:$0xff] %v2491_v50  ;;  %v2515_v55 = vld [vmem:[%s2334_s16 + $0x31] sm:$0xff]  ;;  %1499 = vmatpush.msra.mxu2 %v2185_v57  ;;  %v2168_v59 = vld [vmem:[%s3261_s1 + $0x28] sm:$0xff]  ;;  %v2533_v60 = vld [vmem:[%s2334_s16 + $0x3f] sm:$0xff] }
  0x1e   : > { %345 = vperm.xlu1 %2253, %v315_v12   ;;  %719 = vperm.xlu0 %2252, %v689_v13   ;;  %3283 = vst [vmem:[#allocation8_spill] sm:$0xff] %v2508_v53  ;;  %v2202_v58 = vld [vmem:[%s3261_s1 + $0x38] sm:$0xff]  ;;  %v2219_v63 = vld [vmem:[%s3261_s1 + $0x40] sm:$0xff]  ;;  %v1240_v4 = vld [vmem:[%s2334_s16 + $0x29] sm:$0xff] }
  0x1f   : > { %2094 = vmatmul.msk.f32.gmra.mxu2 %vm443_vm0, %v2440_v37  ;;  %1646 = vmatpush.msra.mxu3 %v2202_v58  ;;  %v2547_v0 = vld [vmem:[%s2334_s16 + $0x41] sm:$0xff]  ;;  %v2558_v3 = vld [vmem:[%s2334_s16 + $0x57] sm:$0xff] }
  0x20   : > { %1336 = vmatpush.msra.mxu1 %v2168_v59  ;;  %1809 = vmatpush.msra.mxu0 %v2219_v63  ;;  %v670_v5 = vld [vmem:[%s2334_s16 + $0x11] sm:$0xff]  ;;  %v672_v6 = vld [vmem:[%s2334_s16 + $0x21] sm:$0xff]  ;;  %v2651_v63 = vld [vmem:[%s2334_s16 + $0x49] sm:$0xff] }
  0x21   : > { %2098 = vmatmul.msk.f32.gmra.mxu3 %vm443_vm0, %v2470_v45  ;;  %v297_v36 = vld [vmem:[%s2334_s16 + $0x17] sm:$0xff] }
  0x22   : > { %2087 = vmatmul.msk.f32.gmra.mxu0 %vm443_vm0, %v427_v15  ;;  %v2646_v58 = vld [vmem:[%s2334_s16 + $0x71] sm:$0xff] }
  0x23   : > { %2091 = vmatmul.msk.f32.gmra.mxu1 %vm443_vm0, %v2391_v24 }
  0x25   : > { %355 = vperm.xlu2 %2254, %v317_v16   ;;  %v2585_v16 = vld [vmem:[%s2334_s16 + $0x59] sm:$0xff] }
  0x26   : > { %729 = vperm.xlu1 %2253, %v691_v17   ;;  %350 = vperm.xlu0 %2252, %v316_v18   ;;  %v2588_v17 = vld [vmem:[%s2334_s16 + $0x37] sm:$0xff]  ;;  %v296_v18 = vld [vmem:[%s2334_s16 + $0xf] sm:$0xff] }
  0x27   : > { %2095 = vmatmul.msk.f32.gmra.mxu2 %vm443_vm0, %v2467_v44 }
  0x29   : > { %2099 = vmatmul.msk.f32.gmra.mxu3 %vm443_vm0, %v2491_v50 }
  0x2a   : > { %2088 = vmatmul.msk.f32.gmra.mxu0 %vm443_vm0, %v428_v20 }
  0x2b   : > { %2092 = vmatmul.msk.f32.gmra.mxu1 %vm443_vm0, %v2406_v28 }
  0x2d   : > { %739 = vperm.xlu2 %2254, %v693_v21   ;;  %v2593_v21 = vld [vmem:[%s2334_s16 + $0x2f] sm:$0xff] }
  0x2e   : > { %360 = vperm.xlu1 %2253, %v318_v22   ;;  %734 = vperm.xlu0 %2252, %v692_v23  }
  0x2f   : > { %2096 = vmatmul.msk.f32.gmra.mxu2 %vm443_vm0, %v2488_v49 }
  0x31   : > { %2100 = vmatmul.msk.f32.gmra.mxu3 %vm443_vm0, %v2508_v53 }
  0x32   : > { %2152 = vmatmul.msk.f32.vlgmr.msrb.gmra.mxu0 %vm443_vm0, %v427_v15  ;;  %v671_v15 = vld [vmem:[%s2334_s16 + $0x19] sm:$0xff] }
  0x35   : > { %370 = vperm.xlu2 %2254, %v320_v25  }
  0x36   : > { %744 = vperm.xlu1 %2253, %v694_v26   ;;  %365 = vperm.xlu0 %2252, %v319_v27  }
  0x3a   : > { %2153 = vmatmul.msk.f32.gmra.mxu0 %vm443_vm0, %v428_v20  ;;  %v298_v20 = vld [vmem:[%s2334_s16 + $0x1f] sm:$0xff] }
  0x3d   : > { %754 = vperm.xlu2 %2254, %v696_v29  }
  0x3e   : > { %375 = vperm.xlu1 %2253, %v321_v30   ;;  %749 = vperm.xlu0 %2252, %v695_v31  }
  0x42   : > { %2154 = vmatmul.msk.f32.gmra.mxu0 %vm443_vm0, %v2359_v14 }
  0x45   : > { %385 = vperm.xlu2 %2254, %v323_v33  }
  0x46   : > { %759 = vperm.xlu1 %2253, %v697_v34   ;;  %380 = vperm.xlu0 %2252, %v322_v35   ;;  %v2614_v34 = vld [vmem:[%s2334_s16 + $0x6f] sm:$0xff]  ;;  %v2617_v35 = vld [vmem:[%s2334_s16 + $0x47] sm:$0xff] }
  0x4a   : > { %2155 = vmatmul.msk.f32.gmra.mxu0 %vm443_vm0, %v2375_v19 }
  0x4d   : > { %769 = vperm.xlu2 %2254, %v699_v40   ;;  %v930_v40 = vld [vmem:[%s2334_s16 + $0x27] sm:$0xff] }
  0x4e   : > { %390 = vperm.xlu1 %2253, %v324_v41   ;;  %764 = vperm.xlu0 %2252, %v698_v42  }
  0x52   : > { %2156 = vmatmul.msk.f32.gmra.mxu0 %vm443_vm0, %v2391_v24 }
  0x55   : > { %400 = vperm.xlu2 %2254, %v326_v46  }
  0x56   : > { %774 = vperm.xlu1 %2253, %v700_v47   ;;  %395 = vperm.xlu0 %2252, %v325_v48   ;;  %v2631_v47 = vld [vmem:[%s2334_s16 + $0x39] sm:$0xff] }
  0x5a   : > { %2157 = vmatmul.msk.f32.gmra.mxu0 %vm443_vm0, %v2406_v28 }
  0x5e   : > { %405 = vperm.xlu1 %2253, %v327_v51   ;;  %779 = vperm.xlu0 %2252, %v701_v52  }
  0x62   : > { %2158 = vmatmul.msk.f32.gmra.mxu0 %vm443_vm0, %v2421_v32 }
  0x67   : > { %v2512_v54 = vpop.permute.xlu2 %714 }
  0x68   : > { %v2519_v56 = vmul.f32 %v2515_v55, %v2512_v54  ;;  %v784_v39 = vmul.f32 %v2512_v54, %v672_v6 }
  0x6a   : > { %2159 = vmatmul.msk.f32.gmra.mxu0 %vm443_vm0, %v2440_v37 }
  0x6f   : > { %v2535_v61 = vpop.permute.xlu2 %340 }
  0x70   : > { %v2539_v62 = vmul.f32 %v2533_v60, %v2535_v61 }
  0x72   : > { %2160 = vmatmul.msk.f32.gmra.mxu0 %vm443_vm0, %v2467_v44 }
  0x77   : > { %v2549_v1 = vpop.permute.xlu2 %724 }
  0x78   : > { %v2553_v2 = vmul.f32 %v2547_v0, %v2549_v1 }
  0x7a   : > { %2161 = vmatmul.msk.f32.gmra.mxu0 %vm443_vm0, %v2488_v49  ;;  %v2738_v49 = vld [vmem:[%s2334_s16 + $0x98] sm:$0xff] }
  0x7b   : > { %3294 = vst [vmem:[#allocation19_spill] sm:$0xff] %v2738_v49 }
  0x7f   : > { %v2563_v7 = vpop.permute.xlu2 %355 }
  0x80   : > { %v2565_v8 = vpop.permute.xlu1 %709  ;;  %v2567_v9 = vpop.permute.xlu0 %704  ;;  %v2571_v10 = vmul.f32 %v2558_v3, %v2563_v7  ;;  %v413_v44 = vmul.f32 %v2563_v7, %v2588_v17 }
  0x81   : > { %v2574_v11 = vmul.f32 %v1240_v4, %v2565_v8  ;;  %v782_v12 = vmul.f32 %v2567_v9, %v670_v5  ;;  %v2578_v13 = vmul.f32 %v2567_v9, %v672_v6  ;;  %v783_v22 = vmul.f32 %v2565_v8, %v671_v15 }
  0x82   : > { %2162 = vmatmul.msk.f32.gmra.mxu0 %vm443_vm0, %v2443_v38  ;;  %v410_v15 = vmul.f32 %v2535_v61, %v298_v20 }
  0x83   : > { %2118 = vmatmul.msk.f32.vlgmr.msrb.gmra.mxu2 %vm443_vm0, %v782_v12 }
  0x87   : > { %v2596_v23 = vpop.permute.xlu2 %739 }
  0x88   : > { %v2600_v25 = vmul.f32 %v2585_v16, %v2596_v23  ;;  %v336_v26 = vpop.permute.xlu1 %335  ;;  %v331_v27 = vpop.permute.xlu0 %330 }
  0x89   : > { %v2603_v29 = vmul.f32 %v336_v26, %v2588_v17  ;;  %v408_v30 = vmul.f32 %v331_v27, %v296_v18  ;;  %v945_v31 = vmul.f32 %v331_v27, %v298_v20  ;;  %v2606_v33 = vmul.f32 %v2593_v21, %v331_v27  ;;  %v2661_v18 = vld [vmem:[%s2334_s16 + $0x4f] sm:$0xff] }
  0x8a   : > { %3284 = vst [vmem:[#allocation9_spill] sm:$0xff] %v2600_v25  ;;  %2163 = vmatmul.msk.f32.gmra.mxu0 %vm443_vm0, %v2470_v45  ;;  %v409_v48 = vmul.f32 %v336_v26, %v297_v36  ;;  %v946_v52 = vmul.f32 %v930_v40, %v336_v26  ;;  %v947_v27 = vmul.f32 %v2593_v21, %v2535_v61 }
  0x8b   : > { %2101 = vmatmul.msk.f32.vlgmr.msrb.gmra.mxu1 %vm443_vm0, %v408_v30  ;;  %2119 = vmatmul.msk.f32.gmra.mxu2 %vm443_vm0, %v783_v22 }
  0x8c   : > { %2135 = vmatmul.msk.f32.vlgmr.msrb.gmra.mxu3 %vm443_vm0, %v945_v31  ;;  %v2684_v31 = vld [vmem:[%s2334_s16 + $0x5f] sm:$0xff] }
  0x8f   : > { %v2622_v41 = vpop.permute.xlu2 %370  ;;  %v2744_v25 = vpop.f32.mrf.mxu0 }
  0x90   : > { %v2626_v42 = vmul.f32 %v2614_v34, %v2622_v41  ;;  %v346_v43 = vpop.permute.xlu1 %345  ;;  %v2628_v46 = vpop.permute.xlu0 %719 }
  0x91   : > { %v2634_v51 = vmul.f32 %v2617_v35, %v346_v43  ;;  %v2638_v57 = vmul.f32 %v2631_v47, %v2628_v46  ;;  %v785_v22 = vmul.f32 %v1240_v4, %v2628_v46  ;;  %v2679_v4 = vld [vmem:[%s2334_s16 + $0x87] sm:$0xff] }
  0x92   : > { %3285 = vst [vmem:[#allocation10_spill] sm:$0xff] %v2626_v42  ;;  %2164 = vmatmul.msk.f32.gmra.mxu0 %vm443_vm0, %v2491_v50 }
  0x93   : > { %2102 = vmatmul.msk.f32.gmra.mxu1 %vm443_vm0, %v409_v48  ;;  %2120 = vmatmul.msk.f32.gmra.mxu2 %vm443_vm0, %v784_v39  ;;  %v786_v48 = vmul.f32 %v2515_v55, %v2549_v1 }
  0x94   : > { %2136 = vmatmul.msk.f32.gmra.mxu3 %vm443_vm0, %v946_v52  ;;  %v2695_v52 = vld [vmem:[%s2334_s16 + $0x51] sm:$0xff] }
  0x97   : > { %v2648_v59 = vpop.permute.xlu2 %754 }
  0x98   : > { %v2655_v5 = vmul.f32 %v2646_v58, %v2648_v59  ;;  %v2657_v6 = vpop.permute.xlu1 %729  ;;  %v351_v12 = vpop.permute.xlu0 %350 }
  0x99   : > { %v2666_v26 = vmul.f32 %v2657_v6, %v2651_v63  ;;  %v2671_v30 = vmul.f32 %v351_v12, %v2661_v18  ;;  %v949_v42 = vmul.f32 %v2533_v60, %v351_v12 }
  0x9a   : > { %3286 = vst [vmem:[#allocation11_spill] sm:$0xff] %v2655_v5  ;;  %2165 = vmatmul.msk.f32.gmra.mxu0 %vm443_vm0, %v2508_v53  ;;  %v948_v53 = vmul.f32 %v346_v43, %v2588_v17  ;;  %v2719_v5 = vld [vmem:[%s2334_s16 + $0x61] sm:$0xff]  ;;  %v2781_v17 = vpop.f32.mrf.mxu0 }
  0x9b   : > { %3287 = vst [vmem:[#allocation12_spill] sm:$0xff] %v2666_v26  ;;  %2103 = vmatmul.msk.f32.gmra.mxu1 %vm443_vm0, %v410_v15  ;;  %2121 = vmatmul.msk.f32.gmra.mxu2 %vm443_vm0, %v785_v22  ;;  %v411_v15 = vmul.f32 %v930_v40, %v346_v43  ;;  %v2714_v40 = vld [vmem:[%s2334_s16 + $0x89] sm:$0xff] }
  0x9c   : > { %2137 = vmatmul.msk.f32.gmra.mxu3 %vm443_vm0, %v947_v27  ;;  %v2701_v27 = vld [vmem:[%s2334_s16 + $0x90] sm:$0xff] }
  0x9d   : > { %3290 = vst [vmem:[#allocation15_spill] sm:$0xff] %v2701_v27 }
  0x9f   : > { %v2681_v20 = vpop.permute.xlu2 %385 }
  0xa0   : > { %v2688_v61 = vmul.f32 %v2679_v4, %v2681_v20  ;;  %v361_v36 = vpop.permute.xlu1 %360  ;;  %v2690_v39 = vpop.permute.xlu0 %734 }
  0xa1   : > { %v2698_v22 = vmul.f32 %v2684_v31, %v361_v36  ;;  %v2706_v50 = vmul.f32 %v2695_v52, %v2690_v39 }
  0xa2   : > { %3288 = vst [vmem:[#allocation13_spill] sm:$0xff] %v2688_v61  ;;  %2166 = vmatmul.msk.f32.gmra.mxu0 %vm443_vm0, %v2701_v27  ;;  %v2731_v27 = vld [vmem:[%s2334_s16 + $0x67] sm:$0xff] }
  0xa3   : > { %3289 = vst [vmem:[#allocation14_spill] sm:$0xff] %v2698_v22  ;;  %2104 = vmatmul.msk.f32.gmra.mxu1 %vm443_vm0, %v411_v15  ;;  %2122 = vmatmul.msk.f32.gmra.mxu2 %vm443_vm0, %v786_v48  ;;  %v412_v48 = vmul.f32 %v2593_v21, %v351_v12  ;;  %v2752_v21 = vld [vmem:[%s2334_s16 + $0x77] sm:$0xff] }
  0xa4   : > { %3291 = vst [vmem:[#allocation16_spill] sm:$0xff] %v2706_v50  ;;  %2138 = vmatmul.msk.f32.gmra.mxu3 %vm443_vm0, %v948_v53  ;;  %v787_v53 = vmul.f32 %v2631_v47, %v2657_v6 }
  0xa7   : > { %v2716_v61 = vpop.permute.xlu2 %769 }
  0xa8   : > { %v2723_v43 = vmul.f32 %v2714_v40, %v2716_v61  ;;  %v2725_v45 = vpop.permute.xlu1 %744  ;;  %v366_v15 = vpop.permute.xlu0 %365 }
  0xa9   : > { %v2735_v38 = vmul.f32 %v2725_v45, %v2719_v5 }
  0xaa   : > { %3292 = vst [vmem:[#allocation17_spill] sm:$0xff] %v2723_v43  ;;  %v2742_v43 = vmul.f32 %v366_v15, %v2731_v27  ;;  %2167 = vmatmul.msk.f32.gmra.mxu0 %vm443_vm0, %v2738_v49  ;;  %v950_v49 = vmul.f32 %v2617_v35, %v2563_v7 }
  0xab   : > { %3293 = vst [vmem:[#allocation18_spill] sm:$0xff] %v2735_v38  ;;  %2105 = vmatmul.msk.f32.gmra.mxu1 %vm443_vm0, %v412_v48  ;;  %2123 = vmatmul.msk.f32.gmra.mxu2 %vm443_vm0, %v787_v53  ;;  %v788_v53 = vmul.f32 %v2547_v0, %v2690_v39  ;;  %v1728_v48 = vmul.f32 %v2515_v55, %v2567_v9 }
  0xac   : > { %3295 = vst [vmem:[#allocation20_spill] sm:$0xff] %v2742_v43  ;;  %2139 = vmatmul.msk.f32.gmra.mxu3 %vm443_vm0, %v949_v42  ;;  %v2761_v43 = vld [vmem:[%s2334_s16 + $0x69] sm:$0xff]  ;;  %v789_v9 = vmul.f32 %v2596_v23, %v2651_v63 }
  0xb0   : > { %v2754_v38 = vpop.permute.xlu1 %375  ;;  %v2756_v12 = vpop.permute.xlu0 %749 }
  0xb1   : > { %v2767_v42 = vmul.f32 %v2752_v21, %v2754_v38  ;;  %v2775_v50 = vmul.f32 %v2761_v43, %v2756_v12 }
  0xb2   : > { %2220 = vmatmul.msk.f32.vlgmr.msra.gmra.mxu0 %vm443_vm0, %v1728_v48  ;;  %v951_v48 = vmul.f32 %v361_v36, %v2661_v18 }
  0xb3   : > { %3296 = vst [vmem:[#allocation21_spill] sm:$0xff] %v2767_v42  ;;  %2106 = vmatmul.msk.f32.gmra.mxu1 %vm443_vm0, %v413_v44  ;;  %2124 = vmatmul.msk.f32.gmra.mxu2 %vm443_vm0, %v788_v53  ;;  %v2784_v42 = vld [vmem:[%s2334_s16 + $0x79] sm:$0xff]  ;;  %v414_v44 = vmul.f32 %v2533_v60, %v361_v36  ;;  %v1729_v53 = vmul.f32 %v2631_v47, %v2565_v8  ;;  %v2808_v60 = vpop.f32.mrf.mxu0  ;;  %v2818_v36 = vld [vmem:[%s2334_s16 + $0x81] sm:$0xff] }
  0xb4   : > { %3297 = vst [vmem:[#allocation22_spill] sm:$0xff] %v2775_v50  ;;  %2140 = vmatmul.msk.f32.gmra.mxu3 %vm443_vm0, %v950_v49  ;;  %v2792_v50 = vld [vmem:[%s2334_s16 + $0x7f] sm:$0xff] }
  0xb8   : > { %v2786_v55 = vpop.permute.xlu1 %759  ;;  %v381_v7 = vpop.permute.xlu0 %380 }
  0xb9   : > { %v2796_v49 = vmul.f32 %v2786_v55, %v2784_v42  ;;  %v2802_v37 = vmul.f32 %v381_v7, %v2792_v50 }
  0xba   : > { %2221 = vmatmul.msk.f32.gmra.mxu0 %vm443_vm0, %v1729_v53 }
  0xbb   : > { %3298 = vst [vmem:[#allocation23_spill] sm:$0xff] %v2796_v49  ;;  %2107 = vmatmul.msk.f32.gmra.mxu1 %vm443_vm0, %v414_v44  ;;  %2125 = vmatmul.msk.f32.gmra.mxu2 %vm443_vm0, %v789_v9  ;;  %v2811_v49 = vld [vmem:[%s2334_s16 + $0x8f] sm:$0xff]  ;;  %v790_v44 = vmul.f32 %v2695_v52, %v2725_v45  ;;  %v415_v9 = vmul.f32 %v2617_v35, %v366_v15  ;;  %v2839_v35 = vld [vmem:[%s2334_s16 + $0x97] sm:$0xff] }
  0xbc   : > { %3299 = vst [vmem:[#allocation24_spill] sm:$0xff] %v2802_v37  ;;  %2141 = vmatmul.msk.f32.gmra.mxu3 %vm443_vm0, %v951_v48  ;;  %v1730_v48 = vmul.f32 %v2547_v0, %v2512_v54  ;;  %v952_v37 = vmul.f32 %v2558_v3, %v366_v15  ;;  %v416_v15 = vmul.f32 %v2622_v41, %v2661_v18 }
  0xc0   : > { %v2813_v8 = vpop.permute.xlu1 %390  ;;  %v2815_v47 = vpop.permute.xlu0 %764 }
  0xc1   : > { %v2825_v53 = vmul.f32 %v2811_v49, %v2813_v8  ;;  %v2832_v22 = vmul.f32 %v2818_v36, %v2815_v47 }
  0xc2   : > { %2222 = vmatmul.msk.f32.gmra.mxu0 %vm443_vm0, %v1730_v48  ;;  %v1731_v48 = vmul.f32 %v2628_v46, %v2651_v63  ;;  %v417_v46 = vmul.f32 %v2558_v3, %v2754_v38  ;;  %v1732_v63 = vmul.f32 %v2695_v52, %v2549_v1  ;;  %v793_v1 = vmul.f32 %v2761_v43, %v2786_v55 }
  0xc3   : > { %3300 = vst [vmem:[#allocation25_spill] sm:$0xff] %v2825_v53  ;;  %2108 = vmatmul.msk.f32.gmra.mxu1 %vm443_vm0, %v415_v9  ;;  %2126 = vmatmul.msk.f32.gmra.mxu2 %vm443_vm0, %v790_v44  ;;  %v2842_v53 = vld [vmem:[%s2334_s16 + $0x91] sm:$0xff]  ;;  %v791_v44 = vmul.f32 %v2585_v16, %v2756_v12  ;;  %v953_v9 = vmul.f32 %v2684_v31, %v2622_v41  ;;  %v2872_v41 = vld [vmem:[%s2334_s16 + $0x99] sm:$0xff] }
  0xc4   : > { %3301 = vst [vmem:[#allocation26_spill] sm:$0xff] %v2832_v22  ;;  %2142 = vmatmul.msk.f32.gmra.mxu3 %vm443_vm0, %v952_v37  ;;  %v2848_v22 = vpop.f32.mrf.mxu0  ;;  %v418_v3 = vmul.f32 %v2684_v31, %v381_v7  ;;  %v955_v52 = vmul.f32 %v2614_v34, %v381_v7  ;;  %v419_v31 = vmul.f32 %v2681_v20, %v2731_v27 }
  0xc5   : > { %v1734_v7 = vmul.f32 %v2690_v39, %v2719_v5  ;;  %v1735_v39 = vmul.f32 %v2761_v43, %v2596_v23  ;;  %v1736_v43 = vmul.f32 %v2646_v58, %v2725_v45 }
  0xc8   : > { %v2844_v54 = vpop.permute.xlu1 %774  ;;  %v396_v0 = vpop.permute.xlu0 %395 }
  0xc9   : > { %v2854_v37 = vmul.f32 %v2842_v53, %v2844_v54  ;;  %v2861_v26 = vmul.f32 %v2839_v35, %v396_v0 }
  0xca   : > { %2223 = vmatmul.msk.f32.gmra.mxu0 %vm443_vm0, %v1731_v48  ;;  %v2902_v48 = vpop.f32.mrf.mxu2 }
  0xcb   : > { %3302 = vst [vmem:[#allocation27_spill] sm:$0xff] %v2854_v37  ;;  %2109 = vmatmul.msk.f32.gmra.mxu1 %vm443_vm0, %v416_v15  ;;  %2127 = vmatmul.msk.f32.gmra.mxu2 %vm443_vm0, %v791_v44  ;;  %v792_v37 = vmul.f32 %v2648_v59, %v2719_v5  ;;  %v954_v15 = vmul.f32 %v2754_v38, %v2731_v27  ;;  %v2920_v27 = vpop.f32.mrf.mxu3 }
  0xcc   : > { %2143 = vmatmul.msk.f32.gmra.mxu3 %vm443_vm0, %v953_v9  ;;  %v2884_v9 = vpop.f32.mrf.mxu0  ;;  %v1733_v38 = vmul.f32 %v2585_v16, %v2657_v6  ;;  %v794_v16 = vmul.f32 %v2646_v58, %v2815_v47  ;;  %v956_v6 = vmul.f32 %v2752_v21, %v2681_v20  ;;  %v795_v20 = vmul.f32 %v2716_v61, %v2784_v42 }
  0xcd   : > { %v420_v5 = vmul.f32 %v2614_v34, %v2813_v8  ;;  %v421_v34 = vmul.f32 %v2752_v21, %v396_v0 }
  0xd0   : > { %v2867_v18 = vpop.permute.xlu0 %779 }
  0xd1   : > { %v2882_v44 = vmul.f32 %v2872_v41, %v2867_v18  ;;  %v797_v45 = vmul.f32 %v2714_v40, %v2867_v18 }
  0xd2   : > { %2224 = vmatmul.msk.f32.gmra.mxu0 %vm443_vm0, %v1732_v63 }
  0xd3   : > { %2110 = vmatmul.msk.f32.gmra.mxu1 %vm443_vm0, %v417_v46  ;;  %2128 = vmatmul.msk.f32.gmra.mxu2 %vm443_vm0, %v792_v37  ;;  %v2904_v46 = vpop.f32.mrf.mxu1  ;;  %v2943_v23 = vpop.f32.mrf.mxu3 }
  0xd4   : > { %2144 = vmatmul.msk.f32.gmra.mxu3 %vm443_vm0, %v954_v15  ;;  %v2900_v37 = vpop.f32.mrf.mxu0  ;;  %v2922_v15 = vpop.f32.mrf.mxu2 }
  0xda   : > { %2225 = vmatmul.msk.f32.gmra.mxu0 %vm443_vm0, %v1733_v38  ;;  %v796_v38 = vmul.f32 %v2818_v36, %v2844_v54 }
  0xdb   : > { %2111 = vmatmul.msk.f32.gmra.mxu1 %vm443_vm0, %v418_v3  ;;  %2129 = vmatmul.msk.f32.gmra.mxu2 %vm443_vm0, %v793_v1  ;;  %v957_v1 = vmul.f32 %v2813_v8, %v2792_v50  ;;  %v2932_v3 = vpop.f32.mrf.mxu1  ;;  %v958_v8 = vmul.f32 %v2679_v4, %v396_v0  ;;  %v1737_v0 = vmul.f32 %v2756_v12, %v2784_v42 }
  0xdc   : > { %2145 = vmatmul.msk.f32.gmra.mxu3 %vm443_vm0, %v955_v52  ;;  %v2918_v63 = vpop.f32.mrf.mxu0  ;;  %v1738_v42 = vmul.f32 %v2818_v36, %v2648_v59  ;;  %v1739_v59 = vmul.f32 %v2714_v40, %v2786_v55 }
  0xe2   : > { %2226 = vmatmul.msk.f32.gmra.mxu0 %vm443_vm0, %v1734_v7 }
  0xe3   : > { %2112 = vmatmul.msk.f32.gmra.mxu1 %vm443_vm0, %v419_v31  ;;  %2130 = vmatmul.msk.f32.gmra.mxu2 %vm443_vm0, %v794_v16  ;;  %v2948_v31 = vpop.f32.mrf.mxu2  ;;  %v2954_v21 = vpop.f32.mrf.mxu1 }
  0xe4   : > { %2146 = vmatmul.msk.f32.gmra.mxu3 %vm443_vm0, %v956_v6  ;;  %v2941_v52 = vpop.f32.mrf.mxu0  ;;  %v2956_v16 = vpop.permute.xlu2 %400 }
  0xe5   : > { %v422_v6 = vmul.f32 %v2956_v16, %v2792_v50  ;;  %v959_v58 = vmul.f32 %v2811_v49, %v2956_v16 }
  0xea   : > { %2227 = vmatmul.msk.f32.gmra.mxu0 %vm443_vm0, %v1735_v39 }
  0xeb   : > { %2113 = vmatmul.msk.f32.gmra.mxu1 %vm443_vm0, %v420_v5  ;;  %2131 = vmatmul.msk.f32.gmra.mxu2 %vm443_vm0, %v795_v20  ;;  %v2970_v20 = vpop.f32.mrf.mxu3  ;;  %v2974_v50 = vpop.f32.mrf.mxu2 }
  0xec   : > { %2147 = vmatmul.msk.f32.gmra.mxu3 %vm443_vm0, %v957_v1  ;;  %v2966_v7 = vpop.f32.mrf.mxu0  ;;  %v2976_v5 = vpop.permute.xlu1 %405 }
  0xed   : > { %v2978_v49 = vpop.f32.mrf.mxu1  ;;  %v423_v12 = vmul.f32 %v2679_v4, %v2976_v5  ;;  %v960_v39 = vmul.f32 %v2839_v35, %v2976_v5 }
  0xf2   : > { %2228 = vmatmul.msk.f32.gmra.mxu0 %vm443_vm0, %v1736_v43 }
  0xf3   : > { %2114 = vmatmul.msk.f32.gmra.mxu1 %vm443_vm0, %v421_v34  ;;  %2132 = vmatmul.msk.f32.gmra.mxu2 %vm443_vm0, %v796_v38  ;;  %v2993_v38 = vpop.f32.mrf.mxu3 }
  0xf4   : > { %2148 = vmatmul.msk.f32.gmra.mxu3 %vm443_vm0, %v958_v8  ;;  %v2991_v1 = vpop.f32.mrf.mxu0 }
  0xfa   : > { %2229 = vmatmul.msk.f32.gmra.mxu0 %vm443_vm0, %v1737_v0 }
  0xfb   : > { %2115 = vmatmul.msk.f32.gmra.mxu1 %vm443_vm0, %v422_v6  ;;  %2133 = vmatmul.msk.f32.gmra.mxu2 %vm443_vm0, %v797_v45 }
  0xfc   : > { %2149 = vmatmul.msk.f32.gmra.mxu3 %vm443_vm0, %v959_v58  ;;  %v3005_v43 = vpop.f32.mrf.mxu0  ;;  %v1726_v58 = vld [vmem:[%s2334_s16 + $0xa1] sm:$0xff] }
 0x102   : > { %2230 = vmatmul.msk.f32.gmra.mxu0 %vm443_vm0, %v1738_v42  ;;  %v1727_v42 = vld [vmem:[%s2334_s16 + $0xa9] sm:$0xff] }
 0x103   : > { %2116 = vmatmul.msk.f32.gmra.mxu1 %vm443_vm0, %v423_v12  ;;  %2186 = vmatmul.msk.f32.vlgmr.msra.gmra.mxu2 %vm443_vm0, %v2606_v33 }
 0x104   : > { %2150 = vmatmul.msk.f32.gmra.mxu3 %vm443_vm0, %v960_v39 }
 0x106   : > { %v865_v4 = vpop.f32.mrf.mxu2 }
 0x108   : > { %v622_v34 = vpop.f32.mrf.mxu1 }
 0x109   : > { %v623_v36 = vadd.f32 %v622_v34, %v2744_v25  ;;  %v1740_v25 = vmul.f32 %v2842_v53, %v2815_v47  ;;  %v3021_v53 = vpop.f32.mrf.mxu0 }
 0x10a   : > { %2231 = vmatmul.msk.f32.gmra.mxu0 %vm443_vm0, %v1739_v59 }
 0x10b   : > { %2169 = vmatmul.msk.f32.vlgmr.msra.gmra.mxu1 %vm443_vm0, %v2578_v13  ;;  %2187 = vmatmul.msk.f32.gmra.mxu2 %vm443_vm0, %v2603_v29  ;;  %v913_v35 = vadd.f32 %v865_v4, %v623_v36  ;;  %v1743_v4 = vmul.f32 %v1727_v42, %v2867_v18 }
 0x10c   : > { %2203 = vmatmul.msk.f32.vlgmr.msra.gmra.mxu3 %vm443_vm0, %v2359_v14 }
 0x10e   : > { %v868_v33 = vpop.f32.mrf.mxu2 }
 0x10f   : > { %v1028_v8 = vpop.f32.mrf.mxu3 }
 0x110   : > { %v3007_v6 = vadd.f32 %v1028_v8, %v913_v35  ;;  %v625_v40 = vpop.f32.mrf.mxu1 }
 0x111   : > { %v626_v13 = vadd.f32 %v625_v40, %v2781_v17 }
 0x112   : > { %2232 = vmatmul.msk.f32.gmra.mxu0 %vm443_vm0, %v1740_v25 }
 0x113   : > { %2170 = vmatmul.msk.f32.gmra.mxu1 %vm443_vm0, %v2574_v11  ;;  %2188 = vmatmul.msk.f32.gmra.mxu2 %vm443_vm0, %v2539_v62  ;;  %v914_v29 = vadd.f32 %v868_v33, %v626_v13  ;;  %v1741_v11 = vmul.f32 %v2872_v41, %v2716_v61  ;;  %v3038_v41 = vpop.f32.mrf.mxu0  ;;  %v3303_v33 = vld [vmem:[#allocation12_spill] sm:$0xff] }
 0x114   : > { %2204 = vmatmul.msk.f32.gmra.mxu3 %vm443_vm0, %v2375_v19 }
 0x116   : > { %v871_v14 = vpop.f32.mrf.mxu2 }
 0x117   : > { %v1031_v55 = vpop.f32.mrf.mxu3 }
 0x118   : > { %v3019_v45 = vadd.f32 %v1031_v55, %v914_v29  ;;  %v628_v47 = vpop.f32.mrf.mxu1  ;;  %v3307_v29 = vld [vmem:[#allocation20_spill] sm:$0xff] }
 0x119   : > { %v629_v17 = vadd.f32 %v628_v47, %v2808_v60  ;;  %v1742_v60 = vmul.f32 %v1726_v58, %v2844_v54  ;;  %v3308_v55 = vld [vmem:[#allocation4_spill] sm:$0xff] }
 0x11a   : > { %2233 = vmatmul.msk.f32.gmra.mxu0 %vm443_vm0, %v1741_v11 }
 0x11b   : > { %2171 = vmatmul.msk.f32.gmra.mxu1 %vm443_vm0, %v2519_v56  ;;  %2189 = vmatmul.msk.f32.gmra.mxu2 %vm443_vm0, %v2634_v51  ;;  %v915_v62 = vadd.f32 %v871_v14, %v629_v17 }
 0x11c   : > { %2205 = vmatmul.msk.f32.gmra.mxu3 %vm443_vm0, %v2391_v24 }
 0x11e   : > { %v874_v19 = vpop.f32.mrf.mxu2 }
 0x11f   : > { %v1034_v0 = vpop.f32.mrf.mxu3 }
 0x120   : > { %v3034_v12 = vadd.f32 %v1034_v0, %v915_v62  ;;  %v631_v61 = vpop.f32.mrf.mxu1 }
 0x121   : > { %v632_v56 = vadd.f32 %v631_v61, %v2848_v22  ;;  %v3310_v61 = vld [vmem:[#allocation10_spill] sm:$0xff] }
 0x122   : > { %2234 = vmatmul.msk.f32.gmra.mxu0 %vm443_vm0, %v1742_v60 }
 0x123   : > { %2172 = vmatmul.msk.f32.gmra.mxu1 %vm443_vm0, %v2638_v57  ;;  %2190 = vmatmul.msk.f32.gmra.mxu2 %vm443_vm0, %v2671_v30  ;;  %v916_v51 = vadd.f32 %v874_v19, %v632_v56  ;;  %v3311_v56 = vld [vmem:[#allocation6_spill] sm:$0xff] }
 0x124   : > { %2206 = vmatmul.msk.f32.gmra.mxu3 %vm443_vm0, %v2406_v28  ;;  %v3059_v28 = vpop.f32.mrf.mxu0 }
 0x126   : > { %v877_v24 = vpop.f32.mrf.mxu2 }
 0x127   : > { %v1037_v39 = vpop.f32.mrf.mxu3 }
 0x128   : > { %v3048_v54 = vadd.f32 %v1037_v39, %v916_v51  ;;  %v634_v22 = vpop.f32.mrf.mxu1 }
 0x129   : > { %v635_v34 = vadd.f32 %v634_v22, %v2904_v46 }
 0x12a   : > { %2235 = vmatmul.msk.f32.gmra.mxu0 %vm443_vm0, %v1743_v4 }
 0x12b   : > { %2173 = vmatmul.msk.f32.gmra.mxu1 %vm443_vm0, %v2553_v2  ;;  %2191 = vmatmul.msk.f32.gmra.mxu2 %vm443_vm0, %v2571_v10  ;;  %v917_v30 = vadd.f32 %v877_v24, %v635_v34  ;;  %v3304_v2 = vld [vmem:[#allocation14_spill] sm:$0xff]  ;;  %v3313_v34 = vld [vmem:[#allocation21_spill] sm:$0xff] }
 0x12c   : > { %2207 = vmatmul.msk.f32.gmra.mxu3 %vm443_vm0, %v2421_v32  ;;  %v3305_v10 = vld [vmem:[#allocation2_spill] sm:$0xff]  ;;  %v3070_v8 = vpop.f32.mrf.mxu0 }
 0x12e   : > { %v880_v57 = vpop.f32.mrf.mxu2 }
 0x12f   : > { %v1040_v59 = vpop.f32.mrf.mxu3 }
 0x130   : > { %v3061_v36 = vadd.f32 %v1040_v59, %v917_v30  ;;  %v637_v18 = vpop.f32.mrf.mxu1  ;;  %v3314_v30 = vld [vmem:[#allocation3_spill] sm:$0xff] }
 0x131   : > { %v638_v46 = vadd.f32 %v637_v18, %v2932_v3  ;;  %v3306_v3 = vld [vmem:[#allocation16_spill] sm:$0xff] }
 0x133   : > { %2174 = vmatmul.msk.f32.gmra.mxu1 %vm443_vm0, %v3303_v33  ;;  %2192 = vmatmul.msk.f32.gmra.mxu2 %vm443_vm0, %v3304_v2  ;;  %v918_v35 = vadd.f32 %v880_v57, %v638_v46 }
 0x134   : > { %2208 = vmatmul.msk.f32.gmra.mxu3 %vm443_vm0, %v3305_v10  ;;  %v3083_v58 = vpop.f32.mrf.mxu0  ;;  %v3316_v10 = vld [vmem:[#allocation24_spill] sm:$0xff] }
 0x136   : > { %v883_v32 = vpop.f32.mrf.mxu2 }
 0x137   : > { %v1043_v40 = vpop.f32.mrf.mxu3 }
 0x138   : > { %v3072_v25 = vadd.f32 %v1043_v40, %v918_v35  ;;  %v640_v13 = vpop.f32.mrf.mxu1  ;;  %v3317_v35 = vld [vmem:[#allocation5_spill] sm:$0xff] }
 0x139   : > { %v641_v14 = vadd.f32 %v640_v13, %v2954_v21  ;;  %v3309_v21 = vld [vmem:[#allocation9_spill] sm:$0xff] }
 0x13b   : > { %2175 = vmatmul.msk.f32.gmra.mxu1 %vm443_vm0, %v3306_v3  ;;  %2193 = vmatmul.msk.f32.gmra.mxu2 %vm443_vm0, %v3307_v29  ;;  %v919_v11 = vadd.f32 %v883_v32, %v641_v14 }
 0x13c   : > { %2209 = vmatmul.msk.f32.gmra.mxu3 %vm443_vm0, %v3308_v55  ;;  %v3095_v4 = vpop.f32.mrf.mxu0 }
 0x13e   : > { %v886_v47 = vpop.f32.mrf.mxu2 }
 0x13f   : > { %v1046_v17 = vpop.f32.mrf.mxu3 }
 0x140   : > { %v3081_v19 = vadd.f32 %v1046_v17, %v919_v11  ;;  %v643_v62 = vpop.f32.mrf.mxu1  ;;  %v3320_v17 = vld [vmem:[#allocation7_spill] sm:$0xff] }
 0x141   : > { %v644_v0 = vadd.f32 %v643_v62, %v2978_v49  ;;  %v3312_v49 = vld [vmem:[#allocation18_spill] sm:$0xff] }
 0x143   : > { %2176 = vmatmul.msk.f32.gmra.mxu1 %vm443_vm0, %v3309_v21  ;;  %2194 = vmatmul.msk.f32.gmra.mxu2 %vm443_vm0, %v3310_v61  ;;  %v920_v60 = vadd.f32 %v886_v47, %v644_v0  ;;  %v3319_v47 = vld [vmem:[#allocation13_spill] sm:$0xff] }
 0x144   : > { %2210 = vmatmul.msk.f32.gmra.mxu3 %vm443_vm0, %v3311_v56  ;;  %v3112_v40 = vpop.f32.mrf.mxu0  ;;  %v3321_v56 = vld [vmem:[#allocation23_spill] sm:$0xff] }
 0x146   : > { %v889_v24 = vpop.f32.mrf.mxu2 }
 0x147   : > { %v1049_v51 = vpop.f32.mrf.mxu3 }
 0x148   : > { %v3092_v42 = vadd.f32 %v1049_v51, %v920_v60  ;;  %v646_v39 = vpop.f32.mrf.mxu1 }
 0x149   : > { %v647_v22 = vadd.f32 %v646_v39, %v2902_v48  ;;  %v3315_v48 = vld [vmem:[#allocation22_spill] sm:$0xff]  ;;  %v3323_v39 = vld [vmem:[#allocation8_spill] sm:$0xff] }
 0x14b   : > { %2177 = vmatmul.msk.f32.gmra.mxu1 %vm443_vm0, %v3312_v49  ;;  %2195 = vmatmul.msk.f32.gmra.mxu2 %vm443_vm0, %v3313_v34  ;;  %v921_v57 = vadd.f32 %v889_v24, %v647_v22  ;;  %v3322_v24 = vld [vmem:[#allocation25_spill] sm:$0xff] }
 0x14c   : > { %2211 = vmatmul.msk.f32.gmra.mxu3 %vm443_vm0, %v3314_v30  ;;  %v3123_v0 = vpop.f32.mrf.mxu0 }
 0x14e   : > { %v892_v59 = vpop.f32.mrf.mxu2 }
 0x14f   : > { %v1052_v18 = vpop.f32.mrf.mxu3 }
 0x150   : > { %v3103_v46 = vadd.f32 %v1052_v18, %v921_v57  ;;  %v649_v33 = vpop.f32.mrf.mxu1 }
 0x151   : > { %v650_v2 = vadd.f32 %v649_v33, %v2922_v15  ;;  %v3318_v15 = vld [vmem:[#allocation11_spill] sm:$0xff] }
 0x152   : > { %v3325_v33 = vld [vmem:[#allocation15_spill] sm:$0xff] }
 0x153   : > { %2178 = vmatmul.msk.f32.gmra.mxu1 %vm443_vm0, %v3315_v48  ;;  %2196 = vmatmul.msk.f32.gmra.mxu2 %vm443_vm0, %v3316_v10  ;;  %v922_v32 = vadd.f32 %v892_v59, %v650_v2  ;;  %v1416_v2 = vld [vmem:[%s2334_s16 + $0x9f] sm:$0xff] }
 0x154   : > { %2212 = vmatmul.msk.f32.gmra.mxu3 %vm443_vm0, %v3317_v35  ;;  %v3136_v30 = vpop.f32.mrf.mxu0 }
 0x156   : > { %v895_v13 = vpop.f32.mrf.mxu2 }
 0x157   : > { %v1055_v14 = vpop.f32.mrf.mxu3 }
 0x158   : > { %v3114_v3 = vadd.f32 %v1055_v14, %v922_v32  ;;  %v652_v29 = vpop.f32.mrf.mxu1 }
 0x159   : > { %v653_v55 = vadd.f32 %v652_v29, %v2948_v31  ;;  %v3326_v29 = vld [vmem:[#allocation17_spill] sm:$0xff] }
 0x15b   : > { %2179 = vmatmul.msk.f32.gmra.mxu1 %vm443_vm0, %v3318_v15  ;;  %2197 = vmatmul.msk.f32.gmra.mxu2 %vm443_vm0, %v3319_v47  ;;  %v923_v11 = vadd.f32 %v895_v13, %v653_v55  ;;  %v3327_v55 = vld [vmem:[#allocation19_spill] sm:$0xff] }
 0x15c   : > { %2213 = vmatmul.msk.f32.gmra.mxu3 %vm443_vm0, %v3320_v17  ;;  %v1811_v14 = vpop.f32.mrf.mxu0  ;;  %v1417_v15 = vld [vmem:[%s2334_s16 + $0xa7] sm:$0xff] }
 0x15e   : > { %v898_v62 = vpop.f32.mrf.mxu2 }
 0x15f   : > { %v1058_v21 = vpop.f32.mrf.mxu3 }
 0x160   : > { %v3125_v61 = vadd.f32 %v1058_v21, %v923_v11  ;;  %v655_v60 = vpop.f32.mrf.mxu1  ;;  %v1579_v21 = vld [vmem:[%s2334_s16 + $0xa0] sm:$0xff] }
 0x161   : > { %v656_v31 = vadd.f32 %v655_v60, %v2974_v50  ;;  %v3324_v50 = vld [vmem:[#allocation26_spill] sm:$0xff]  ;;  %v3328_v60 = vld [vmem:[#allocation27_spill] sm:$0xff] }
 0x163   : > { %2180 = vmatmul.msk.f32.gmra.mxu1 %vm443_vm0, %v3321_v56  ;;  %2198 = vmatmul.msk.f32.gmra.mxu2 %vm443_vm0, %v3322_v24  ;;  %v924_v51 = vadd.f32 %v898_v62, %v656_v31 }
 0x164   : > { %2214 = vmatmul.msk.f32.gmra.mxu3 %vm443_vm0, %v3323_v39  ;;  %v1814_v56 = vpop.f32.mrf.mxu0 }
 0x166   : > { %v901_v22 = vpop.f32.mrf.mxu2 }
 0x167   : > { %v1061_v49 = vpop.f32.mrf.mxu3 }
 0x168   : > { %v3134_v34 = vadd.f32 %v1061_v49, %v924_v51  ;;  %v658_v57 = vpop.f32.mrf.mxu1  ;;  %v1580_v49 = vld [vmem:[%s2334_s16 + $0xa8] sm:$0xff]  ;;  %s2238_s16 = sshll.u32 %s3330_s25, 7 }
 0x169   : > { %v659_v59 = vadd.f32 %v658_v57, %v2920_v27  ;;  %v1432_v27 = vmul.f32 %v1416_v2, %v2956_v16  ;;  %v1433_v16 = vmul.f32 %v1417_v15, %v2976_v5  ;;  %s3187_s12 = scalar_lea.vmem %s3265_s5, %s2238_s16 }
 0x16b   : > { %2181 = vmatmul.msk.f32.gmra.mxu1 %vm443_vm0, %v3324_v50  ;;  %2199 = vmatmul.msk.f32.gmra.mxu2 %vm443_vm0, %v2861_v26  ;;  %v925_v18 = vadd.f32 %v901_v22, %v659_v59 }
 0x16c   : > { %2215 = vmatmul.msk.f32.gmra.mxu3 %vm443_vm0, %v3325_v33  ;;  %v1817_v59 = vpop.f32.mrf.mxu0  ;;  %v1223_v33 = vadd.f32 %v2884_v9, %v3007_v6 }
 0x16e   : > { %v904_v48 = vpop.f32.mrf.mxu2 }
 0x16f   : > { %v1064_v10 = vpop.f32.mrf.mxu3 }
 0x170   : > { %v3146_v32 = vadd.f32 %v1064_v10, %v925_v18  ;;  %v661_v35 = vpop.f32.mrf.mxu1 }
 0x171   : > { %v662_v13 = vadd.f32 %v661_v35, %v2943_v23 }
 0x173   : > { %2182 = vmatmul.msk.f32.gmra.mxu1 %vm443_vm0, %v3326_v29  ;;  %2200 = vmatmul.msk.f32.gmra.mxu2 %vm443_vm0, %v1432_v27  ;;  %v926_v26 = vadd.f32 %v904_v48, %v662_v13  ;;  %v1224_v13 = vadd.f32 %v2900_v37, %v3019_v45  ;;  %v1225_v37 = vadd.f32 %v2918_v63, %v3034_v12 }
 0x174   : > { %2216 = vmatmul.msk.f32.gmra.mxu3 %vm443_vm0, %v3327_v55 }
 0x176   : > { %v907_v47 = vpop.f32.mrf.mxu2 }
 0x177   : > { %v1067_v11 = vpop.f32.mrf.mxu3 }
 0x178   : > { %v3156_v17 = vadd.f32 %v1067_v11, %v926_v26  ;;  %v664_v62 = vpop.f32.mrf.mxu1  ;;  %v1820_v26 = vpop.f32.mrf.mxu0 }
 0x179   : > { %v665_v23 = vadd.f32 %v664_v62, %v2970_v20 }
 0x17b   : > { %2183 = vmatmul.msk.f32.gmra.mxu1 %vm443_vm0, %v3328_v60  ;;  %2201 = vmatmul.msk.f32.gmra.mxu2 %vm443_vm0, %v1433_v16  ;;  %v927_v31 = vadd.f32 %v907_v47, %v665_v23 }
 0x17c   : > { %2217 = vmatmul.msk.f32.gmra.mxu3 %vm443_vm0, %v1579_v21 }
 0x17e   : > { %v910_v24 = vpop.f32.mrf.mxu2 }
 0x17f   : > { %v1070_v51 = vpop.f32.mrf.mxu3 }
 0x180   : > { %v3165_v39 = vadd.f32 %v1070_v51, %v927_v31  ;;  %v667_v22 = vpop.f32.mrf.mxu1  ;;  %v1823_v23 = vpop.f32.mrf.mxu0 }
 0x181   : > { %v668_v5 = vadd.f32 %v667_v22, %v2993_v38 }
 0x183   : > { %2184 = vmatmul.msk.f32.gmra.mxu1 %vm443_vm0, %v2882_v44  ;;  %v928_v20 = vadd.f32 %v910_v24, %v668_v5  ;;  %v3180_v44 = vld [vmem:[%s3262_s2] ss:$0 sm:$0xff] }
 0x184   : > { %2218 = vmatmul.msk.f32.gmra.mxu3 %vm443_vm0, %v1580_v49 }
 0x186   : > { %v1501_v57 = vpop.f32.mrf.mxu2 }
 0x187   : > { %v1073_v50 = vpop.f32.mrf.mxu3 }
 0x188   : > { %v3172_v18 = vadd.f32 %v1073_v50, %v928_v20  ;;  %v1338_v2 = vpop.f32.mrf.mxu1 }
 0x189   : > { %v1386_v48 = vadd.f32 %v1338_v2, %v1223_v33  ;;  %v1826_v33 = vpop.f32.mrf.mxu0 }
 0x18b   : > { %v1549_v35 = vadd.f32 %v1501_v57, %v1386_v48  ;;  %v1226_v57 = vadd.f32 %v2941_v52, %v3048_v54 }
 0x18e   : > { %v1504_v10 = vpop.f32.mrf.mxu2 }
 0x18f   : > { %v1648_v38 = vpop.f32.mrf.mxu3 }
 0x190   : > { %v1696_v27 = vadd.f32 %v1648_v38, %v1549_v35  ;;  %v1341_v29 = vpop.f32.mrf.mxu1 }
 0x191   : > { %v1387_v15 = vadd.f32 %v1341_v29, %v1224_v13  ;;  %v1227_v29 = vadd.f32 %v2966_v7, %v3061_v36 }
 0x192   : > { %v1859_v55 = vadd.f32 %v1811_v14, %v1696_v27 }
 0x193   : > { %v1550_v47 = vadd.f32 %v1504_v10, %v1387_v15 }
 0x194   : > { %v1879_v9 = vadd.f32 %v3180_v44, %v1859_v55 }
 0x196   : > { %1895 = vst [vmem:[%s3187_s12] sm:$0xff] %v1879_v9  ;;  %v1507_v6 = vpop.f32.mrf.mxu2  ;;  %v1933_v60 = vmul.f32 %v1879_v9, %v1879_v9 }
 0x197   : > { %v1651_v11 = vpop.f32.mrf.mxu3 }
 0x198   : > { %v1697_v62 = vadd.f32 %v1651_v11, %v1550_v47  ;;  %v1344_v45 = vpop.f32.mrf.mxu1  ;;  %v1829_v11 = vpop.f32.mrf.mxu0 }
 0x199   : > { %v1388_v16 = vadd.f32 %v1344_v45, %v1225_v37 }
 0x19a   : > { %v1860_v14 = vadd.f32 %v1814_v56, %v1697_v62 }
 0x19b   : > { %v1551_v22 = vadd.f32 %v1507_v6, %v1388_v16 }
 0x19c   : > { %v1880_v21 = vadd.f32 %v3180_v44, %v1860_v14  ;;  %v1228_v14 = vadd.f32 %v2991_v1, %v3072_v25 }
 0x19e   : > { %1896 = vst [vmem:[%s3187_s12 + $0x8] sm:$0xff] %v1880_v21  ;;  %v1911_v31 = vadd.f32 %v1880_v21, %v1879_v9  ;;  %v1934_v24 = vmul.f32 %v1880_v21, %v1880_v21  ;;  %v1510_v51 = vpop.f32.mrf.mxu2 }
 0x19f   : > { %v1654_v5 = vpop.f32.mrf.mxu3 }
 0x1a0   : > { %v1949_v49 = vadd.f32 %v1934_v24, %v1933_v60  ;;  %v1698_v20 = vadd.f32 %v1654_v5, %v1551_v22  ;;  %v1347_v63 = vpop.f32.mrf.mxu1 }
 0x1a1   : > { %v1389_v56 = vadd.f32 %v1347_v63, %v1226_v57  ;;  %v1832_v57 = vpop.f32.mrf.mxu0 }
 0x1a2   : > { %v1861_v12 = vadd.f32 %v1817_v59, %v1698_v20 }
 0x1a3   : > { %v1552_v35 = vadd.f32 %v1510_v51, %v1389_v56 }
 0x1a4   : > { %v1881_v50 = vadd.f32 %v3180_v44, %v1861_v12 }
 0x1a6   : > { %1897 = vst [vmem:[%s3187_s12 + $0x10] sm:$0xff] %v1881_v50  ;;  %v1912_v2 = vadd.f32 %v1911_v31, %v1881_v50  ;;  %v1935_v48 = vmul.f32 %v1881_v50, %v1881_v50  ;;  %v1513_v10 = vpop.f32.mrf.mxu2 }
 0x1a7   : > { %v1657_v38 = vpop.f32.mrf.mxu3 }
 0x1a8   : > { %v1950_v27 = vadd.f32 %v1949_v49, %v1935_v48  ;;  %v1699_v13 = vadd.f32 %v1657_v38, %v1552_v35  ;;  %v1350_v55 = vpop.f32.mrf.mxu1  ;;  %v1229_v49 = vadd.f32 %v3005_v43, %v3081_v19  ;;  %v1230_v35 = vadd.f32 %v3021_v53, %v3092_v42 }
 0x1a9   : > { %v1390_v54 = vadd.f32 %v1350_v55, %v1227_v29 }
 0x1aa   : > { %v1862_v52 = vadd.f32 %v1820_v26, %v1699_v13 }
 0x1ab   : > { %v1553_v47 = vadd.f32 %v1513_v10, %v1390_v54 }
 0x1ac   : > { %v1882_v59 = vadd.f32 %v3180_v44, %v1862_v52 }
 0x1ae   : > { %1898 = vst [vmem:[%s3187_s12 + $0x18] sm:$0xff] %v1882_v59  ;;  %v1913_v15 = vadd.f32 %v1912_v2, %v1882_v59  ;;  %v1936_v9 = vmul.f32 %v1882_v59, %v1882_v59  ;;  %v1516_v6 = vpop.f32.mrf.mxu2 }
 0x1af   : > { %v1660_v62 = vpop.f32.mrf.mxu3 }
 0x1b0   : > { %v1951_v37 = vadd.f32 %v1950_v27, %v1936_v9  ;;  %v1700_v45 = vadd.f32 %v1660_v62, %v1553_v47  ;;  %v1353_v16 = vpop.f32.mrf.mxu1  ;;  %v1835_v27 = vpop.f32.mrf.mxu0  ;;  %v1231_v9 = vadd.f32 %v3038_v41, %v3103_v46 }
 0x1b1   : > { %v1391_v36 = vadd.f32 %v1353_v16, %v1228_v14 }
 0x1b2   : > { %v1863_v7 = vadd.f32 %v1823_v23, %v1700_v45 }
 0x1b3   : > { %v1554_v24 = vadd.f32 %v1516_v6, %v1391_v36 }
 0x1b4   : > { %v1883_v26 = vadd.f32 %v3180_v44, %v1863_v7 }
 0x1b6   : > { %1899 = vst [vmem:[%s3187_s12 + $0x20] sm:$0xff] %v1883_v26  ;;  %v1914_v21 = vadd.f32 %v1913_v15, %v1883_v26  ;;  %v1937_v60 = vmul.f32 %v1883_v26, %v1883_v26  ;;  %v1519_v31 = vpop.f32.mrf.mxu2  ;;  %v1232_v26 = vadd.f32 %v3059_v28, %v3114_v3 }
 0x1b7   : > { %v1663_v51 = vpop.f32.mrf.mxu3 }
 0x1b8   : > { %v1952_v22 = vadd.f32 %v1951_v37, %v1937_v60  ;;  %v1701_v5 = vadd.f32 %v1663_v51, %v1554_v24  ;;  %v1356_v20 = vpop.f32.mrf.mxu1 }
 0x1b9   : > { %v1392_v25 = vadd.f32 %v1356_v20, %v1229_v49 }
 0x1ba   : > { %v1864_v1 = vadd.f32 %v1826_v33, %v1701_v5 }
 0x1bb   : > { %v1555_v50 = vadd.f32 %v1519_v31, %v1392_v25 }
 0x1bc   : > { %v1884_v23 = vadd.f32 %v3180_v44, %v1864_v1  ;;  %v1233_v1 = vadd.f32 %v3070_v8, %v3125_v61 }
 0x1be   : > { %1900 = vst [vmem:[%s3187_s12 + $0x28] sm:$0xff] %v1884_v23  ;;  %v1915_v63 = vadd.f32 %v1914_v21, %v1884_v23  ;;  %v1938_v12 = vmul.f32 %v1884_v23, %v1884_v23  ;;  %v1522_v56 = vpop.f32.mrf.mxu2 }
 0x1bf   : > { %v1666_v2 = vpop.f32.mrf.mxu3 }
 0x1c0   : > { %v1953_v48 = vadd.f32 %v1952_v22, %v1938_v12  ;;  %v1702_v10 = vadd.f32 %v1666_v2, %v1555_v50  ;;  %v1359_v38 = vpop.f32.mrf.mxu1 }
 0x1c1   : > { %v1393_v19 = vadd.f32 %v1359_v38, %v1230_v35  ;;  %v1234_v35 = vadd.f32 %v3083_v58, %v3134_v34 }
 0x1c2   : > { %v1865_v43 = vadd.f32 %v1829_v11, %v1702_v10  ;;  %v1838_v11 = vpop.f32.mrf.mxu0 }
 0x1c3   : > { %v1556_v52 = vadd.f32 %v1522_v56, %v1393_v19 }
 0x1c4   : > { %v1885_v33 = vadd.f32 %v3180_v44, %v1865_v43 }
 0x1c6   : > { %1901 = vst [vmem:[%s3187_s12 + $0x30] sm:$0xff] %v1885_v33  ;;  %v1916_v13 = vadd.f32 %v1915_v63, %v1885_v33  ;;  %v1939_v29 = vmul.f32 %v1885_v33, %v1885_v33  ;;  %v1525_v55 = vpop.f32.mrf.mxu2 }
 0x1c7   : > { %v1669_v54 = vpop.f32.mrf.mxu3 }
 0x1c8   : > { %v1954_v59 = vadd.f32 %v1953_v48, %v1939_v29  ;;  %v1703_v15 = vadd.f32 %v1669_v54, %v1556_v52  ;;  %v1362_v6 = vpop.f32.mrf.mxu1 }
 0x1c9   : > { %v1394_v42 = vadd.f32 %v1362_v6, %v1231_v9 }
 0x1ca   : > { %v1866_v53 = vadd.f32 %v1832_v57, %v1703_v15  ;;  %v1841_v5 = vpop.f32.mrf.mxu0 }
 0x1cb   : > { %v1557_v14 = vadd.f32 %v1525_v55, %v1394_v42 }
 0x1cc   : > { %v1886_v47 = vadd.f32 %v3180_v44, %v1866_v53 }
 0x1ce   : > { %1902 = vst [vmem:[%s3187_s12 + $0x38] sm:$0xff] %v1886_v47  ;;  %v1917_v62 = vadd.f32 %v1916_v13, %v1886_v47  ;;  %v1940_v37 = vmul.f32 %v1886_v47, %v1886_v47  ;;  %v1528_v45 = vpop.f32.mrf.mxu2 }
 0x1cf   : > { %v1672_v16 = vpop.f32.mrf.mxu3 }
 0x1d0   : > { %v1955_v7 = vadd.f32 %v1954_v59, %v1940_v37  ;;  %v1704_v36 = vadd.f32 %v1672_v16, %v1557_v14  ;;  %v1365_v21 = vpop.f32.mrf.mxu1  ;;  %v1235_v59 = vadd.f32 %v3095_v4, %v3146_v32 }
 0x1d1   : > { %v1395_v46 = vadd.f32 %v1365_v21, %v1232_v26 }
 0x1d2   : > { %v1867_v41 = vadd.f32 %v1835_v27, %v1704_v36  ;;  %v1844_v43 = vpop.f32.mrf.mxu0 }
 0x1d3   : > { %v1558_v22 = vadd.f32 %v1528_v45, %v1395_v46  ;;  %v1236_v45 = vadd.f32 %v3112_v40, %v3156_v17 }
 0x1d4   : > { %v1887_v60 = vadd.f32 %v3180_v44, %v1867_v41 }
 0x1d6   : > { %1903 = vst [vmem:[%s3187_s12 + $0x40] sm:$0xff] %v1887_v60  ;;  %v1918_v31 = vadd.f32 %v1917_v62, %v1887_v60  ;;  %v1941_v24 = vmul.f32 %v1887_v60, %v1887_v60  ;;  %v1531_v51 = vpop.f32.mrf.mxu2 }
 0x1d7   : > { %v1675_v49 = vpop.f32.mrf.mxu3 }
 0x1d8   : > { %v1956_v20 = vadd.f32 %v1955_v7, %v1941_v24  ;;  %v1705_v57 = vadd.f32 %v1675_v49, %v1558_v22  ;;  %v1368_v25 = vpop.f32.mrf.mxu1  ;;  %v1237_v24 = vadd.f32 %v3123_v0, %v3165_v39 }
 0x1d9   : > { %v1396_v3 = vadd.f32 %v1368_v25, %v1233_v1 }
 0x1da   : > { %v1868_v28 = vadd.f32 %v1838_v11, %v1705_v57  ;;  %v1847_v9 = vpop.f32.mrf.mxu0 }
 0x1db   : > { %v1559_v50 = vadd.f32 %v1531_v51, %v1396_v3 }
 0x1dc   : > { %v1888_v23 = vadd.f32 %v3180_v44, %v1868_v28 }
 0x1de   : > { %1904 = vst [vmem:[%s3187_s12 + $0x48] sm:$0xff] %v1888_v23  ;;  %v1919_v63 = vadd.f32 %v1918_v31, %v1888_v23  ;;  %v1942_v12 = vmul.f32 %v1888_v23, %v1888_v23  ;;  %v1534_v56 = vpop.f32.mrf.mxu2  ;;  %v1238_v23 = vadd.f32 %v3136_v30, %v3172_v18 }
 0x1df   : > { %v1678_v2 = vpop.f32.mrf.mxu3 }
 0x1e0   : > { %v1957_v48 = vadd.f32 %v1956_v20, %v1942_v12  ;;  %v1706_v10 = vadd.f32 %v1678_v2, %v1559_v50  ;;  %v1371_v38 = vpop.f32.mrf.mxu1 }
 0x1e1   : > { %v1397_v61 = vadd.f32 %v1371_v38, %v1234_v35 }
 0x1e2   : > { %v1869_v8 = vadd.f32 %v1841_v5, %v1706_v10  ;;  %v1850_v36 = vpop.f32.mrf.mxu0 }
 0x1e3   : > { %v1560_v13 = vadd.f32 %v1534_v56, %v1397_v61 }
 0x1e4   : > { %v1889_v19 = vadd.f32 %v3180_v44, %v1869_v8 }
 0x1e6   : > { %1905 = vst [vmem:[%s3187_s12 + $0x50] sm:$0xff] %v1889_v19  ;;  %v1920_v27 = vadd.f32 %v1919_v63, %v1889_v19  ;;  %v1943_v33 = vmul.f32 %v1889_v19, %v1889_v19  ;;  %v1537_v29 = vpop.f32.mrf.mxu2 }
 0x1e7   : > { %v1681_v55 = vpop.f32.mrf.mxu3 }
 0x1e8   : > { %v1958_v52 = vadd.f32 %v1957_v48, %v1943_v33  ;;  %v1707_v54 = vadd.f32 %v1681_v55, %v1560_v13  ;;  %v1374_v15 = vpop.f32.mrf.mxu1 }
 0x1e9   : > { %v1398_v34 = vadd.f32 %v1374_v15, %v1235_v59 }
 0x1ea   : > { %v1870_v58 = vadd.f32 %v1844_v43, %v1707_v54  ;;  %v1853_v1 = vpop.f32.mrf.mxu0 }
 0x1eb   : > { %v1561_v47 = vadd.f32 %v1537_v29, %v1398_v34 }
 0x1ec   : > { %v1890_v6 = vadd.f32 %v3180_v44, %v1870_v58 }
 0x1ee   : > { %1906 = vst [vmem:[%s3187_s12 + $0x58] sm:$0xff] %v1890_v6  ;;  %v1921_v53 = vadd.f32 %v1920_v27, %v1890_v6  ;;  %v1944_v42 = vmul.f32 %v1890_v6, %v1890_v6  ;;  %v1540_v16 = vpop.f32.mrf.mxu2 }
 0x1ef   : > { %v1684_v11 = vpop.f32.mrf.mxu3 }
 0x1f0   : > { %v1959_v62 = vadd.f32 %v1958_v52, %v1944_v42  ;;  %v1708_v37 = vadd.f32 %v1684_v11, %v1561_v47  ;;  %v1377_v14 = vpop.f32.mrf.mxu1 }
 0x1f1   : > { %v1399_v32 = vadd.f32 %v1377_v14, %v1236_v45 }
 0x1f2   : > { %v1871_v4 = vadd.f32 %v1847_v9, %v1708_v37  ;;  %v1856_v43 = vpop.f32.mrf.mxu0 }
 0x1f3   : > { %v1562_v41 = vadd.f32 %v1540_v16, %v1399_v32 }
 0x1f4   : > { %v1891_v7 = vadd.f32 %v3180_v44, %v1871_v4 }
 0x1f6   : > { %1907 = vst [vmem:[%s3187_s12 + $0x60] sm:$0xff] %v1891_v7  ;;  %v1922_v26 = vadd.f32 %v1921_v53, %v1891_v7  ;;  %v1945_v21 = vmul.f32 %v1891_v7, %v1891_v7  ;;  %v1543_v22 = vpop.f32.mrf.mxu2 }
 0x1f7   : > { %v1687_v46 = vpop.f32.mrf.mxu3 }
 0x1f8   : > { %v1960_v60 = vadd.f32 %v1959_v62, %v1945_v21  ;;  %v1709_v31 = vadd.f32 %v1687_v46, %v1562_v41  ;;  %v1380_v51 = vpop.f32.mrf.mxu1 }
 0x1f9   : > { %v1400_v17 = vadd.f32 %v1380_v51, %v1237_v24 }
 0x1fa   : > { %v1872_v40 = vadd.f32 %v1850_v36, %v1709_v31 }
 0x1fb   : > { %v1563_v57 = vadd.f32 %v1543_v22, %v1400_v17 }
 0x1fc   : > { %v1892_v5 = vadd.f32 %v3180_v44, %v1872_v40 }
 0x1fe   : > { %1908 = vst [vmem:[%s3187_s12 + $0x68] sm:$0xff] %v1892_v5  ;;  %v1923_v49 = vadd.f32 %v1922_v26, %v1892_v5  ;;  %v1946_v20 = vmul.f32 %v1892_v5, %v1892_v5  ;;  %v1546_v56 = vpop.f32.mrf.mxu2 }
 0x1ff   : > { %v1690_v25 = vpop.f32.mrf.mxu3 }
 0x200   : > { %v1961_v28 = vadd.f32 %v1960_v60, %v1946_v20  ;;  %v1710_v3 = vadd.f32 %v1690_v25, %v1563_v57  ;;  %v1383_v0 = vpop.f32.mrf.mxu1 }
 0x201   : > { %v1401_v63 = vadd.f32 %v1383_v0, %v1238_v23 }
 0x202   : > { %v1873_v39 = vadd.f32 %v1853_v1, %v1710_v3 }
 0x203   : > { %v1564_v48 = vadd.f32 %v1546_v56, %v1401_v63 }
 0x204   : > { %v1893_v12 = vadd.f32 %v3180_v44, %v1873_v39 }
 0x206   : > { %1909 = vst [vmem:[%s3187_s12 + $0x70] sm:$0xff] %v1893_v12  ;;  %v1924_v50 = vadd.f32 %v1923_v49, %v1893_v12  ;;  %v1947_v2 = vmul.f32 %v1893_v12, %v1893_v12 }
 0x207   : > { %v1693_v10 = vpop.f32.mrf.mxu3 }
 0x208   : > { %v1962_v35 = vadd.f32 %v1961_v28, %v1947_v2  ;;  %v1711_v38 = vadd.f32 %v1693_v10, %v1564_v48 }
 0x20a   : > { %v1874_v8 = vadd.f32 %v1856_v43, %v1711_v38 }
 0x20c   : > { %v1894_v61 = vadd.f32 %v3180_v44, %v1874_v8 }
 0x20e   : > { %1910 = vst [vmem:[%s3187_s12 + $0x78] sm:$0xff] %v1894_v61  ;;  %v1925_v30 = vadd.f32 %v1924_v50, %v1894_v61  ;;  %v1948_v18 = vmul.f32 %v1894_v61, %v1894_v61 }
 0x210   : > { %v1926_v19 = vrot.slane %v1925_v30, 4  ;;  %v1963_v27 = vadd.f32 %v1962_v35, %v1948_v18 }
 0x212   : > { %v1927_v33 = vadd.f32 %v1926_v19, %v1925_v30  ;;  %v1964_v13 = vrot.slane %v1963_v27, 4 }
 0x214   : > { %v1928_v29 = vrot.slane %v1927_v33, 2  ;;  %v1965_v55 = vadd.f32 %v1964_v13, %v1963_v27 }
 0x216   : > { %v1929_v52 = vadd.f32 %v1928_v29, %v1927_v33  ;;  %v1966_v54 = vrot.slane %v1965_v55, 2 }
 0x218   : > { %v1930_v59 = vrot.slane %v1929_v52, 1  ;;  %v1967_v15 = vadd.f32 %v1966_v54, %v1965_v55 }
 0x21a   : > { %v1931_v58 = vadd.f32 %v1930_v59, %v1929_v52  ;;  %v1968_v44 = vrot.slane %v1967_v15, 1 }
 0x21c   : > { %1932 = vst [vmem:[%s292_s15] sm:$0x1] %v1931_v58  ;;  %v1969_v34 = vadd.f32 %v1968_v44, %v1967_v15 }
 0x21e   : > { %1970 = vst [vmem:[%s295_s19] sm:$0x1] %v1969_v34 }
 0x21f PF: > { %s18_s24 = sadd.s32 1, %s2262_s24  }
 0x220   : > { %p15_p4 = scmp.ge.s32.totalorder %s18_s24, 6  }
 0x222   :  { %17 = sbr.rel (!%p15_p4) target bundleno = 1 (0x1), region = 102 }

// kernel: double_conv.6
= control target key start
LH: loop header
LB: loop body
LE: loop exit
PB: predicated region body
PF: predicated region fallthrough
CT: control target
= control target key end

     0   :  { %s2028_s24 = smov 0   ;;  %s3288_s0 = inlined_call_operand.vmem [shape: f32[4,192,128], index: 0, kind: input, shape index: {}]   ;;  %s3289_s1 = inlined_call_operand.vmem [shape: f32[9,128,128], index: 1, kind: input, shape index: {}]   ;;  %s3290_s2 = inlined_call_operand.vmem [shape: f32[1,128], index: 2, kind: input, shape index: {}]   ;;  %s3291_s3 = inlined_call_operand.vmem [shape: f32[128,1], index: 3, kind: input, shape index: {}]   ;;  %s3292_s4 = inlined_call_operand.vmem [shape: f32[128,1], index: 4, kind: input, shape index: {}]   ;;  %s3293_s5 = inlined_call_operand.vmem [shape: f32[4,128,128], index: 5, kind: output, shape index: {0}]   ;;  %s3294_s6 = inlined_call_operand.vmem [shape: f32[4,1,128], index: 6, kind: output, shape index: {1}]   ;;  %s3295_s7 = inlined_call_operand.vmem [shape: f32[4,1,128], index: 7, kind: output, shape index: {2}]  }
   0x1 LB: > { %s1778_s25 = sadd.s32 4294967295, %s1985_s24   ;;  %p1782_p0 = scmp.ge.s32.totalorder %s1985_s24, 1  ;;  %s1985_s24 = sphi %s2028_s24, %s18_s24  }
   0x2   : > { %p242_p1 = scmp.lt.s32.totalorder %s1985_s24, 5 }
   0x4   : > { %p243_p2 = pnand %p1782_p0, %p242_p1 }
   0x6   : > { %246 = sbr.rel (%p243_p2) target bundleno = 544 (0x220), region = 40 }
   0xb   : > { %v1801_v0 = vld [vmem:[%s3289_s1 + $0xf8] sm:$0xff]  ;;  %v621_v1 = vld [vmem:[%s3292_s4 + $0x10] sm:$0xff]  ;;  %v620_v2 = vld [vmem:[%s3292_s4 + $0x8] sm:$0xff]  ;;  %v1987_v3 = vmov 0   ;;  %p2083_p3 = scmp.lt.s32.totalorder %s1778_s25, 3 }
   0xc   : > { %473 = vmatpush.msra.mxu0 %v1801_v0  ;;  %1977 = vset.pattern.permute.xlu2 %v1987_v3  ;;  %v619_v4 = vld [vmem:[%s3292_s4] sm:$0xff]  ;;  %v1800_v5 = vld [vmem:[%s3289_s1 + $0xf0] sm:$0xff]  ;;  %v1799_v6 = vld [vmem:[%s3289_s1 + $0xe8] sm:$0xff] }
   0xd   : > { %1976 = vset.pattern.permute.xlu1 %v1987_v3  ;;  %1975 = vset.pattern.permute.xlu0 %v1987_v3  ;;  %v1798_v7 = vld [vmem:[%s3289_s1 + $0xe0] sm:$0xff]  ;;  %v1797_v8 = vld [vmem:[%s3289_s1 + $0xd8] sm:$0xff]  ;;  %v314_v9 = vld [vmem:[%s3291_s3 + $0x10] sm:$0xff]  ;;  %s3342_s25 = smov (!%p2083_p3, %s1778_s25), 3 }
   0xe   : > { %647 = vperm.xlu2 %1977, %v621_v1   ;;  %642 = vperm.xlu1 %1976, %v620_v2   ;;  %v313_v10 = vld [vmem:[%s3291_s3 + $0x8] sm:$0xff]  ;;  %v312_v11 = vld [vmem:[%s3291_s3] sm:$0xff]  ;;  %v1796_v12 = vld [vmem:[%s3289_s1 + $0xd0] sm:$0xff]  ;;  %s1965_s29 = smul.u32 192, %s3342_s25  ;;  %s1916_s17 = sshll.u32 %s3342_s25, 7 }
   0xf   : > { %637 = vperm.xlu0 %1975, %v619_v4   ;;  %474 = vmatpush.msra.mxu0 %v1800_v5  ;;  %v1795_v13 = vld [vmem:[%s3289_s1 + $0xc8] sm:$0xff]  ;;  %v1794_v14 = vld [vmem:[%s3289_s1 + $0xc0] sm:$0xff]  ;;  %v1793_v15 = vld [vmem:[%s3289_s1 + $0xb8] sm:$0xff]  ;;  %s3215_s22 = scalar_lea.vmem %s3293_s5, %s1916_s17  ;;  %s292_s27 = scalar_lea.vmem %s3294_s6, %s3342_s25 }
  0x10   : > { %1918 = vmatpush.msra.mxu2 %v1801_v0  ;;  %1917 = vmatpush.msra.mxu1 %v1801_v0  ;;  %v623_v16 = vld [vmem:[%s3292_s4 + $0x20] sm:$0xff]  ;;  %v315_v17 = vld [vmem:[%s3291_s3 + $0x18] sm:$0xff]  ;;  %v1792_v19 = vld [vmem:[%s3289_s1 + $0xb0] sm:$0xff]  ;;  %s2133_s19 = scalar_lea.vmem %s3288_s0, %s1965_s29  ;;  %s295_s30 = scalar_lea.vmem %s3295_s7, %s3342_s25 }
  0x11   : > { %475 = vmatpush.msra.mxu0 %v1799_v6  ;;  %1919 = vmatpush.msra.mxu3 %v1801_v0  ;;  %v622_v18 = vld [vmem:[%s3292_s4 + $0x18] sm:$0xff]  ;;  %v1791_v20 = vld [vmem:[%s3289_s1 + $0xa8] sm:$0xff]  ;;  %v1790_v21 = vld [vmem:[%s3289_s1 + $0xa0] sm:$0xff] }
  0x12   : > { %1921 = vmatpush.msra.mxu2 %v1800_v5  ;;  %1920 = vmatpush.msra.mxu1 %v1800_v5  ;;  %v1789_v22 = vld [vmem:[%s3289_s1 + $0x98] sm:$0xff]  ;;  %v317_v23 = vld [vmem:[%s3291_s3 + $0x28] sm:$0xff]  ;;  %v316_v25 = vld [vmem:[%s3291_s3 + $0x20] sm:$0xff] }
  0x13   : > { %476 = vmatpush.msra.mxu0 %v1798_v7  ;;  %1922 = vmatpush.msra.mxu3 %v1800_v5  ;;  %v624_v24 = vld [vmem:[%s3292_s4 + $0x28] sm:$0xff]  ;;  %v1788_v26 = vld [vmem:[%s3289_s1 + $0x90] sm:$0xff]  ;;  %v1786_v28 = vld [vmem:[%s3289_s1 + $0x80] sm:$0xff] }
  0x14   : > { %1924 = vmatpush.msra.mxu2 %v1799_v6  ;;  %1923 = vmatpush.msra.mxu1 %v1799_v6  ;;  %v1787_v27 = vld [vmem:[%s3289_s1 + $0x88] sm:$0xff]  ;;  %v440_v29 = vld [vmem:[%s2133_s19 + $0x10] sm:$0xff]  ;;  %v1849_v30 = vld [vmem:[%s3289_s1 + $0x278] sm:$0xff] }
  0x15   : > { %477 = vmatpush.msra.mxu0 %v1797_v8  ;;  %1925 = vmatpush.msra.mxu3 %v1799_v6  ;;  %v626_v31 = vld [vmem:[%s3292_s4 + $0x38] sm:$0xff]  ;;  %v318_v32 = vld [vmem:[%s3291_s3 + $0x30] sm:$0xff]  ;;  %v1847_v35 = vld [vmem:[%s3289_s1 + $0x268] sm:$0xff] }
  0x16   : > { %340 = vperm.xlu2 %1977, %v314_v9   ;;  %335 = vperm.xlu1 %1976, %v313_v10   ;;  %v625_v33 = vld [vmem:[%s3292_s4 + $0x30] sm:$0xff]  ;;  %v1846_v36 = vld [vmem:[%s3289_s1 + $0x260] sm:$0xff]  ;;  %v441_v37 = vld [vmem:[%s2133_s19 + $0x18] sm:$0xff] }
  0x17   : > { %330 = vperm.xlu0 %1975, %v312_v11   ;;  %478 = vmatpush.msra.mxu0 %v1796_v12  ;;  %v1848_v34 = vld [vmem:[%s3289_s1 + $0x270] sm:$0xff]  ;;  %v1845_v38 = vld [vmem:[%s3289_s1 + $0x258] sm:$0xff]  ;;  %v320_v39 = vld [vmem:[%s3291_s3 + $0x40] sm:$0xff] }
  0x18   : > { %1927 = vmatpush.msra.mxu2 %v1798_v7  ;;  %1926 = vmatpush.msra.mxu1 %v1798_v7  ;;  %v627_v40 = vld [vmem:[%s3292_s4 + $0x40] sm:$0xff]  ;;  %v319_v41 = vld [vmem:[%s3291_s3 + $0x38] sm:$0xff]  ;;  %v1844_v42 = vld [vmem:[%s3289_s1 + $0x250] sm:$0xff] }
  0x19   : > { %479 = vmatpush.msra.mxu0 %v1795_v13  ;;  %1928 = vmatpush.msra.mxu3 %v1798_v7  ;;  %v1843_v43 = vld [vmem:[%s3289_s1 + $0x248] sm:$0xff]  ;;  %v1842_v44 = vld [vmem:[%s3289_s1 + $0x240] sm:$0xff]  ;;  %v1841_v46 = vld [vmem:[%s3289_s1 + $0x238] sm:$0xff] }
  0x1a   : > { %1930 = vmatpush.msra.mxu2 %v1797_v8  ;;  %1929 = vmatpush.msra.mxu1 %v1797_v8  ;;  %v442_v45 = vld [vmem:[%s2133_s19 + $0x20] sm:$0xff]  ;;  %v629_v47 = vld [vmem:[%s3292_s4 + $0x50] sm:$0xff]  ;;  %v321_v48 = vld [vmem:[%s3291_s3 + $0x48] sm:$0xff] }
  0x1b   : > { %480 = vmatpush.msra.mxu0 %v1794_v14  ;;  %1931 = vmatpush.msra.mxu3 %v1797_v8  ;;  %v2193_v49 = vld [vmem:[%s2133_s19 + $0x30] sm:$0xff]  ;;  %v628_v50 = vld [vmem:[%s3292_s4 + $0x48] sm:$0xff]  ;;  %v1817_v54 = vld [vmem:[%s3289_s1 + $0x178] sm:$0xff] }
  0x1c   : > { %1933 = vmatpush.msra.mxu2 %v1796_v12  ;;  %1932 = vmatpush.msra.mxu1 %v1796_v12  ;;  %v1840_v51 = vld [vmem:[%s3289_s1 + $0x230] sm:$0xff]  ;;  %v1839_v52 = vld [vmem:[%s3289_s1 + $0x228] sm:$0xff]  ;;  %v1838_v55 = vld [vmem:[%s3289_s1 + $0x220] sm:$0xff] }
  0x1d   : > { %481 = vmatpush.msra.mxu0 %v1793_v15  ;;  %1934 = vmatpush.msra.mxu3 %v1796_v12  ;;  %v2206_v53 = vld [vmem:[%s2133_s19 + $0x50] sm:$0xff]  ;;  %v2216_v56 = vld [vmem:[%s2133_s19 + $0x28] sm:$0xff]  ;;  %v1837_v57 = vld [vmem:[%s3289_s1 + $0x218] sm:$0xff] }
  0x1e   : > { %657 = vperm.xlu2 %1977, %v623_v16   ;;  %345 = vperm.xlu1 %1976, %v315_v17   ;;  %v323_v58 = vld [vmem:[%s3291_s3 + $0x58] sm:$0xff]  ;;  %v322_v61 = vld [vmem:[%s3291_s3 + $0x50] sm:$0xff]  ;;  %v1815_v0 = vld [vmem:[%s3289_s1 + $0x168] sm:$0xff] }
  0x1f   : > { %652 = vperm.xlu0 %1975, %v622_v18   ;;  %482 = vmatpush.msra.mxu0 %v1792_v19  ;;  %v630_v59 = vld [vmem:[%s3292_s4 + $0x58] sm:$0xff]  ;;  %v1836_v62 = vld [vmem:[%s3289_s1 + $0x210] sm:$0xff]  ;;  %v1835_v1 = vld [vmem:[%s3289_s1 + $0x208] sm:$0xff] }
  0x20   : > { %1936 = vmatpush.msra.mxu2 %v1795_v13  ;;  %1935 = vmatpush.msra.mxu1 %v1795_v13  ;;  %v2228_v60 = vld [vmem:[%s2133_s19 + $0x38] sm:$0xff]  ;;  %v1816_v63 = vld [vmem:[%s3289_s1 + $0x170] sm:$0xff]  ;;  %v1834_v2 = vld [vmem:[%s3289_s1 + $0x200] sm:$0xff] }
  0x21   : > { %483 = vmatpush.msra.mxu0 %v1791_v20  ;;  %1937 = vmatpush.msra.mxu3 %v1795_v13  ;;  %v1814_v3 = vld [vmem:[%s3289_s1 + $0x160] sm:$0xff]  ;;  %v2254_v4 = vld [vmem:[%s2133_s19 + $0x58] sm:$0xff]  ;;  %v2257_v5 = vld [vmem:[%s2133_s19 + $0x70] sm:$0xff] }
  0x22   : > { %1939 = vmatpush.msra.mxu2 %v1794_v14  ;;  %1938 = vmatpush.msra.mxu1 %v1794_v14  ;;  %v1833_v6 = vld [vmem:[%s3289_s1 + $0x1f8] sm:$0xff]  ;;  %v632_v9 = vld [vmem:[%s3292_s4 + $0x68] sm:$0xff]  ;;  %v324_v10 = vld [vmem:[%s3291_s3 + $0x60] sm:$0xff] }
  0x23   : > { %484 = vmatpush.msra.mxu0 %v1790_v21  ;;  %1940 = vmatpush.msra.mxu3 %v1794_v14  ;;  %v439_v7 = vld [vmem:[%s3289_s1 + $0x78] sm:$0xff]  ;;  %v631_v11 = vld [vmem:[%s3292_s4 + $0x60] sm:$0xff]  ;;  %v1832_v12 = vld [vmem:[%s3289_s1 + $0x1f0] sm:$0xff] }
  0x24   : > { %1942 = vmatpush.msra.mxu2 %v1793_v15  ;;  %1941 = vmatpush.msra.mxu1 %v1793_v15  ;;  %v1813_v8 = vld [vmem:[%s3289_s1 + $0x158] sm:$0xff]  ;;  %v438_v13 = vld [vmem:[%s3289_s1 + $0x70] sm:$0xff]  ;;  %v437_v16 = vld [vmem:[%s3289_s1 + $0x68] sm:$0xff] }
  0x25   : > { %485 = vmatpush.msra.mxu0 %v1789_v22  ;;  %1943 = vmatpush.msra.mxu3 %v1793_v15  ;;  %v1812_v14 = vld [vmem:[%s3289_s1 + $0x150] sm:$0xff]  ;;  %v1831_v15 = vld [vmem:[%s3289_s1 + $0x1e8] sm:$0xff]  ;;  %v1830_v18 = vld [vmem:[%s3289_s1 + $0x1e0] sm:$0xff] }
  0x26   : > { %355 = vperm.xlu2 %1977, %v317_v23   ;;  %662 = vperm.xlu1 %1976, %v624_v24   ;;  %v1811_v17 = vld [vmem:[%s3289_s1 + $0x148] sm:$0xff]  ;;  %v435_v23 = vld [vmem:[%s3289_s1 + $0x58] sm:$0xff]  ;;  %v326_v24 = vld [vmem:[%s3291_s3 + $0x70] sm:$0xff] }
  0x27   : > { %350 = vperm.xlu0 %1975, %v316_v25   ;;  %486 = vmatpush.msra.mxu0 %v1788_v26  ;;  %v633_v25 = vld [vmem:[%s3292_s4 + $0x70] sm:$0xff] }
  0x28   : > { %1945 = vmatpush.msra.mxu2 %v1792_v19  ;;  %1944 = vmatpush.msra.mxu1 %v1792_v19 }
  0x29   : > { %487 = vmatpush.msra.mxu0 %v1787_v27  ;;  %1946 = vmatpush.msra.mxu3 %v1792_v19  ;;  %v436_v19 = vld [vmem:[%s3289_s1 + $0x60] sm:$0xff] }
  0x2a   : > { %1948 = vmatpush.msra.mxu2 %v1791_v20  ;;  %1947 = vmatpush.msra.mxu1 %v1791_v20 }
  0x2b   : > { %488 = vmatpush.msra.mxu0 %v1786_v28  ;;  %1949 = vmatpush.msra.mxu3 %v1791_v20  ;;  %v1810_v20 = vld [vmem:[%s3289_s1 + $0x140] sm:$0xff] }
  0x2c   : > { %489 = vmatmul.f32.vlgmr.msra.gmra.mxu0 %v440_v29  ;;  %1951 = vmatpush.msra.mxu2 %v1790_v21  ;;  %v434_v29 = vld [vmem:[%s3289_s1 + $0x50] sm:$0xff] }
  0x2d   : > { %992 = vmatpush.msrb.mxu0 %v1849_v30  ;;  %1950 = vmatpush.msra.mxu1 %v1790_v21  ;;  %v1828_v30 = vld [vmem:[%s3289_s1 + $0x1d0] sm:$0xff] }
  0x2e   : > { %672 = vperm.xlu2 %1977, %v626_v31   ;;  %360 = vperm.xlu1 %1976, %v318_v32   ;;  %v1808_v31 = vld [vmem:[%s3289_s1 + $0x130] sm:$0xff]  ;;  %v433_v32 = vld [vmem:[%s3289_s1 + $0x48] sm:$0xff] }
  0x2f   : > { %667 = vperm.xlu0 %1975, %v625_v33   ;;  %993 = vmatpush.msrb.mxu0 %v1848_v34  ;;  %v2346_v33 = vld [vmem:[%s2133_s19 + $0x40] sm:$0xff]  ;;  %v1827_v34 = vld [vmem:[%s3289_s1 + $0x1c8] sm:$0xff] }
  0x30   : > { %1954 = vmatpush.msra.mxu2 %v1789_v22  ;;  %1952 = vmatpush.msra.mxu3 %v1790_v21  ;;  %v2307_v21 = vld [vmem:[%s2133_s19 + $0x60] sm:$0xff] }
  0x31   : > { %994 = vmatpush.msrb.mxu0 %v1847_v35  ;;  %1953 = vmatpush.msra.mxu1 %v1789_v22  ;;  %v1807_v35 = vld [vmem:[%s3289_s1 + $0x128] sm:$0xff] }
  0x32   : > { %1957 = vmatpush.msra.mxu2 %v1788_v26  ;;  %1955 = vmatpush.msra.mxu3 %v1789_v22  ;;  %v2310_v22 = vld [vmem:[%s2133_s19 + $0x78] sm:$0xff] }
  0x33   : > { %995 = vmatpush.msrb.mxu0 %v1846_v36  ;;  %1956 = vmatpush.msra.mxu1 %v1788_v26  ;;  %v1826_v36 = vld [vmem:[%s3289_s1 + $0x1c0] sm:$0xff] }
  0x34   : > { %492 = vmatmul.f32.gmra.mxu0 %v441_v37  ;;  %1960 = vmatpush.msra.mxu2 %v1787_v27  ;;  %v432_v37 = vld [vmem:[%s3289_s1 + $0x40] sm:$0xff] }
  0x35   : > { %996 = vmatpush.msrb.mxu0 %v1845_v38  ;;  %1958 = vmatpush.msra.mxu3 %v1788_v26  ;;  %v325_v26 = vld [vmem:[%s3291_s3 + $0x68] sm:$0xff] }
  0x36   : > { %370 = vperm.xlu2 %1977, %v320_v39   ;;  %677 = vperm.xlu1 %1976, %v627_v40   ;;  %v2362_v38 = vld [vmem:[%s2133_s19 + $0x68] sm:$0xff]  ;;  %v327_v39 = vld [vmem:[%s3291_s3 + $0x78] sm:$0xff]  ;;  %v1806_v40 = vld [vmem:[%s3289_s1 + $0x120] sm:$0xff] }
  0x37   : > { %365 = vperm.xlu0 %1975, %v319_v41   ;;  %997 = vmatpush.msrb.mxu0 %v1844_v42  ;;  %v634_v41 = vld [vmem:[%s3292_s4 + $0x78] sm:$0xff]  ;;  %v2376_v42 = vld [vmem:[%s2133_s19 + $0x80] sm:$0xff] }
  0x38   : > { %1963 = vmatpush.msra.mxu2 %v1786_v28  ;;  %1959 = vmatpush.msra.mxu1 %v1787_v27 }
  0x39   : > { %998 = vmatpush.msrb.mxu0 %v1843_v43  ;;  %1961 = vmatpush.msra.mxu3 %v1787_v27  ;;  %v1829_v27 = vld [vmem:[%s3289_s1 + $0x1d8] sm:$0xff] }
  0x3a   : > { %1962 = vmatpush.msra.mxu1 %v1786_v28  ;;  %513 = vmatmul.f32.vlgmr.msra.gmra.mxu2 %v2206_v53  ;;  %v1825_v43 = vld [vmem:[%s3289_s1 + $0x1b8] sm:$0xff] }
  0x3b   : > { %999 = vmatpush.msrb.mxu0 %v1842_v44  ;;  %1964 = vmatpush.msra.mxu3 %v1786_v28  ;;  %v1809_v28 = vld [vmem:[%s3289_s1 + $0x138] sm:$0xff] }
  0x3c   : > { %495 = vmatmul.f32.gmra.mxu0 %v442_v45  ;;  %501 = vmatmul.f32.vlgmr.msra.gmra.mxu1 %v2193_v49  ;;  %v431_v44 = vld [vmem:[%s3289_s1 + $0x38] sm:$0xff] }
  0x3d   : > { %1000 = vmatpush.msrb.mxu0 %v1841_v46  ;;  %748 = vmatpush.msrb.mxu2 %v1817_v54  ;;  %v1824_v46 = vld [vmem:[%s3289_s1 + $0x1b0] sm:$0xff]  ;;  %v1822_v54 = vld [vmem:[%s3289_s1 + $0x1a0] sm:$0xff] }
  0x3e   : > { %687 = vperm.xlu2 %1977, %v629_v47   ;;  %375 = vperm.xlu1 %1976, %v321_v48   ;;  %v430_v47 = vld [vmem:[%s3289_s1 + $0x30] sm:$0xff]  ;;  %v964_v48 = vld [vmem:[%s2133_s19 + $0x48] sm:$0xff] }
  0x3f   : > { %682 = vperm.xlu0 %1975, %v628_v50   ;;  %1001 = vmatpush.msrb.mxu0 %v1840_v51  ;;  %v1823_v50 = vld [vmem:[%s3289_s1 + $0x1a8] sm:$0xff] }
  0x40   : > { %749 = vmatpush.msrb.mxu2 %v1816_v63  ;;  %525 = vmatmul.f32.vlgmr.msra.gmra.mxu3 %v2257_v5  ;;  %v429_v51 = vld [vmem:[%s3289_s1 + $0x28] sm:$0xff] }
  0x41   : > { %1002 = vmatpush.msrb.mxu0 %v1839_v52  ;;  %878 = vmatpush.msrb.mxu3 %v1833_v6  ;;  %v1803_v52 = vld [vmem:[%s3289_s1 + $0x108] sm:$0xff]  ;;  %v1897_v6 = vld [vmem:[%s3289_s1 + $0x3f8] sm:$0xff] }
  0x42   : > { %750 = vmatpush.msrb.mxu2 %v1815_v0  ;;  %538 = vmatpush.msrb.mxu1 %v439_v7  ;;  %v1819_v63 = vld [vmem:[%s3289_s1 + $0x188] sm:$0xff]  ;;  %v1865_v7 = vld [vmem:[%s3289_s1 + $0x2f8] sm:$0xff] }
  0x43   : > { %1003 = vmatpush.msrb.mxu0 %v1838_v55  ;;  %516 = vmatmul.f32.gmra.mxu2 %v2254_v4  ;;  %v428_v55 = vld [vmem:[%s3289_s1 + $0x20] sm:$0xff]  ;;  %v425_v0 = vld [vmem:[%s3289_s1 + $0x8] sm:$0xff] }
  0x44   : > { %498 = vmatmul.f32.gmra.mxu0 %v2216_v56  ;;  %504 = vmatmul.f32.gmra.mxu1 %v2228_v60 }
  0x45   : > { %1004 = vmatpush.msrb.mxu0 %v1837_v57  ;;  %751 = vmatpush.msrb.mxu2 %v1814_v3  ;;  %v2418_v57 = vld [vmem:[%s2133_s19 + $0x88] sm:$0xff]  ;;  %v424_v3 = vld [vmem:[%s3289_s1] sm:$0xff] }
  0x46   : > { %385 = vperm.xlu2 %1977, %v323_v58   ;;  %692 = vperm.xlu1 %1976, %v630_v59   ;;  %v1821_v58 = vld [vmem:[%s3289_s1 + $0x198] sm:$0xff] }
  0x47   : > { %380 = vperm.xlu0 %1975, %v322_v61   ;;  %1005 = vmatpush.msrb.mxu0 %v1836_v62  ;;  %v427_v59 = vld [vmem:[%s3289_s1 + $0x18] sm:$0xff]  ;;  %v1820_v61 = vld [vmem:[%s3289_s1 + $0x190] sm:$0xff] }
  0x48   : > { %752 = vmatpush.msrb.mxu2 %v1813_v8  ;;  %879 = vmatpush.msrb.mxu3 %v1832_v12  ;;  %v426_v62 = vld [vmem:[%s3289_s1 + $0x10] sm:$0xff] }
  0x49   : > { %1006 = vmatpush.msrb.mxu0 %v1835_v1  ;;  %539 = vmatpush.msrb.mxu1 %v438_v13  ;;  %v1881_v1 = vld [vmem:[%s3289_s1 + $0x378] sm:$0xff] }
  0x4a   : > { %753 = vmatpush.msrb.mxu2 %v1812_v14  ;;  %880 = vmatpush.msrb.mxu3 %v1831_v15  ;;  %v1896_v14 = vld [vmem:[%s3289_s1 + $0x3f0] sm:$0xff]  ;;  %v1913_v15 = vld [vmem:[%s3289_s1 + $0x478] sm:$0xff] }
  0x4b   : > { %1007 = vmatpush.msrb.mxu0 %v1834_v2  ;;  %540 = vmatpush.msrb.mxu1 %v437_v16  ;;  %v1818_v2 = vld [vmem:[%s3289_s1 + $0x180] sm:$0xff]  ;;  %v1864_v16 = vld [vmem:[%s3289_s1 + $0x2f0] sm:$0xff] }
  0x4c   : > { %1008 = vmatmul.f32.vlgmr.msrb.gmra.mxu0 %v442_v45  ;;  %754 = vmatpush.msrb.mxu2 %v1811_v17  ;;  %v1805_v45 = vld [vmem:[%s3289_s1 + $0x118] sm:$0xff]  ;;  %v2486_v17 = vld [vmem:[%s2133_s19 + $0x41] sm:$0xff] }
  0x4d   : > { %881 = vmatpush.msrb.mxu3 %v1830_v18  ;;  %541 = vmatpush.msrb.mxu1 %v436_v19 }
  0x4e   : > { %702 = vperm.xlu2 %1977, %v632_v9   ;;  %390 = vperm.xlu1 %1976, %v324_v10   ;;  %v1880_v9 = vld [vmem:[%s3289_s1 + $0x370] sm:$0xff] }
  0x4f   : > { %697 = vperm.xlu0 %1975, %v631_v11   ;;  %519 = vmatmul.f32.gmra.mxu2 %v2307_v21  ;;  %v2463_v10 = vld [vmem:[%s2133_s19 + $0x31] sm:$0xff]  ;;  %v2466_v11 = vld [vmem:[%s2133_s19 + $0x3f] sm:$0xff] }
  0x50   : > { %755 = vmatpush.msrb.mxu2 %v1810_v20  ;;  %528 = vmatmul.f32.gmra.mxu3 %v2310_v22  ;;  %v1879_v20 = vld [vmem:[%s3289_s1 + $0x368] sm:$0xff] }
  0x51   : > { %542 = vmatpush.msrb.mxu1 %v435_v23  ;;  %882 = vmatpush.msrb.mxu3 %v1829_v27  ;;  %v1895_v23 = vld [vmem:[%s3289_s1 + $0x3e8] sm:$0xff]  ;;  %v603_v27 = vld [vmem:[%s2133_s19 + $0x11] sm:$0xff] }
  0x52   : > { %756 = vmatpush.msrb.mxu2 %v1809_v28  ;;  %507 = vmatmul.f32.gmra.mxu1 %v2346_v33  ;;  %v1073_v28 = vld [vmem:[%s2133_s19 + $0x21] sm:$0xff] }
  0x53   : > { %543 = vmatpush.msrb.mxu1 %v434_v29  ;;  %883 = vmatpush.msrb.mxu3 %v1828_v30  ;;  %v2517_v30 = vld [vmem:[%s2133_s19 + $0x29] sm:$0xff] }
  0x54   : > { %1011 = vmatmul.f32.gmra.mxu0 %v2216_v56  ;;  %757 = vmatpush.msrb.mxu2 %v1808_v31  ;;  %v1802_v56 = vld [vmem:[%s3289_s1 + $0x100] sm:$0xff] }
  0x55   : > { %544 = vmatpush.msrb.mxu1 %v433_v32  ;;  %884 = vmatpush.msrb.mxu3 %v1827_v34 }
  0x56   : > { %400 = vperm.xlu2 %1977, %v326_v24   ;;  %707 = vperm.xlu1 %1976, %v633_v25   ;;  %v1912_v24 = vld [vmem:[%s3289_s1 + $0x470] sm:$0xff]  ;;  %v1863_v25 = vld [vmem:[%s3289_s1 + $0x2e8] sm:$0xff] }
  0x57   : > { %395 = vperm.xlu0 %1975, %v325_v26   ;;  %522 = vmatmul.f32.gmra.mxu2 %v2362_v38  ;;  %v2508_v26 = vld [vmem:[%s2133_s19 + $0x57] sm:$0xff] }
  0x58   : > { %758 = vmatpush.msrb.mxu2 %v1807_v35  ;;  %885 = vmatpush.msrb.mxu3 %v1826_v36  ;;  %v1878_v35 = vld [vmem:[%s3289_s1 + $0x360] sm:$0xff] }
  0x59   : > { %545 = vmatpush.msrb.mxu1 %v432_v37  ;;  %531 = vmatmul.f32.gmra.mxu3 %v2376_v42  ;;  %v604_v37 = vld [vmem:[%s2133_s19 + $0x19] sm:$0xff] }
  0x5a   : > { %759 = vmatpush.msrb.mxu2 %v1806_v40  ;;  %886 = vmatpush.msrb.mxu3 %v1825_v43  ;;  %v1911_v40 = vld [vmem:[%s3289_s1 + $0x468] sm:$0xff]  ;;  %v2548_v43 = vld [vmem:[%s2133_s19 + $0x59] sm:$0xff] }
  0x5b   : > { %546 = vmatpush.msrb.mxu1 %v431_v44  ;;  %1496 = vmatpush.msra.mxu0 %v1913_v15  ;;  %v296_v44 = vld [vmem:[%s2133_s19 + $0xf] sm:$0xff]  ;;  %v2604_v15 = vld [vmem:[%s2133_s19 + $0x39] sm:$0xff] }
  0x5c   : > { %1014 = vmatmul.f32.gmra.mxu0 %v2193_v49  ;;  %v1804_v49 = vld [vmem:[%s3289_s1 + $0x110] sm:$0xff]  ;;  %760 = vmatpush.msrb.mxu2 %v1805_v45  ;;  %v829_v45 = vld [vmem:[%s2133_s19 + $0x1f] sm:$0xff] }
  0x5d   : > { %510 = vmatmul.f32.gmra.mxu1 %v964_v48  ;;  %887 = vmatpush.msrb.mxu3 %v1824_v46 }
  0x5e   : > { %405 = vperm.xlu1 %1976, %v327_v39   ;;  %547 = vmatpush.msrb.mxu1 %v430_v47  ;;  %v1894_v39 = vld [vmem:[%s3289_s1 + $0x3e0] sm:$0xff] }
  0x5f   : > { %712 = vperm.xlu0 %1975, %v634_v41   ;;  %761 = vmatpush.msrb.mxu2 %v1804_v49  ;;  %v1862_v41 = vld [vmem:[%s3289_s1 + $0x2e0] sm:$0xff]  ;;  %v2559_v49 = vld [vmem:[%s2133_s19 + $0x37] sm:$0xff] }
  0x60   : > { %888 = vmatpush.msrb.mxu3 %v1823_v50  ;;  %548 = vmatpush.msrb.mxu1 %v429_v51 }
  0x61   : > { %762 = vmatpush.msrb.mxu2 %v1803_v52  ;;  %534 = vmatmul.f32.gmra.mxu3 %v2418_v57 }
  0x62   : > { %889 = vmatpush.msrb.mxu3 %v1822_v54  ;;  %549 = vmatpush.msrb.mxu1 %v428_v55 }
  0x63   : > { %763 = vmatpush.msrb.mxu2 %v1802_v56  ;;  %1497 = vmatpush.msra.mxu0 %v1912_v24  ;;  %v1877_v56 = vld [vmem:[%s3289_s1 + $0x358] sm:$0xff] }
  0x64   : > { %1017 = vmatmul.f32.gmra.mxu0 %v2228_v60  ;;  %890 = vmatpush.msrb.mxu3 %v1821_v58 }
  0x65   : > { %550 = vmatpush.msrb.mxu1 %v427_v59  ;;  %1252 = vmatpush.msra.mxu2 %v1881_v1  ;;  %v1893_v59 = vld [vmem:[%s3289_s1 + $0x3d8] sm:$0xff] }
  0x66   : > { %891 = vmatpush.msrb.mxu3 %v1820_v61  ;;  %1498 = vmatpush.msra.mxu0 %v1911_v40  ;;  %v1910_v61 = vld [vmem:[%s3289_s1 + $0x460] sm:$0xff] }
  0x67   : > { %551 = vmatpush.msrb.mxu1 %v426_v62  ;;  %1253 = vmatpush.msra.mxu2 %v1880_v9  ;;  %v1861_v62 = vld [vmem:[%s3289_s1 + $0x2d8] sm:$0xff] }
  0x68   : > { %v2426_v60 = vpop.permute.xlu2 %647  ;;  %892 = vmatpush.msrb.mxu3 %v1819_v63  ;;  %v2585_v63 = vld [vmem:[%s2133_s19 + $0x6f] sm:$0xff]  ;;  %1499 = vmatpush.msra.mxu0 %v1910_v61  ;;  %v2679_v61 = vld [vmem:[%s2133_s19 + $0x87] sm:$0xff] }
  0x69   : > { %552 = vmatpush.msrb.mxu1 %v425_v0  ;;  %v2474_v13 = vmul.f32 %v2463_v10, %v2426_v60  ;;  %1254 = vmatpush.msra.mxu2 %v1879_v20  ;;  %v297_v0 = vld [vmem:[%s2133_s19 + $0x17] sm:$0xff] }
  0x6a   : > { %893 = vmatpush.msrb.mxu3 %v1818_v2 }
  0x6b   : > { %553 = vmatpush.msrb.mxu1 %v424_v3  ;;  %1255 = vmatpush.msra.mxu2 %v1878_v35  ;;  %v717_v3 = vmul.f32 %v1073_v28, %v2426_v60 }
  0x6c   : > { %1020 = vmatmul.f32.gmra.mxu0 %v2346_v33  ;;  %1366 = vmatpush.msra.mxu3 %v1897_v6  ;;  %v830_v6 = vld [vmem:[%s2133_s19 + $0x27] sm:$0xff] }
  0x6d   : > { %1122 = vmatpush.msra.mxu1 %v1865_v7  ;;  %1256 = vmatpush.msra.mxu2 %v1877_v56  ;;  %v1907_v56 = vld [vmem:[%s3289_s1 + $0x448] sm:$0xff] }
  0x6e   : > { %1367 = vmatpush.msra.mxu3 %v1896_v14 }
  0x6f   : > { %1123 = vmatpush.msra.mxu1 %v1864_v16  ;;  %v1876_v16 = vld [vmem:[%s3289_s1 + $0x350] sm:$0xff] }
  0x70   : > { %v2457_v8 = vpop.permute.xlu2 %340  ;;  %1368 = vmatpush.msra.mxu3 %v1895_v23  ;;  %1257 = vmatpush.msra.mxu2 %v1876_v16  ;;  %v2695_v16 = vld [vmem:[%s2133_s19 + $0x51] sm:$0xff] }
  0x71   : > { %v2470_v12 = vmul.f32 %v2466_v11, %v2457_v8  ;;  %1124 = vmatpush.msra.mxu1 %v1863_v25  ;;  %v1892_v25 = vld [vmem:[%s3289_s1 + $0x3d0] sm:$0xff] }
  0x72   : > { %1369 = vmatpush.msra.mxu3 %v1894_v39  ;;  %v2638_v39 = vld [vmem:[%s2133_s19 + $0x49] sm:$0xff] }
  0x73   : > { %1125 = vmatpush.msra.mxu1 %v1862_v41 }
  0x74   : > { %1023 = vmatmul.f32.gmra.mxu0 %v964_v48  ;;  %1370 = vmatpush.msra.mxu3 %v1893_v59 }
  0x75   : > { %1126 = vmatpush.msra.mxu1 %v1861_v62  ;;  %v1905_v62 = vld [vmem:[%s3289_s1 + $0x438] sm:$0xff] }
  0x76   : > { %1371 = vmatpush.msra.mxu3 %v1892_v25 }
  0x78   : > { %v2488_v18 = vpop.permute.xlu2 %657 }
  0x79   : > { %v2492_v19 = vmul.f32 %v2486_v17, %v2488_v18 }
  0x7c   : > { %1026 = vmatmul.f32.gmra.mxu0 %v2206_v53 }
  0x80   : > { %v2512_v53 = vpop.permute.xlu1 %642  ;;  %v2514_v29 = vpop.permute.xlu2 %355 }
  0x81   : > { %v2519_v31 = vpop.permute.xlu0 %637  ;;  %v2523_v32 = vmul.f32 %v2508_v26, %v2514_v29  ;;  %v2534_v36 = vmul.f32 %v2512_v53, %v2517_v30  ;;  %v716_v48 = vmul.f32 %v2512_v53, %v604_v37 }
  0x82   : > { %v715_v33 = vmul.f32 %v2519_v31, %v603_v27  ;;  %v2527_v34 = vmul.f32 %v1073_v28, %v2519_v31  ;;  %v1909_v27 = vld [vmem:[%s3289_s1 + $0x458] sm:$0xff]  ;;  %v1860_v28 = vld [vmem:[%s3289_s1 + $0x2d0] sm:$0xff] }
  0x83   : > { %3299 = vst [vmem:[#allocation2_spill] sm:$0xff] %v2523_v32  ;;  %1500 = vmatpush.msra.mxu0 %v1909_v27  ;;  %1127 = vmatpush.msra.mxu1 %v1860_v28 }
  0x84   : > { %764 = vmatmul.f32.vlgmr.msrb.gmra.mxu2 %v715_v33  ;;  %1029 = vmatmul.f32.gmra.mxu0 %v2254_v4  ;;  %v2553_v4 = vld [vmem:[%s2133_s19 + $0x2f] sm:$0xff] }
  0x85   : > { %v2628_v33 = vld [vmem:[%s2133_s19 + $0x71] sm:$0xff]  ;;  %v847_v59 = vmul.f32 %v2553_v4, %v2457_v8 }
  0x88   : > { %v2555_v46 = vpop.permute.xlu2 %672  ;;  %v336_v47 = vpop.permute.xlu1 %335 }
  0x89   : > { %v2563_v50 = vmul.f32 %v2548_v43, %v2555_v46  ;;  %v331_v51 = vpop.permute.xlu0 %330  ;;  %v2572_v58 = vmul.f32 %v2559_v49, %v336_v47  ;;  %v409_v14 = vmul.f32 %v336_v47, %v297_v0  ;;  %v846_v23 = vmul.f32 %v830_v6, %v336_v47  ;;  %v2651_v47 = vld [vmem:[%s2133_s19 + $0x4f] sm:$0xff] }
  0x8a   : > { %v408_v52 = vmul.f32 %v331_v51, %v296_v44  ;;  %v845_v54 = vmul.f32 %v829_v45, %v331_v51  ;;  %v2566_v55 = vmul.f32 %v2553_v4, %v331_v51  ;;  %v410_v51 = vmul.f32 %v829_v45, %v2457_v8  ;;  %v1891_v45 = vld [vmem:[%s3289_s1 + $0x3c8] sm:$0xff] }
  0x8b   : > { %3300 = vst [vmem:[#allocation3_spill] sm:$0xff] %v2563_v50  ;;  %v1859_v8 = vld [vmem:[%s3289_s1 + $0x2c8] sm:$0xff]  ;;  %1372 = vmatpush.msra.mxu3 %v1891_v45 }
  0x8c   : > { %554 = vmatmul.f32.vlgmr.msrb.gmra.mxu1 %v408_v52  ;;  %767 = vmatmul.f32.gmra.mxu2 %v716_v48  ;;  %v2739_v45 = vld [vmem:[%s2133_s19 + $0x61] sm:$0xff] }
  0x8d   : > { %894 = vmatmul.f32.vlgmr.msrb.gmra.mxu3 %v845_v54  ;;  %1032 = vmatmul.f32.gmra.mxu0 %v2307_v21  ;;  %v2589_v21 = vld [vmem:[%s2133_s19 + $0x47] sm:$0xff] }
  0x8e   : > { %v1875_v54 = vld [vmem:[%s3289_s1 + $0x348] sm:$0xff]  ;;  %1128 = vmatpush.msra.mxu1 %v1859_v8 }
  0x8f   : > { %1258 = vmatpush.msra.mxu2 %v1875_v54 }
  0x90   : > { %v2591_v1 = vpop.permute.xlu2 %370  ;;  %v2593_v2 = vpop.permute.xlu1 %345 }
  0x91   : > { %v2599_v7 = vmul.f32 %v2585_v63, %v2591_v1  ;;  %v2601_v9 = vpop.permute.xlu0 %652  ;;  %v2611_v20 = vmul.f32 %v2589_v21, %v2593_v2  ;;  %v848_v54 = vmul.f32 %v2559_v49, %v2593_v2 }
  0x92   : > { %v2615_v24 = vmul.f32 %v2601_v9, %v2604_v15  ;;  %v718_v52 = vmul.f32 %v2601_v9, %v2517_v30  ;;  %v1906_v30 = vld [vmem:[%s3289_s1 + $0x440] sm:$0xff] }
  0x93   : > { %3301 = vst [vmem:[#allocation4_spill] sm:$0xff] %v2599_v7 }
  0x94   : > { %557 = vmatmul.f32.gmra.mxu1 %v409_v14  ;;  %770 = vmatmul.f32.gmra.mxu2 %v717_v3  ;;  %v2692_v14 = vld [vmem:[%s2133_s19 + $0x5f] sm:$0xff] }
  0x95   : > { %897 = vmatmul.f32.gmra.mxu3 %v846_v23  ;;  %1035 = vmatmul.f32.gmra.mxu0 %v2362_v38  ;;  %v1908_v38 = vld [vmem:[%s3289_s1 + $0x450] sm:$0xff]  ;;  %v853_v32 = vmul.f32 %v2692_v14, %v2591_v1 }
  0x96   : > { %1501 = vmatpush.msra.mxu0 %v1908_v38  ;;  %v411_v38 = vmul.f32 %v830_v6, %v2593_v2  ;;  %v1890_v6 = vld [vmem:[%s3289_s1 + $0x3c0] sm:$0xff] }
  0x97   : > { %v1858_v2 = vld [vmem:[%s3289_s1 + $0x2c0] sm:$0xff]  ;;  %1373 = vmatpush.msra.mxu3 %v1890_v6 }
  0x98   : > { %v2633_v35 = vpop.permute.xlu2 %687  ;;  %v2635_v37 = vpop.permute.xlu1 %662  ;;  %1502 = vmatpush.msra.mxu0 %v1907_v56  ;;  %v1903_v56 = vld [vmem:[%s3289_s1 + $0x428] sm:$0xff]  ;;  %1129 = vmatpush.msra.mxu1 %v1858_v2 }
  0x99   : > { %v2642_v40 = vmul.f32 %v2628_v33, %v2633_v35  ;;  %v2646_v41 = vmul.f32 %v2638_v39, %v2635_v37  ;;  %v2648_v44 = vpop.permute.xlu0 %350  ;;  %v720_v6 = vmul.f32 %v2635_v37, %v2604_v15 }
  0x9a   : > { %v2655_v48 = vmul.f32 %v2651_v47, %v2648_v44  ;;  %1503 = vmatpush.msra.mxu0 %v1906_v30  ;;  %v2733_v30 = vld [vmem:[%s2133_s19 + $0x89] sm:$0xff]  ;;  %v849_v2 = vmul.f32 %v2466_v11, %v2648_v44 }
  0x9b   : > { %3302 = vst [vmem:[#allocation5_spill] sm:$0xff] %v2642_v40 }
  0x9c   : > { %3303 = vst [vmem:[#allocation6_spill] sm:$0xff] %v2646_v41  ;;  %560 = vmatmul.f32.gmra.mxu1 %v410_v51  ;;  %773 = vmatmul.f32.gmra.mxu2 %v718_v52  ;;  %v719_v51 = vmul.f32 %v2463_v10, %v2488_v18  ;;  %v1874_v52 = vld [vmem:[%s3289_s1 + $0x340] sm:$0xff] }
  0x9d   : > { %900 = vmatmul.f32.gmra.mxu3 %v847_v59  ;;  %1038 = vmatmul.f32.gmra.mxu0 %v2257_v5  ;;  %v1904_v5 = vld [vmem:[%s3289_s1 + $0x430] sm:$0xff]  ;;  %v1902_v59 = vld [vmem:[%s3289_s1 + $0x420] sm:$0xff] }
  0x9e   : > { %1504 = vmatpush.msra.mxu0 %v1905_v62  ;;  %1259 = vmatpush.msra.mxu2 %v1874_v52  ;;  %v2756_v52 = vld [vmem:[%s2133_s19 + $0x67] sm:$0xff] }
  0xa0   : > { %v2687_v0 = vpop.permute.xlu2 %385  ;;  %v2689_v3 = vpop.permute.xlu1 %360  ;;  %1505 = vmatpush.msra.mxu0 %v1904_v5 }
  0xa1   : > { %v2699_v23 = vmul.f32 %v2679_v61, %v2687_v0  ;;  %v2703_v25 = vmul.f32 %v2692_v14, %v2689_v3  ;;  %v2705_v27 = vpop.permute.xlu0 %667  ;;  %v851_v7 = vmul.f32 %v2651_v47, %v2689_v3 }
  0xa2   : > { %v2709_v28 = vmul.f32 %v2695_v16, %v2705_v27  ;;  %1506 = vmatpush.msra.mxu0 %v1903_v56  ;;  %v412_v56 = vmul.f32 %v2553_v4, %v2648_v44  ;;  %v1899_v4 = vld [vmem:[%s3289_s1 + $0x408] sm:$0xff]  ;;  %v1889_v44 = vld [vmem:[%s3289_s1 + $0x3b8] sm:$0xff] }
  0xa3   : > { %3304 = vst [vmem:[#allocation7_spill] sm:$0xff] %v2699_v23  ;;  %1374 = vmatpush.msra.mxu3 %v1889_v44  ;;  %v413_v44 = vmul.f32 %v2559_v49, %v2514_v29  ;;  %v1888_v49 = vld [vmem:[%s3289_s1 + $0x3b0] sm:$0xff] }
  0xa4   : > { %3305 = vst [vmem:[#allocation8_spill] sm:$0xff] %v2703_v25  ;;  %563 = vmatmul.f32.gmra.mxu1 %v411_v38  ;;  %776 = vmatmul.f32.gmra.mxu2 %v719_v51  ;;  %v2902_v25 = vld [vmem:[%s2133_s19 + $0x97] sm:$0xff] }
  0xa5   : > { %3306 = vst [vmem:[#allocation9_spill] sm:$0xff] %v2709_v28  ;;  %903 = vmatmul.f32.gmra.mxu3 %v848_v54  ;;  %1041 = vmatmul.f32.gmra.mxu0 %v2310_v22  ;;  %v1901_v22 = vld [vmem:[%s3289_s1 + $0x418] sm:$0xff] }
  0xa6   : > { %1507 = vmatpush.msra.mxu0 %v1902_v59  ;;  %v1873_v59 = vld [vmem:[%s3289_s1 + $0x338] sm:$0xff]  ;;  %1375 = vmatpush.msra.mxu3 %v1888_v49 }
  0xa7   : > { %1260 = vmatpush.msra.mxu2 %v1873_v59  ;;  %v2795_v59 = vld [vmem:[%s2133_s19 + $0x69] sm:$0xff]  ;;  %v2890_v28 = vld [vmem:[%s2133_s19 + $0x98] sm:$0xff] }
  0xa8   : > { %v2741_v8 = vpop.permute.xlu2 %702  ;;  %v2743_v62 = vpop.permute.xlu1 %677  ;;  %1508 = vmatpush.msra.mxu0 %v1901_v22  ;;  %v1857_v22 = vld [vmem:[%s3289_s1 + $0x2b8] sm:$0xff]  ;;  %3317 = vst [vmem:[#allocation20_spill] sm:$0xff] %v2890_v28 }
  0xa9   : > { %v2747_v5 = vmul.f32 %v2733_v30, %v2741_v8  ;;  %v2751_v38 = vmul.f32 %v2739_v45, %v2743_v62  ;;  %v2753_v51 = vpop.permute.xlu0 %365  ;;  %v2774_v23 = vpop.f32.mrf.mxu0  ;;  %1130 = vmatpush.msra.mxu1 %v1857_v22  ;;  %v721_v22 = vmul.f32 %v2486_v17, %v2705_v27 }
  0xaa   : > { %v2760_v54 = vmul.f32 %v2756_v52, %v2753_v51 }
  0xab   : > { %3307 = vst [vmem:[#allocation10_spill] sm:$0xff] %v2747_v5  ;;  %v1900_v5 = vld [vmem:[%s3289_s1 + $0x410] sm:$0xff] }
  0xac   : > { %3308 = vst [vmem:[#allocation11_spill] sm:$0xff] %v2751_v38  ;;  %566 = vmatmul.f32.gmra.mxu1 %v412_v56  ;;  %779 = vmatmul.f32.gmra.mxu2 %v720_v6  ;;  %v1898_v56 = vld [vmem:[%s3289_s1 + $0x400] sm:$0xff]  ;;  %v2792_v6 = vld [vmem:[%s2133_s19 + $0x77] sm:$0xff] }
  0xad   : > { %3309 = vst [vmem:[#allocation12_spill] sm:$0xff] %v2760_v54  ;;  %906 = vmatmul.f32.gmra.mxu3 %v849_v2  ;;  %1044 = vmatmul.f32.gmra.mxu0 %v2376_v42  ;;  %v2851_v38 = vld [vmem:[%s2133_s19 + $0x90] sm:$0xff]  ;;  %v723_v54 = vmul.f32 %v2695_v16, %v2743_v62 }
  0xae   : > { %1509 = vmatpush.msra.mxu0 %v1900_v5  ;;  %3314 = vst [vmem:[#allocation17_spill] sm:$0xff] %v2851_v38 }
  0xb0   : > { %v2789_v42 = vpop.permute.xlu1 %375  ;;  %1510 = vmatpush.msra.mxu0 %v1899_v4  ;;  %v1872_v4 = vld [vmem:[%s3289_s1 + $0x330] sm:$0xff] }
  0xb1   : > { %v2799_v2 = vmul.f32 %v2792_v6, %v2789_v42  ;;  %v2801_v40 = vpop.permute.xlu0 %682  ;;  %1261 = vmatpush.msra.mxu2 %v1872_v4  ;;  %v1871_v4 = vld [vmem:[%s3289_s1 + $0x328] sm:$0xff] }
  0xb2   : > { %v2805_v5 = vmul.f32 %v2795_v59, %v2801_v40  ;;  %1511 = vmatpush.msra.mxu0 %v1898_v56  ;;  %v1856_v56 = vld [vmem:[%s3289_s1 + $0x2b0] sm:$0xff]  ;;  %v724_v41 = vmul.f32 %v2548_v43, %v2801_v40 }
  0xb3   : > { %3310 = vst [vmem:[#allocation13_spill] sm:$0xff] %v2799_v2  ;;  %v850_v2 = vmul.f32 %v2589_v21, %v2514_v29  ;;  %1131 = vmatpush.msra.mxu1 %v1856_v56  ;;  %v2826_v29 = vld [vmem:[%s2133_s19 + $0x79] sm:$0xff]  ;;  %v414_v56 = vmul.f32 %v2466_v11, %v2689_v3  ;;  %1262 = vmatpush.msra.mxu2 %v1871_v4  ;;  %v1887_v11 = vld [vmem:[%s3289_s1 + $0x3a8] sm:$0xff] }
  0xb4   : > { %3311 = vst [vmem:[#allocation14_spill] sm:$0xff] %v2805_v5  ;;  %569 = vmatmul.f32.gmra.mxu1 %v413_v44  ;;  %782 = vmatmul.f32.gmra.mxu2 %v721_v22  ;;  %v2823_v5 = vpop.f32.mrf.mxu0  ;;  %v2837_v22 = vld [vmem:[%s2133_s19 + $0x7f] sm:$0xff]  ;;  %v2867_v3 = vld [vmem:[%s2133_s19 + $0x8f] sm:$0xff] }
  0xb5   : > { %909 = vmatmul.f32.gmra.mxu3 %v850_v2  ;;  %1047 = vmatmul.f32.gmra.mxu0 %v2418_v57 }
  0xb6   : > { %1376 = vmatpush.msra.mxu3 %v1887_v11  ;;  %v1870_v11 = vld [vmem:[%s3289_s1 + $0x320] sm:$0xff] }
  0xb7   : > { %1263 = vmatpush.msra.mxu2 %v1870_v11  ;;  %v2905_v11 = vld [vmem:[%s2133_s19 + $0x91] sm:$0xff] }
  0xb8   : > { %v2828_v44 = vpop.permute.xlu1 %692 }
  0xb9   : > { %v2832_v2 = vmul.f32 %v2826_v29, %v2828_v44  ;;  %v2834_v57 = vpop.permute.xlu0 %380 }
  0xba   : > { %v2844_v49 = vmul.f32 %v2837_v22, %v2834_v57 }
  0xbb   : > { %3312 = vst [vmem:[#allocation15_spill] sm:$0xff] %v2832_v2  ;;  %v722_v2 = vmul.f32 %v2638_v39, %v2555_v46 }
  0xbc   : > { %3313 = vst [vmem:[#allocation16_spill] sm:$0xff] %v2844_v49  ;;  %572 = vmatmul.f32.gmra.mxu1 %v414_v56  ;;  %v1855_v49 = vld [vmem:[%s3289_s1 + $0x2a8] sm:$0xff]  ;;  %v2862_v4 = vpop.f32.mrf.mxu0 }
  0xbd   : > { %785 = vmatmul.f32.gmra.mxu2 %v722_v2  ;;  %912 = vmatmul.f32.gmra.mxu3 %v851_v7  ;;  %v2870_v7 = vld [vmem:[%s2133_s19 + $0x81] sm:$0xff] }
  0xbe   : > { %1050 = vmatmul.f32.gmra.mxu0 %v2851_v38  ;;  %1132 = vmatpush.msra.mxu1 %v1855_v49  ;;  %v415_v38 = vmul.f32 %v2589_v21, %v2753_v51  ;;  %v1854_v21 = vld [vmem:[%s3289_s1 + $0x2a0] sm:$0xff] }
  0xc0   : > { %v2864_v50 = vpop.permute.xlu1 %390  ;;  %1133 = vmatpush.msra.mxu1 %v1854_v21  ;;  %v416_v21 = vmul.f32 %v2651_v47, %v2591_v1  ;;  %v1853_v47 = vld [vmem:[%s3289_s1 + $0x298] sm:$0xff]  ;;  %v417_v1 = vmul.f32 %v2508_v26, %v2789_v42 }
  0xc1   : > { %v2874_v2 = vmul.f32 %v2867_v3, %v2864_v50  ;;  %v2876_v56 = vpop.permute.xlu0 %697 }
  0xc2   : > { %v2883_v49 = vmul.f32 %v2870_v7, %v2876_v56  ;;  %1134 = vmatpush.msra.mxu1 %v1853_v47  ;;  %v1852_v47 = vld [vmem:[%s3289_s1 + $0x290] sm:$0xff] }
  0xc3   : > { %3315 = vst [vmem:[#allocation18_spill] sm:$0xff] %v2874_v2  ;;  %v852_v2 = vmul.f32 %v2508_v26, %v2753_v51  ;;  %v1884_v26 = vld [vmem:[%s3289_s1 + $0x390] sm:$0xff] }
  0xc4   : > { %3316 = vst [vmem:[#allocation19_spill] sm:$0xff] %v2883_v49  ;;  %575 = vmatmul.f32.gmra.mxu1 %v415_v38  ;;  %v1886_v49 = vld [vmem:[%s3289_s1 + $0x3a0] sm:$0xff] }
  0xc5   : > { %788 = vmatmul.f32.gmra.mxu2 %v723_v54  ;;  %915 = vmatmul.f32.gmra.mxu3 %v852_v2  ;;  %v1869_v2 = vld [vmem:[%s3289_s1 + $0x318] sm:$0xff] }
  0xc6   : > { %1053 = vmatmul.f32.gmra.mxu0 %v2890_v28  ;;  %1377 = vmatpush.msra.mxu3 %v1886_v49  ;;  %v2918_v28 = vpop.f32.mrf.mxu0 }
  0xc7   : > { %1264 = vmatpush.msra.mxu2 %v1869_v2  ;;  %v2939_v2 = vld [vmem:[%s2133_s19 + $0x99] sm:$0xff]  ;;  %1135 = vmatpush.msra.mxu1 %v1852_v47  ;;  %v856_v47 = vmul.f32 %v2792_v6, %v2687_v0 }
  0xc8   : > { %v2907_v51 = vpop.permute.xlu1 %707 }
  0xc9   : > { %v2911_v38 = vmul.f32 %v2905_v11, %v2907_v51  ;;  %v2913_v54 = vpop.permute.xlu0 %395 }
  0xca   : > { %v2922_v49 = vmul.f32 %v2902_v25, %v2913_v54 }
  0xcb   : > { %3318 = vst [vmem:[#allocation21_spill] sm:$0xff] %v2911_v38  ;;  %v1463_v38 = vmul.f32 %v2463_v10, %v2519_v31  ;;  %v1868_v31 = vld [vmem:[%s3289_s1 + $0x310] sm:$0xff] }
  0xcc   : > { %3319 = vst [vmem:[#allocation22_spill] sm:$0xff] %v2922_v49  ;;  %578 = vmatmul.f32.gmra.mxu1 %v416_v21  ;;  %v1885_v49 = vld [vmem:[%s3289_s1 + $0x398] sm:$0xff]  ;;  %1265 = vmatpush.msra.mxu2 %v1868_v31  ;;  %v855_v31 = vmul.f32 %v2585_v63, %v2834_v57 }
  0xcd   : > { %791 = vmatmul.f32.gmra.mxu2 %v724_v41  ;;  %918 = vmatmul.f32.gmra.mxu3 %v853_v32  ;;  %v725_v41 = vmul.f32 %v2739_v45, %v2633_v35 }
  0xce   : > { %1512 = vmatmul.f32.vlgmr.msra.gmra.mxu0 %v1463_v38  ;;  %1378 = vmatpush.msra.mxu3 %v1885_v49  ;;  %v854_v38 = vmul.f32 %v2756_v52, %v2789_v42  ;;  %v1464_v49 = vmul.f32 %v2512_v53, %v2604_v15  ;;  %v2958_v21 = vpop.f32.mrf.mxu0  ;;  %v1867_v53 = vld [vmem:[%s3289_s1 + $0x308] sm:$0xff]  ;;  %v418_v15 = vmul.f32 %v2692_v14, %v2834_v57  ;;  %v2985_v57 = vpop.f32.mrf.mxu2 }
  0xcf   : > { %v726_v42 = vmul.f32 %v2795_v59, %v2828_v44  ;;  %1266 = vmatpush.msra.mxu2 %v1867_v53  ;;  %v1851_v14 = vld [vmem:[%s3289_s1 + $0x288] sm:$0xff]  ;;  %v1466_v53 = vmul.f32 %v2638_v39, %v2601_v9  ;;  %v420_v9 = vmul.f32 %v2585_v63, %v2864_v50  ;;  %v728_v39 = vmul.f32 %v2826_v29, %v2741_v8 }
  0xd0   : > { %1379 = vmatpush.msra.mxu3 %v1884_v26  ;;  %1136 = vmatpush.msra.mxu1 %v1851_v14  ;;  %v727_v26 = vmul.f32 %v2628_v33, %v2876_v56  ;;  %v421_v63 = vmul.f32 %v2792_v6, %v2913_v54  ;;  %v3038_v6 = vpop.permute.xlu2 %400 }
  0xd1   : > { %v2941_v10 = vpop.permute.xlu0 %712 }
  0xd2   : > { %v2948_v32 = vmul.f32 %v2939_v2, %v2941_v10 }
  0xd4   : > { %581 = vmatmul.f32.gmra.mxu1 %v417_v1  ;;  %v1465_v1 = vmul.f32 %v2486_v17, %v2426_v60  ;;  %v1866_v60 = vld [vmem:[%s3289_s1 + $0x300] sm:$0xff]  ;;  %v419_v17 = vmul.f32 %v2756_v52, %v2687_v0  ;;  %v3008_v0 = vpop.f32.mrf.mxu3 }
  0xd5   : > { %794 = vmatmul.f32.gmra.mxu2 %v725_v41  ;;  %921 = vmatmul.f32.gmra.mxu3 %v854_v38  ;;  %v1883_v41 = vld [vmem:[%s3289_s1 + $0x388] sm:$0xff]  ;;  %v1850_v52 = vld [vmem:[%s3289_s1 + $0x280] sm:$0xff] }
  0xd6   : > { %1515 = vmatmul.f32.gmra.mxu0 %v1464_v49  ;;  %v2983_v38 = vpop.f32.mrf.mxu0  ;;  %1380 = vmatpush.msra.mxu3 %v1883_v41  ;;  %v2987_v49 = vpop.f32.mrf.mxu1  ;;  %v857_v41 = vmul.f32 %v2837_v22, %v2864_v50  ;;  %v858_v50 = vmul.f32 %v2679_v61, %v2913_v54 }
  0xd7   : > { %1267 = vmatpush.msra.mxu2 %v1866_v60  ;;  %1137 = vmatpush.msra.mxu1 %v1850_v52 }
  0xdc   : > { %584 = vmatmul.f32.gmra.mxu1 %v418_v15  ;;  %v1882_v15 = vld [vmem:[%s3289_s1 + $0x380] sm:$0xff] }
  0xdd   : > { %797 = vmatmul.f32.gmra.mxu2 %v726_v42  ;;  %924 = vmatmul.f32.gmra.mxu3 %v855_v31  ;;  %v3010_v31 = vpop.f32.mrf.mxu2 }
  0xde   : > { %1518 = vmatmul.f32.gmra.mxu0 %v1465_v1  ;;  %1381 = vmatpush.msra.mxu3 %v1882_v15  ;;  %v3006_v42 = vpop.f32.mrf.mxu0  ;;  %v1467_v1 = vmul.f32 %v2695_v16, %v2488_v18  ;;  %v3020_v14 = vpop.f32.mrf.mxu1  ;;  %v1468_v18 = vmul.f32 %v2548_v43, %v2635_v37  ;;  %v730_v15 = vmul.f32 %v2733_v30, %v2941_v10 }
  0xdf   : > { %v1469_v43 = vmul.f32 %v2739_v45, %v2705_v27  ;;  %v859_v37 = vmul.f32 %v2867_v3, %v3038_v6  ;;  %v1470_v45 = vmul.f32 %v2795_v59, %v2555_v46 }
  0xe4   : > { %587 = vmatmul.f32.gmra.mxu1 %v419_v17  ;;  %v729_v17 = vmul.f32 %v2870_v7, %v2907_v51 }
  0xe5   : > { %800 = vmatmul.f32.gmra.mxu2 %v727_v26  ;;  %927 = vmatmul.f32.gmra.mxu3 %v856_v47  ;;  %v3028_v26 = vpop.f32.mrf.mxu3  ;;  %v3034_v16 = vpop.f32.mrf.mxu2 }
  0xe6   : > { %1521 = vmatmul.f32.gmra.mxu0 %v1466_v53  ;;  %v3022_v60 = vpop.f32.mrf.mxu0  ;;  %v3036_v47 = vpop.f32.mrf.mxu1  ;;  %v422_v53 = vmul.f32 %v2837_v22, %v3038_v6 }
  0xe7   : > { %v3054_v22 = vpop.permute.xlu1 %405 }
  0xe8   : > { %v423_v27 = vmul.f32 %v2679_v61, %v3054_v22  ;;  %v860_v3 = vmul.f32 %v2902_v25, %v3054_v22  ;;  %v1471_v61 = vmul.f32 %v2628_v33, %v2743_v62  ;;  %v1472_v33 = vmul.f32 %v2826_v29, %v2801_v40 }
  0xe9   : > { %v1473_v40 = vmul.f32 %v2870_v7, %v2633_v35 }
  0xec   : > { %590 = vmatmul.f32.gmra.mxu1 %v420_v9 }
  0xed   : > { %803 = vmatmul.f32.gmra.mxu2 %v728_v39  ;;  %930 = vmatmul.f32.gmra.mxu3 %v857_v41  ;;  %v3050_v52 = vpop.f32.mrf.mxu3  ;;  %v3052_v9 = vpop.f32.mrf.mxu2 }
  0xee   : > { %1524 = vmatmul.f32.gmra.mxu0 %v1467_v1  ;;  %v3048_v54 = vpop.f32.mrf.mxu0  ;;  %v3056_v39 = vpop.f32.mrf.mxu1 }
  0xf4   : > { %593 = vmatmul.f32.gmra.mxu1 %v421_v63 }
  0xf5   : > { %806 = vmatmul.f32.gmra.mxu2 %v729_v17  ;;  %933 = vmatmul.f32.gmra.mxu3 %v858_v50  ;;  %v3067_v41 = vpop.f32.mrf.mxu3 }
  0xf6   : > { %1527 = vmatmul.f32.gmra.mxu0 %v1468_v18  ;;  %v3065_v1 = vpop.f32.mrf.mxu0  ;;  %v1333_v18 = vld [vmem:[%s2133_s19 + $0x30] sm:$0xff] }
  0xfc   : > { %596 = vmatmul.f32.gmra.mxu1 %v422_v53 }
  0xfd   : > { %809 = vmatmul.f32.gmra.mxu2 %v730_v15  ;;  %936 = vmatmul.f32.gmra.mxu3 %v859_v37 }
  0xfe   : > { %1530 = vmatmul.f32.gmra.mxu0 %v1469_v43  ;;  %v3075_v59 = vpop.f32.mrf.mxu0  ;;  %v1334_v43 = vld [vmem:[%s2133_s19 + $0x38] sm:$0xff] }
 0x104   : > { %599 = vmatmul.f32.gmra.mxu1 %v423_v27 }
 0x105   : > { %1268 = vmatmul.f32.vlgmr.msra.gmra.mxu2 %v2566_v55  ;;  %939 = vmatmul.f32.gmra.mxu3 %v860_v3  ;;  %v1335_v3 = vld [vmem:[%s2133_s19 + $0x40] sm:$0xff] }
 0x106   : > { %1533 = vmatmul.f32.gmra.mxu0 %v1470_v45  ;;  %v3087_v45 = vpop.f32.mrf.mxu0 }
 0x107   : > { %v765_v63 = vpop.f32.mrf.mxu2 }
 0x109   : > { %v555_v17 = vpop.f32.mrf.mxu1 }
 0x10a   : > { %v556_v46 = vadd.f32 %v555_v17, %v2774_v23 }
 0x10c   : > { %1138 = vmatmul.f32.vlgmr.msra.gmra.mxu1 %v2527_v34  ;;  %v813_v25 = vadd.f32 %v765_v63, %v556_v46 }
 0x10d   : > { %1271 = vmatmul.f32.gmra.mxu2 %v2572_v58  ;;  %1382 = vmatmul.f32.vlgmr.msra.gmra.mxu3 %v1333_v18  ;;  %v1336_v18 = vld [vmem:[%s2133_s19 + $0x48] sm:$0xff] }
 0x10e   : > { %1536 = vmatmul.f32.gmra.mxu0 %v1471_v61  ;;  %v1474_v61 = vmul.f32 %v2733_v30, %v2828_v44  ;;  %v1475_v30 = vmul.f32 %v2905_v11, %v2876_v56  ;;  %v1476_v56 = vmul.f32 %v2939_v2, %v2741_v8  ;;  %v3321_v11 = vld [vmem:[#allocation6_spill] sm:$0xff] }
 0x10f   : > { %v768_v55 = vpop.f32.mrf.mxu2  ;;  %v1339_v8 = vld [vmem:[%s2133_s19 + $0x60] sm:$0xff] }
 0x110   : > { %v895_v50 = vpop.f32.mrf.mxu3 }
 0x111   : > { %v3077_v53 = vadd.f32 %v895_v50, %v813_v25  ;;  %v558_v15 = vpop.f32.mrf.mxu1  ;;  %v1337_v25 = vld [vmem:[%s2133_s19 + $0x50] sm:$0xff] }
 0x112   : > { %v559_v23 = vadd.f32 %v558_v15, %v2823_v5 }
 0x114   : > { %1141 = vmatmul.f32.gmra.mxu1 %v2534_v36  ;;  %v814_v58 = vadd.f32 %v768_v55, %v559_v23  ;;  %v1338_v23 = vld [vmem:[%s2133_s19 + $0x58] sm:$0xff] }
 0x115   : > { %1274 = vmatmul.f32.gmra.mxu2 %v2470_v12  ;;  %1385 = vmatmul.f32.gmra.mxu3 %v1334_v43 }
 0x116   : > { %1539 = vmatmul.f32.gmra.mxu0 %v1472_v33 }
 0x117   : > { %v771_v34 = vpop.f32.mrf.mxu2 }
 0x118   : > { %v898_v62 = vpop.f32.mrf.mxu3 }
 0x119   : > { %v3085_v37 = vadd.f32 %v898_v62, %v814_v58  ;;  %v561_v27 = vpop.f32.mrf.mxu1  ;;  %v1461_v62 = vld [vmem:[%s2133_s19 + $0xa1] sm:$0xff] }
 0x11a   : > { %v562_v5 = vadd.f32 %v561_v27, %v2862_v4  ;;  %v3101_v4 = vpop.f32.mrf.mxu0  ;;  %v1477_v2 = vmul.f32 %v1461_v62, %v2907_v51  ;;  %v1342_v62 = vld [vmem:[%s2133_s19 + $0x78] sm:$0xff] }
 0x11c   : > { %1144 = vmatmul.f32.gmra.mxu1 %v2474_v13  ;;  %v815_v36 = vadd.f32 %v771_v34, %v562_v5 }
 0x11d   : > { %1277 = vmatmul.f32.gmra.mxu2 %v2611_v20  ;;  %1388 = vmatmul.f32.gmra.mxu3 %v1335_v3 }
 0x11e   : > { %1542 = vmatmul.f32.gmra.mxu0 %v1473_v40 }
 0x11f   : > { %v774_v12 = vpop.f32.mrf.mxu2 }
 0x120   : > { %v901_v29 = vpop.f32.mrf.mxu3 }
 0x121   : > { %v3095_v63 = vadd.f32 %v901_v29, %v815_v36  ;;  %v564_v17 = vpop.f32.mrf.mxu1  ;;  %v3324_v36 = vld [vmem:[#allocation12_spill] sm:$0xff] }
 0x122   : > { %v565_v35 = vadd.f32 %v564_v17, %v2918_v28 }
 0x124   : > { %1147 = vmatmul.f32.gmra.mxu1 %v2615_v24  ;;  %v816_v20 = vadd.f32 %v774_v12, %v565_v35  ;;  %v3320_v24 = vld [vmem:[#allocation2_spill] sm:$0xff]  ;;  %v3323_v12 = vld [vmem:[#allocation9_spill] sm:$0xff] }
 0x125   : > { %1280 = vmatmul.f32.gmra.mxu2 %v2655_v48  ;;  %1391 = vmatmul.f32.gmra.mxu3 %v1336_v18  ;;  %v3113_v48 = vpop.f32.mrf.mxu0  ;;  %v1462_v18 = vld [vmem:[%s2133_s19 + $0xa9] sm:$0xff] }
 0x126   : > { %1545 = vmatmul.f32.gmra.mxu0 %v1474_v61 }
 0x127   : > { %v777_v13 = vpop.f32.mrf.mxu2 }
 0x128   : > { %v904_v7 = vpop.f32.mrf.mxu3 }
 0x129   : > { %v3105_v46 = vadd.f32 %v904_v7, %v816_v20  ;;  %v567_v55 = vpop.f32.mrf.mxu1  ;;  %v1340_v7 = vld [vmem:[%s2133_s19 + $0x68] sm:$0xff] }
 0x12a   : > { %v568_v28 = vadd.f32 %v567_v55, %v2987_v49  ;;  %v3322_v49 = vld [vmem:[#allocation8_spill] sm:$0xff]  ;;  %v3325_v55 = vld [vmem:[#allocation3_spill] sm:$0xff] }
 0x12c   : > { %1150 = vmatmul.f32.gmra.mxu1 %v2492_v19  ;;  %v817_v50 = vadd.f32 %v777_v13, %v568_v28 }
 0x12d   : > { %1283 = vmatmul.f32.gmra.mxu2 %v3320_v24  ;;  %1394 = vmatmul.f32.gmra.mxu3 %v1337_v25  ;;  %v3124_v27 = vpop.f32.mrf.mxu0  ;;  %v3326_v25 = vld [vmem:[#allocation4_spill] sm:$0xff] }
 0x12e   : > { %1548 = vmatmul.f32.gmra.mxu0 %v1475_v30 }
 0x12f   : > { %v780_v44 = vpop.f32.mrf.mxu2 }
 0x130   : > { %v907_v15 = vpop.f32.mrf.mxu3 }
 0x131   : > { %v3115_v43 = vadd.f32 %v907_v15, %v817_v50  ;;  %v570_v33 = vpop.f32.mrf.mxu1 }
 0x132   : > { %v571_v19 = vadd.f32 %v570_v33, %v3020_v14  ;;  %v1341_v33 = vld [vmem:[%s2133_s19 + $0x70] sm:$0xff] }
 0x134   : > { %1153 = vmatmul.f32.gmra.mxu1 %v3321_v11  ;;  %v818_v58 = vadd.f32 %v780_v44, %v571_v19 }
 0x135   : > { %1286 = vmatmul.f32.gmra.mxu2 %v3322_v49  ;;  %1397 = vmatmul.f32.gmra.mxu3 %v1338_v23  ;;  %v3136_v20 = vpop.f32.mrf.mxu0  ;;  %v3327_v23 = vld [vmem:[#allocation11_spill] sm:$0xff] }
 0x136   : > { %1551 = vmatmul.f32.gmra.mxu0 %v1476_v56 }
 0x137   : > { %v783_v34 = vpop.f32.mrf.mxu2 }
 0x138   : > { %v910_v3 = vpop.f32.mrf.mxu3 }
 0x139   : > { %v3126_v40 = vadd.f32 %v910_v3, %v818_v58  ;;  %v573_v5 = vpop.f32.mrf.mxu1  ;;  %v3329_v3 = vld [vmem:[#allocation14_spill] sm:$0xff] }
 0x13a   : > { %v574_v14 = vadd.f32 %v573_v5, %v3036_v47  ;;  %v1478_v47 = vmul.f32 %v1462_v18, %v2941_v10  ;;  %v3328_v10 = vld [vmem:[#allocation13_spill] sm:$0xff] }
 0x13b   : > { %v3331_v18 = vld [vmem:[#allocation5_spill] sm:$0xff] }
 0x13c   : > { %1156 = vmatmul.f32.gmra.mxu1 %v3323_v12  ;;  %v819_v17 = vadd.f32 %v783_v34, %v574_v14 }
 0x13d   : > { %1289 = vmatmul.f32.gmra.mxu2 %v3324_v36  ;;  %1400 = vmatmul.f32.gmra.mxu3 %v1339_v8 }
 0x13e   : > { %1554 = vmatmul.f32.gmra.mxu0 %v1477_v2 }
 0x140   : > { %v786_v29 = vpop.f32.mrf.mxu2  ;;  %v913_v61 = vpop.f32.mrf.mxu3 }
 0x141   : > { %v3134_v35 = vadd.f32 %v913_v61, %v819_v17  ;;  %v576_v13 = vpop.f32.mrf.mxu1  ;;  %v1343_v17 = vld [vmem:[%s2133_s19 + $0x80] sm:$0xff] }
 0x142   : > { %v577_v51 = vadd.f32 %v576_v13, %v3056_v39  ;;  %v3147_v39 = vpop.f32.mrf.mxu0 }
 0x144   : > { %1159 = vmatmul.f32.gmra.mxu1 %v3325_v55  ;;  %v820_v30 = vadd.f32 %v786_v29, %v577_v51 }
 0x145   : > { %1292 = vmatmul.f32.gmra.mxu2 %v3326_v25  ;;  %1403 = vmatmul.f32.gmra.mxu3 %v1340_v7 }
 0x146   : > { %1557 = vmatmul.f32.gmra.mxu0 %v1478_v47 }
 0x148   : > { %v789_v28 = vpop.f32.mrf.mxu2  ;;  %v916_v24 = vpop.f32.mrf.mxu3 }
 0x149   : > { %v3143_v44 = vadd.f32 %v916_v24, %v820_v30  ;;  %v579_v50 = vpop.f32.mrf.mxu1  ;;  %v1344_v30 = vld [vmem:[%s2133_s19 + $0x88] sm:$0xff] }
 0x14a   : > { %v580_v15 = vadd.f32 %v579_v50, %v2985_v57  ;;  %v3330_v57 = vld [vmem:[#allocation16_spill] sm:$0xff]  ;;  %v3157_v8 = vpop.f32.mrf.mxu0 }
 0x14c   : > { %1162 = vmatmul.f32.gmra.mxu1 %v3327_v23  ;;  %v821_v56 = vadd.f32 %v789_v28, %v580_v15  ;;  %v3333_v28 = vld [vmem:[#allocation15_spill] sm:$0xff] }
 0x14d   : > { %1295 = vmatmul.f32.gmra.mxu2 %v3328_v10  ;;  %1406 = vmatmul.f32.gmra.mxu3 %v1341_v33 }
 0x150   : > { %v792_v19 = vpop.f32.mrf.mxu2  ;;  %v919_v11 = vpop.f32.mrf.mxu3 }
 0x151   : > { %v3151_v49 = vadd.f32 %v919_v11, %v821_v56  ;;  %v582_v34 = vpop.f32.mrf.mxu1 }
 0x152   : > { %v583_v58 = vadd.f32 %v582_v34, %v3010_v31  ;;  %v3332_v31 = vld [vmem:[#allocation7_spill] sm:$0xff]  ;;  %v3165_v51 = vpop.f32.mrf.mxu0  ;;  %v3337_v34 = vld [vmem:[#allocation17_spill] sm:$0xff] }
 0x154   : > { %1165 = vmatmul.f32.gmra.mxu1 %v3329_v3  ;;  %v822_v5 = vadd.f32 %v792_v19, %v583_v58  ;;  %v3335_v19 = vld [vmem:[#allocation19_spill] sm:$0xff]  ;;  %v1217_v58 = vld [vmem:[%s2133_s19 + $0x9f] sm:$0xff] }
 0x155   : > { %1298 = vmatmul.f32.gmra.mxu2 %v3330_v57  ;;  %1409 = vmatmul.f32.gmra.mxu3 %v1342_v62 }
 0x158   : > { %v795_v2 = vpop.f32.mrf.mxu2  ;;  %v922_v14 = vpop.f32.mrf.mxu3 }
 0x159   : > { %v3159_v12 = vadd.f32 %v922_v14, %v822_v5  ;;  %v585_v36 = vpop.f32.mrf.mxu1 }
 0x15a   : > { %v586_v29 = vadd.f32 %v585_v36, %v3034_v16  ;;  %v3334_v16 = vld [vmem:[#allocation18_spill] sm:$0xff]  ;;  %v3175_v10 = vpop.f32.mrf.mxu0 }
 0x15b   : > { %v3338_v36 = vld [vmem:[#allocation10_spill] sm:$0xff] }
 0x15c   : > { %1168 = vmatmul.f32.gmra.mxu1 %v3331_v18  ;;  %v823_v61 = vadd.f32 %v795_v2, %v586_v29  ;;  %v1233_v2 = vmul.f32 %v1217_v58, %v3038_v6  ;;  %v1218_v18 = vld [vmem:[%s2133_s19 + $0xa7] sm:$0xff] }
 0x15d   : > { %1301 = vmatmul.f32.gmra.mxu2 %v3332_v31  ;;  %1412 = vmatmul.f32.gmra.mxu3 %v1343_v17  ;;  %v3339_v17 = vld [vmem:[#allocation20_spill] sm:$0xff] }
 0x160   : > { %v798_v13 = vpop.f32.mrf.mxu2  ;;  %v925_v7 = vpop.f32.mrf.mxu3 }
 0x161   : > { %v3167_v47 = vadd.f32 %v925_v7, %v823_v61  ;;  %v588_v55 = vpop.f32.mrf.mxu1 }
 0x162   : > { %v589_v25 = vadd.f32 %v588_v55, %v3052_v9  ;;  %v3336_v9 = vld [vmem:[#allocation22_spill] sm:$0xff]  ;;  %v1234_v55 = vmul.f32 %v1218_v18, %v3054_v22 }
 0x164   : > { %1171 = vmatmul.f32.gmra.mxu1 %v3333_v28  ;;  %v824_v24 = vadd.f32 %v798_v13, %v589_v25  ;;  %v1347_v25 = vld [vmem:[%s2133_s19 + $0xa0] sm:$0xff] }
 0x165   : > { %1304 = vmatmul.f32.gmra.mxu2 %v3334_v16  ;;  %1415 = vmatmul.f32.gmra.mxu3 %v1344_v30 }
 0x168   : > { %v801_v50 = vpop.f32.mrf.mxu2  ;;  %v928_v15 = vpop.f32.mrf.mxu3 }
 0x169   : > { %v3173_v33 = vadd.f32 %v928_v15, %v824_v24  ;;  %v591_v23 = vpop.f32.mrf.mxu1 }
 0x16a   : > { %v592_v56 = vadd.f32 %v591_v23, %v3008_v0  ;;  %v1513_v0 = vpop.f32.mrf.mxu0 }
 0x16c   : > { %1174 = vmatmul.f32.gmra.mxu1 %v3335_v19  ;;  %v825_v11 = vadd.f32 %v801_v50, %v592_v56  ;;  %v1348_v56 = vld [vmem:[%s2133_s19 + $0xa8] sm:$0xff] }
 0x16d   : > { %1307 = vmatmul.f32.gmra.mxu2 %v3336_v9  ;;  %1418 = vmatmul.f32.gmra.mxu3 %v3337_v34  ;;  %v1057_v34 = vadd.f32 %v2958_v21, %v3077_v53 }
 0x170   : > { %v804_v62 = vpop.f32.mrf.mxu2  ;;  %v931_v3 = vpop.f32.mrf.mxu3 }
 0x171   : > { %v3182_v57 = vadd.f32 %v931_v3, %v825_v11  ;;  %v594_v5 = vpop.f32.mrf.mxu1 }
 0x172   : > { %v595_v14 = vadd.f32 %v594_v5, %v3028_v26  ;;  %v3340_v26 = vld [vmem:[#allocation21_spill] sm:$0xff]  ;;  %v1516_v28 = vpop.f32.mrf.mxu0 }
 0x174   : > { %1177 = vmatmul.f32.gmra.mxu1 %v3338_v36  ;;  %v826_v29 = vadd.f32 %v804_v62, %v595_v14  ;;  %v1058_v14 = vadd.f32 %v2983_v38, %v3085_v37  ;;  %v1059_v38 = vadd.f32 %v3006_v42, %v3095_v63 }
 0x175   : > { %1310 = vmatmul.f32.gmra.mxu2 %v1233_v2  ;;  %1421 = vmatmul.f32.gmra.mxu3 %v3339_v17 }
 0x178   : > { %v807_v31 = vpop.f32.mrf.mxu2  ;;  %v934_v61 = vpop.f32.mrf.mxu3 }
 0x179   : > { %v3189_v13 = vadd.f32 %v934_v61, %v826_v29  ;;  %v597_v7 = vpop.f32.mrf.mxu1 }
 0x17a   : > { %v598_v6 = vadd.f32 %v597_v7, %v3050_v52  ;;  %v1519_v19 = vpop.f32.mrf.mxu0 }
 0x17c   : > { %1180 = vmatmul.f32.gmra.mxu1 %v3340_v26  ;;  %v827_v30 = vadd.f32 %v807_v31, %v598_v6 }
 0x17d   : > { %1313 = vmatmul.f32.gmra.mxu2 %v1234_v55  ;;  %1424 = vmatmul.f32.gmra.mxu3 %v1347_v25 }
 0x180   : > { %v810_v16 = vpop.f32.mrf.mxu2  ;;  %v937_v24 = vpop.f32.mrf.mxu3 }
 0x181   : > { %v3195_v50 = vadd.f32 %v937_v24, %v827_v30  ;;  %v600_v15 = vpop.f32.mrf.mxu1 }
 0x182   : > { %v601_v23 = vadd.f32 %v600_v15, %v3067_v41  ;;  %v1522_v29 = vpop.f32.mrf.mxu0 }
 0x184   : > { %1183 = vmatmul.f32.gmra.mxu1 %v2948_v32  ;;  %v828_v22 = vadd.f32 %v810_v16, %v601_v23  ;;  %v3208_v32 = vld [vmem:[%s3290_s2] ss:$0 sm:$0xff] }
 0x185   : > { %1427 = vmatmul.f32.gmra.mxu3 %v1348_v56 }
 0x188   : > { %v1269_v52 = vpop.f32.mrf.mxu2  ;;  %v940_v9 = vpop.f32.mrf.mxu3 }
 0x189   : > { %v3200_v11 = vadd.f32 %v940_v9, %v828_v22  ;;  %v1139_v58 = vpop.f32.mrf.mxu1 }
 0x18a   : > { %v1187_v62 = vadd.f32 %v1139_v58, %v1057_v34  ;;  %v1525_v6 = vpop.f32.mrf.mxu0 }
 0x18c   : > { %v1317_v5 = vadd.f32 %v1269_v52, %v1187_v62  ;;  %v1060_v52 = vadd.f32 %v3022_v60, %v3105_v46 }
 0x190   : > { %v1272_v3 = vpop.f32.mrf.mxu2  ;;  %v1383_v2 = vpop.f32.mrf.mxu3 }
 0x191   : > { %v1431_v41 = vadd.f32 %v1383_v2, %v1317_v5  ;;  %v1142_v36 = vpop.f32.mrf.mxu1 }
 0x192   : > { %v1188_v18 = vadd.f32 %v1142_v36, %v1058_v14  ;;  %v1528_v34 = vpop.f32.mrf.mxu0  ;;  %v1061_v36 = vadd.f32 %v3048_v54, %v3115_v43 }
 0x193   : > { %v1561_v17 = vadd.f32 %v1513_v0, %v1431_v41 }
 0x194   : > { %v1318_v31 = vadd.f32 %v1272_v3, %v1188_v18 }
 0x195   : > { %v1581_v21 = vadd.f32 %v3208_v32, %v1561_v17 }
 0x197   : > { %1597 = vst [vmem:[%s3215_s22] sm:$0xff] %v1581_v21  ;;  %v1635_v26 = vmul.f32 %v1581_v21, %v1581_v21 }
 0x198   : > { %v1275_v53 = vpop.f32.mrf.mxu2  ;;  %v1386_v61 = vpop.f32.mrf.mxu3 }
 0x199   : > { %v1432_v7 = vadd.f32 %v1386_v61, %v1318_v31  ;;  %v1145_v37 = vpop.f32.mrf.mxu1 }
 0x19a   : > { %v1189_v55 = vadd.f32 %v1145_v37, %v1059_v38  ;;  %v1531_v61 = vpop.f32.mrf.mxu0 }
 0x19b   : > { %v1562_v0 = vadd.f32 %v1516_v28, %v1432_v7 }
 0x19c   : > { %v1319_v15 = vadd.f32 %v1275_v53, %v1189_v55 }
 0x19d   : > { %v1582_v25 = vadd.f32 %v3208_v32, %v1562_v0  ;;  %v1062_v0 = vadd.f32 %v3065_v1, %v3126_v40 }
 0x19f   : > { %1598 = vst [vmem:[%s3215_s22 + $0x8] sm:$0xff] %v1582_v25  ;;  %v1613_v30 = vadd.f32 %v1582_v25, %v1581_v21  ;;  %v1636_v16 = vmul.f32 %v1582_v25, %v1582_v25 }
 0x1a0   : > { %v1278_v24 = vpop.f32.mrf.mxu2  ;;  %v1389_v23 = vpop.f32.mrf.mxu3 }
 0x1a1   : > { %v1651_v56 = vadd.f32 %v1636_v16, %v1635_v26  ;;  %v1433_v22 = vadd.f32 %v1389_v23, %v1319_v15  ;;  %v1148_v42 = vpop.f32.mrf.mxu1 }
 0x1a2   : > { %v1190_v28 = vadd.f32 %v1148_v42, %v1060_v52  ;;  %v1534_v52 = vpop.f32.mrf.mxu0 }
 0x1a3   : > { %v1563_v63 = vadd.f32 %v1519_v19, %v1433_v22 }
 0x1a4   : > { %v1320_v5 = vadd.f32 %v1278_v24, %v1190_v28 }
 0x1a5   : > { %v1583_v9 = vadd.f32 %v3208_v32, %v1563_v63 }
 0x1a7   : > { %1599 = vst [vmem:[%s3215_s22 + $0x10] sm:$0xff] %v1583_v9  ;;  %v1614_v58 = vadd.f32 %v1613_v30, %v1583_v9  ;;  %v1637_v62 = vmul.f32 %v1583_v9, %v1583_v9 }
 0x1a8   : > { %v1281_v3 = vpop.f32.mrf.mxu2  ;;  %v1392_v2 = vpop.f32.mrf.mxu3 }
 0x1a9   : > { %v1652_v41 = vadd.f32 %v1651_v56, %v1637_v62  ;;  %v1434_v14 = vadd.f32 %v1392_v2, %v1320_v5  ;;  %v1151_v17 = vpop.f32.mrf.mxu1  ;;  %v1063_v56 = vadd.f32 %v3075_v59, %v3134_v35  ;;  %v1064_v5 = vadd.f32 %v3087_v45, %v3143_v44 }
 0x1aa   : > { %v1191_v46 = vadd.f32 %v1151_v17, %v1061_v36 }
 0x1ab   : > { %v1564_v60 = vadd.f32 %v1522_v29, %v1434_v14 }
 0x1ac   : > { %v1321_v31 = vadd.f32 %v1281_v3, %v1191_v46 }
 0x1ad   : > { %v1584_v19 = vadd.f32 %v3208_v32, %v1564_v60 }
 0x1af   : > { %1600 = vst [vmem:[%s3215_s22 + $0x18] sm:$0xff] %v1584_v19  ;;  %v1615_v18 = vadd.f32 %v1614_v58, %v1584_v19  ;;  %v1638_v21 = vmul.f32 %v1584_v19, %v1584_v19 }
 0x1b0   : > { %v1284_v53 = vpop.f32.mrf.mxu2  ;;  %v1395_v7 = vpop.f32.mrf.mxu3 }
 0x1b1   : > { %v1653_v38 = vadd.f32 %v1652_v41, %v1638_v21  ;;  %v1435_v37 = vadd.f32 %v1395_v7, %v1321_v31  ;;  %v1154_v55 = vpop.f32.mrf.mxu1  ;;  %v1537_v41 = vpop.f32.mrf.mxu0  ;;  %v1065_v21 = vadd.f32 %v3101_v4, %v3151_v49 }
 0x1b2   : > { %v1192_v43 = vadd.f32 %v1154_v55, %v1062_v0 }
 0x1b3   : > { %v1565_v54 = vadd.f32 %v1525_v6, %v1435_v37 }
 0x1b4   : > { %v1322_v16 = vadd.f32 %v1284_v53, %v1192_v43 }
 0x1b5   : > { %v1585_v29 = vadd.f32 %v3208_v32, %v1565_v54 }
 0x1b7   : > { %1601 = vst [vmem:[%s3215_s22 + $0x20] sm:$0xff] %v1585_v29  ;;  %v1616_v25 = vadd.f32 %v1615_v18, %v1585_v29  ;;  %v1639_v26 = vmul.f32 %v1585_v29, %v1585_v29  ;;  %v1066_v29 = vadd.f32 %v3113_v48, %v3159_v12 }
 0x1b8   : > { %v1287_v30 = vpop.f32.mrf.mxu2  ;;  %v1398_v24 = vpop.f32.mrf.mxu3 }
 0x1b9   : > { %v1654_v15 = vadd.f32 %v1653_v38, %v1639_v26  ;;  %v1436_v23 = vadd.f32 %v1398_v24, %v1322_v16  ;;  %v1157_v22 = vpop.f32.mrf.mxu1 }
 0x1ba   : > { %v1193_v40 = vadd.f32 %v1157_v22, %v1063_v56 }
 0x1bb   : > { %v1566_v1 = vadd.f32 %v1528_v34, %v1436_v23 }
 0x1bc   : > { %v1323_v9 = vadd.f32 %v1287_v30, %v1193_v40 }
 0x1bd   : > { %v1586_v6 = vadd.f32 %v3208_v32, %v1566_v1  ;;  %v1067_v1 = vadd.f32 %v3124_v27, %v3167_v47 }
 0x1bf   : > { %1602 = vst [vmem:[%s3215_s22 + $0x28] sm:$0xff] %v1586_v6  ;;  %v1617_v42 = vadd.f32 %v1616_v25, %v1586_v6  ;;  %v1640_v63 = vmul.f32 %v1586_v6, %v1586_v6 }
 0x1c0   : > { %v1290_v28 = vpop.f32.mrf.mxu2  ;;  %v1401_v58 = vpop.f32.mrf.mxu3 }
 0x1c1   : > { %v1655_v62 = vadd.f32 %v1654_v15, %v1640_v63  ;;  %v1437_v3 = vadd.f32 %v1401_v58, %v1323_v9  ;;  %v1160_v2 = vpop.f32.mrf.mxu1 }
 0x1c2   : > { %v1194_v35 = vadd.f32 %v1160_v2, %v1064_v5  ;;  %v1068_v5 = vadd.f32 %v3136_v20, %v3173_v33 }
 0x1c3   : > { %v1567_v59 = vadd.f32 %v1531_v61, %v1437_v3  ;;  %v1540_v61 = vpop.f32.mrf.mxu0 }
 0x1c4   : > { %v1324_v60 = vadd.f32 %v1290_v28, %v1194_v35 }
 0x1c5   : > { %v1587_v34 = vadd.f32 %v3208_v32, %v1567_v59 }
 0x1c7   : > { %1603 = vst [vmem:[%s3215_s22 + $0x30] sm:$0xff] %v1587_v34  ;;  %v1618_v14 = vadd.f32 %v1617_v42, %v1587_v34  ;;  %v1641_v36 = vmul.f32 %v1587_v34, %v1587_v34 }
 0x1c8   : > { %v1293_v17 = vpop.f32.mrf.mxu2  ;;  %v1404_v46 = vpop.f32.mrf.mxu3 }
 0x1c9   : > { %v1656_v19 = vadd.f32 %v1655_v62, %v1641_v36  ;;  %v1438_v18 = vadd.f32 %v1404_v46, %v1324_v60  ;;  %v1163_v53 = vpop.f32.mrf.mxu1 }
 0x1ca   : > { %v1195_v44 = vadd.f32 %v1163_v53, %v1065_v21 }
 0x1cb   : > { %v1568_v45 = vadd.f32 %v1534_v52, %v1438_v18  ;;  %v1543_v23 = vpop.f32.mrf.mxu0 }
 0x1cc   : > { %v1325_v0 = vadd.f32 %v1293_v17, %v1195_v44 }
 0x1cd   : > { %v1588_v31 = vadd.f32 %v3208_v32, %v1568_v45 }
 0x1cf   : > { %1604 = vst [vmem:[%s3215_s22 + $0x38] sm:$0xff] %v1588_v31  ;;  %v1619_v7 = vadd.f32 %v1618_v14, %v1588_v31  ;;  %v1642_v38 = vmul.f32 %v1588_v31, %v1588_v31 }
 0x1d0   : > { %v1296_v37 = vpop.f32.mrf.mxu2  ;;  %v1407_v55 = vpop.f32.mrf.mxu3 }
 0x1d1   : > { %v1657_v54 = vadd.f32 %v1656_v19, %v1642_v38  ;;  %v1439_v43 = vadd.f32 %v1407_v55, %v1325_v0  ;;  %v1166_v25 = vpop.f32.mrf.mxu1  ;;  %v1069_v19 = vadd.f32 %v3147_v39, %v3182_v57 }
 0x1d2   : > { %v1196_v49 = vadd.f32 %v1166_v25, %v1066_v29 }
 0x1d3   : > { %v1569_v4 = vadd.f32 %v1537_v41, %v1439_v43  ;;  %v1546_v59 = vpop.f32.mrf.mxu0 }
 0x1d4   : > { %v1326_v15 = vadd.f32 %v1296_v37, %v1196_v49  ;;  %v1070_v37 = vadd.f32 %v3157_v8, %v3189_v13 }
 0x1d5   : > { %v1589_v26 = vadd.f32 %v3208_v32, %v1569_v4 }
 0x1d7   : > { %1605 = vst [vmem:[%s3215_s22 + $0x40] sm:$0xff] %v1589_v26  ;;  %v1620_v30 = vadd.f32 %v1619_v7, %v1589_v26  ;;  %v1643_v16 = vmul.f32 %v1589_v26, %v1589_v26 }
 0x1d8   : > { %v1299_v24 = vpop.f32.mrf.mxu2  ;;  %v1410_v56 = vpop.f32.mrf.mxu3 }
 0x1d9   : > { %v1658_v22 = vadd.f32 %v1657_v54, %v1643_v16  ;;  %v1440_v52 = vadd.f32 %v1410_v56, %v1326_v15  ;;  %v1169_v40 = vpop.f32.mrf.mxu1  ;;  %v1071_v16 = vadd.f32 %v3165_v51, %v3195_v50 }
 0x1da   : > { %v1197_v12 = vadd.f32 %v1169_v40, %v1067_v1 }
 0x1db   : > { %v1570_v48 = vadd.f32 %v1540_v61, %v1440_v52  ;;  %v1549_v21 = vpop.f32.mrf.mxu0 }
 0x1dc   : > { %v1327_v9 = vadd.f32 %v1299_v24, %v1197_v12 }
 0x1dd   : > { %v1590_v6 = vadd.f32 %v3208_v32, %v1570_v48 }
 0x1df   : > { %1606 = vst [vmem:[%s3215_s22 + $0x48] sm:$0xff] %v1590_v6  ;;  %v1621_v42 = vadd.f32 %v1620_v30, %v1590_v6  ;;  %v1644_v63 = vmul.f32 %v1590_v6, %v1590_v6  ;;  %v1072_v6 = vadd.f32 %v3175_v10, %v3200_v11 }
 0x1e0   : > { %v1302_v28 = vpop.f32.mrf.mxu2  ;;  %v1413_v58 = vpop.f32.mrf.mxu3 }
 0x1e1   : > { %v1659_v62 = vadd.f32 %v1658_v22, %v1644_v63  ;;  %v1441_v3 = vadd.f32 %v1413_v58, %v1327_v9  ;;  %v1172_v2 = vpop.f32.mrf.mxu1 }
 0x1e2   : > { %v1198_v47 = vadd.f32 %v1172_v2, %v1068_v5 }
 0x1e3   : > { %v1571_v27 = vadd.f32 %v1543_v23, %v1441_v3  ;;  %v1552_v43 = vpop.f32.mrf.mxu0 }
 0x1e4   : > { %v1328_v14 = vadd.f32 %v1302_v28, %v1198_v47 }
 0x1e5   : > { %v1591_v35 = vadd.f32 %v3208_v32, %v1571_v27 }
 0x1e7   : > { %1607 = vst [vmem:[%s3215_s22 + $0x50] sm:$0xff] %v1591_v35  ;;  %v1622_v41 = vadd.f32 %v1621_v42, %v1591_v35  ;;  %v1645_v34 = vmul.f32 %v1591_v35, %v1591_v35 }
 0x1e8   : > { %v1305_v36 = vpop.f32.mrf.mxu2  ;;  %v1416_v17 = vpop.f32.mrf.mxu3 }
 0x1e9   : > { %v1660_v60 = vadd.f32 %v1659_v62, %v1645_v34  ;;  %v1442_v46 = vadd.f32 %v1416_v17, %v1328_v14  ;;  %v1175_v18 = vpop.f32.mrf.mxu1 }
 0x1ea   : > { %v1199_v33 = vadd.f32 %v1175_v18, %v1069_v19 }
 0x1eb   : > { %v1572_v20 = vadd.f32 %v1546_v59, %v1442_v46  ;;  %v1555_v1 = vpop.f32.mrf.mxu0 }
 0x1ec   : > { %v1329_v31 = vadd.f32 %v1305_v36, %v1199_v33 }
 0x1ed   : > { %v1592_v53 = vadd.f32 %v3208_v32, %v1572_v20 }
 0x1ef   : > { %1608 = vst [vmem:[%s3215_s22 + $0x58] sm:$0xff] %v1592_v53  ;;  %v1623_v45 = vadd.f32 %v1622_v41, %v1592_v53  ;;  %v1646_v44 = vmul.f32 %v1592_v53, %v1592_v53 }
 0x1f0   : > { %v1419_v61 = vpop.f32.mrf.mxu3  ;;  %v1308_v55 = vpop.f32.mrf.mxu2 }
 0x1f1   : > { %v1661_v7 = vadd.f32 %v1660_v60, %v1646_v44  ;;  %v1443_v38 = vadd.f32 %v1419_v61, %v1329_v31  ;;  %v1178_v0 = vpop.f32.mrf.mxu1 }
 0x1f2   : > { %v1200_v57 = vadd.f32 %v1178_v0, %v1070_v37 }
 0x1f3   : > { %v1573_v39 = vadd.f32 %v1549_v21, %v1443_v38  ;;  %v1558_v59 = vpop.f32.mrf.mxu0 }
 0x1f4   : > { %v1330_v4 = vadd.f32 %v1308_v55, %v1200_v57 }
 0x1f5   : > { %v1593_v54 = vadd.f32 %v3208_v32, %v1573_v39 }
 0x1f7   : > { %1609 = vst [vmem:[%s3215_s22 + $0x60] sm:$0xff] %v1593_v54  ;;  %v1624_v29 = vadd.f32 %v1623_v45, %v1593_v54  ;;  %v1647_v25 = vmul.f32 %v1593_v54, %v1593_v54 }
 0x1f8   : > { %v1422_v49 = vpop.f32.mrf.mxu3  ;;  %v1311_v15 = vpop.f32.mrf.mxu2 }
 0x1f9   : > { %v1662_v26 = vadd.f32 %v1661_v7, %v1647_v25  ;;  %v1444_v30 = vadd.f32 %v1422_v49, %v1330_v4  ;;  %v1181_v24 = vpop.f32.mrf.mxu1 }
 0x1fa   : > { %v1201_v13 = vadd.f32 %v1181_v24, %v1071_v16 }
 0x1fb   : > { %v1574_v8 = vadd.f32 %v1552_v43, %v1444_v30 }
 0x1fc   : > { %v1331_v52 = vadd.f32 %v1311_v15, %v1201_v13 }
 0x1fd   : > { %v1594_v23 = vadd.f32 %v3208_v32, %v1574_v8 }
 0x1ff   : > { %1610 = vst [vmem:[%s3215_s22 + $0x68] sm:$0xff] %v1594_v23  ;;  %v1625_v56 = vadd.f32 %v1624_v29, %v1594_v23  ;;  %v1648_v22 = vmul.f32 %v1594_v23, %v1594_v23 }
 0x200   : > { %v1425_v40 = vpop.f32.mrf.mxu3  ;;  %v1314_v28 = vpop.f32.mrf.mxu2 }
 0x201   : > { %v1663_v48 = vadd.f32 %v1662_v26, %v1648_v22  ;;  %v1445_v12 = vadd.f32 %v1425_v40, %v1331_v52  ;;  %v1184_v51 = vpop.f32.mrf.mxu1 }
 0x202   : > { %v1202_v42 = vadd.f32 %v1184_v51, %v1072_v6 }
 0x203   : > { %v1575_v50 = vadd.f32 %v1555_v1, %v1445_v12 }
 0x204   : > { %v1332_v62 = vadd.f32 %v1314_v28, %v1202_v42 }
 0x205   : > { %v1595_v63 = vadd.f32 %v3208_v32, %v1575_v50 }
 0x207   : > { %1611 = vst [vmem:[%s3215_s22 + $0x70] sm:$0xff] %v1595_v63  ;;  %v1626_v9 = vadd.f32 %v1625_v56, %v1595_v63  ;;  %v1649_v58 = vmul.f32 %v1595_v63, %v1595_v63 }
 0x208   : > { %v1428_v3 = vpop.f32.mrf.mxu3 }
 0x209   : > { %v1664_v5 = vadd.f32 %v1663_v48, %v1649_v58  ;;  %v1446_v2 = vadd.f32 %v1428_v3, %v1332_v62 }
 0x20b   : > { %v1576_v27 = vadd.f32 %v1558_v59, %v1446_v2 }
 0x20d   : > { %v1596_v47 = vadd.f32 %v3208_v32, %v1576_v27 }
 0x20f   : > { %1612 = vst [vmem:[%s3215_s22 + $0x78] sm:$0xff] %v1596_v47  ;;  %v1627_v10 = vadd.f32 %v1626_v9, %v1596_v47  ;;  %v1650_v11 = vmul.f32 %v1596_v47, %v1596_v47 }
 0x211   : > { %v1628_v35 = vrot.slane %v1627_v10, 4  ;;  %v1665_v41 = vadd.f32 %v1664_v5, %v1650_v11 }
 0x213   : > { %v1629_v34 = vadd.f32 %v1628_v35, %v1627_v10  ;;  %v1666_v14 = vrot.slane %v1665_v41, 4 }
 0x215   : > { %v1630_v36 = vrot.slane %v1629_v34, 2  ;;  %v1667_v17 = vadd.f32 %v1666_v14, %v1665_v41 }
 0x217   : > { %v1631_v60 = vadd.f32 %v1630_v36, %v1629_v34  ;;  %v1668_v46 = vrot.slane %v1667_v17, 2 }
 0x219   : > { %v1632_v19 = vrot.slane %v1631_v60, 1  ;;  %v1669_v18 = vadd.f32 %v1668_v46, %v1667_v17 }
 0x21b   : > { %v1633_v20 = vadd.f32 %v1632_v19, %v1631_v60  ;;  %v1670_v32 = vrot.slane %v1669_v18, 1 }
 0x21d   : > { %1634 = vst [vmem:[%s292_s27] sm:$0x1] %v1633_v20  ;;  %v1671_v33 = vadd.f32 %v1670_v32, %v1669_v18 }
 0x21f   : > { %1672 = vst [vmem:[%s295_s30] sm:$0x1] %v1671_v33 }
 0x220 PF: > { %s18_s24 = sadd.s32 1, %s1985_s24  }
 0x221   : > { %p15_p4 = scmp.ge.s32.totalorder %s18_s24, 6  }
 0x223   :  { %17 = sbr.rel (!%p15_p4) target bundleno = 1 (0x1), region = 102 }

</bundles_post_ra>
